<compile_context>
chip_gen: v7x
topology: tpu7x:2x2x1
jax: 0.10.0
libtpu: 0.0.40
codegen_flags: <defaults>
</compile_context>

<pallas_src>
from functools import partial

import jax
import jax.numpy as jnp
from jax import lax
from jax.experimental import pallas as pl
from jax.experimental.pallas import tpu as pltpu

# ---------------- model hyper-parameters (small, consistent with the module) ---
BATCH = 2
SEQ_LENGTH = 8          # seq_length (before registers)
NUM_LAYERS = 2
NUM_HEADS = 4
HIDDEN_DIM = 32
NUM_REGISTERS = 4
MLP_DIM = 64
LN_EPS = 1e-6

S_TOTAL = SEQ_LENGTH + NUM_REGISTERS
HEAD_DIM = HIDDEN_DIM // NUM_HEADS


# ------------------------------ kernel helpers ---------------------------------
def _layernorm(x, w, b, eps=LN_EPS):
    # x: (S, D); w, b: (1, D) — biased variance, matching torch.nn.LayerNorm.
    mean = jnp.mean(x, axis=-1, keepdims=True)
    var = jnp.mean((x - mean) ** 2, axis=-1, keepdims=True)
    return (x - mean) * lax.rsqrt(var + eps) * w + b


def _gelu_exact(x):
    # torch.nn.GELU() default = exact erf formulation.
    return 0.5 * x * (1.0 + lax.erf(x * 0.7071067811865476))


# --------------------------- fully fused Encoder kernel -------------------------
def encoder_kernel(x_ref, pos_ref, reg_ref,
                   ln1_w_ref, ln1_b_ref,
                   wq_ref, bq_ref, wk_ref, bk_ref, wv_ref, bv_ref,
                   wo_ref, bo_ref,
                   ln2_w_ref, ln2_b_ref,
                   w1_ref, b1_ref, w2_ref, b2_ref,
                   lnf_w_ref, lnf_b_ref,
                   o_ref, buf_ref,
                   *, num_layers, num_heads, seq_length):
    D = wq_ref.shape[-1]
    hd = D // num_heads
    n_reg = buf_ref.shape[0] - seq_length

    # ---- pos-embedding add + register concat (staged through a VMEM scratch) ----
    buf_ref[pl.ds(0, seq_length), :] = x_ref[0] + pos_ref[0]
    buf_ref[pl.ds(seq_length, n_reg), :] = reg_ref[0]
    h = buf_ref[...]                                      # (S_total, D)

    # ---- per-head column masks, built ONCE (hoisted out of the layer loop) -------
    col = lax.broadcasted_iota(jnp.int32, (1, D), 1)
    head_masks = [((col >= hh * hd) & (col < (hh + 1) * hd)).astype(jnp.float32)
                  for hh in range(num_heads)]

    # ---- NUM_LAYERS encoder blocks, statically unrolled --------------------------
    for l in range(num_layers):
        # LN1 + multi-head self-attention (pre-norm).
        n1 = _layernorm(h, ln1_w_ref[l], ln1_b_ref[l])
        # Full-width Q/K/V projections (3 MXU pushes; 1/sqrt(hd) pre-folded into
        # wq/bq at init).  Output columns are head-major.
        q = jnp.dot(n1, wq_ref[l], preferred_element_type=jnp.float32) + bq_ref[l]
        k = jnp.dot(n1, wk_ref[l], preferred_element_type=jnp.float32) + bk_ref[l]
        v = jnp.dot(n1, wv_ref[l], preferred_element_type=jnp.float32) + bv_ref[l]

        ctx = None
        for hh in range(num_heads):
            m_h = head_masks[hh]                          # (1, D) — head-h columns
            # scores = Q_h @ K_h^T without transposes or lane slicing: masking Q's
            # non-head columns to zero makes the full-width contraction equal the
            # per-head contraction.
            s = lax.dot_general(q * m_h, k, (((1,), (1,)), ((), ())),
                                preferred_element_type=jnp.float32)       # (S, S)
            s = s - jnp.max(s, axis=-1, keepdims=True)
            p = jnp.exp(s)
            # softmax denominator via EUP approximate reciprocal (free slot).
            p = p * pl.reciprocal(jnp.sum(p, axis=-1, keepdims=True), approx=True)
            # P @ V_h lands head h's context in its own head-major columns; other
            # columns are exactly zero, so the heads just sum — no concat/relayout.
            part = jnp.dot(p, v * m_h, preferred_element_type=jnp.float32)  # (S, D)
            ctx = part if ctx is None else ctx + part

        attn = jnp.dot(ctx, wo_ref[l], preferred_element_type=jnp.float32) + bo_ref[l]
        y = h + attn                                      # residual 1

        # LN2 + MLP (pre-norm).
        n2 = _layernorm(y, ln2_w_ref[l], ln2_b_ref[l])
        m = jnp.dot(n2, w1_ref[l], preferred_element_type=jnp.float32) + b1_ref[l]
        m = _gelu_exact(m)
        m = jnp.dot(m, w2_ref[l], preferred_element_type=jnp.float32) + b2_ref[l]
        h = y + m                                         # residual 2

    # ---- final LayerNorm + register strip ----------------------------------------
    out = _layernorm(h, lnf_w_ref[...], lnf_b_ref[...])
    o_ref[0] = out[0:seq_length, :]


# ------------------------------- Encoder forward ---------------------------------
def encoder_forward(x, params):
    # x: (batch, seq_length, hidden_dim)
    assert x.ndim == 3, "Expected (batch_size, seq_length, hidden_dim)"
    B, S, D = x.shape
    L, M, R = NUM_LAYERS, MLP_DIM, NUM_REGISTERS

    def const_spec(shape):
        n = len(shape)
        return pl.BlockSpec(shape, lambda b, n=n: (0,) * n)

    kernel = partial(encoder_kernel, num_layers=L, num_heads=NUM_HEADS, seq_length=S)
    return pl.pallas_call(
        kernel,
        out_shape=jax.ShapeDtypeStruct((B, S, D), x.dtype),
        grid=(B,),
        in_specs=[
            pl.BlockSpec((1, S, D), lambda b: (b, 0, 0)),      # x
            const_spec((1, S, D)),                             # pos_embedding
            const_spec((1, R, D)),                             # registers
            const_spec((L, 1, D)), const_spec((L, 1, D)),      # ln1 w, b
            const_spec((L, D, D)), const_spec((L, 1, D)),      # wq (pre-T, scaled), bq
            const_spec((L, D, D)), const_spec((L, 1, D)),      # wk, bk
            const_spec((L, D, D)), const_spec((L, 1, D)),      # wv, bv
            const_spec((L, D, D)), const_spec((L, 1, D)),      # wo (pre-T), bo
            const_spec((L, 1, D)), const_spec((L, 1, D)),      # ln2 w, b
            const_spec((L, D, M)), const_spec((L, 1, M)),      # fc1 (pre-T), b1
            const_spec((L, M, D)), const_spec((L, 1, D)),      # fc2 (pre-T), b2
            const_spec((1, D)), const_spec((1, D)),            # final LN w, b
        ],
        out_specs=pl.BlockSpec((1, S, D), lambda b: (b, 0, 0)),
        scratch_shapes=[pltpu.VMEM((S + R, D), jnp.float32)],
        compiler_params=pltpu.CompilerParams(dimension_semantics=("parallel",)),
    )(x, params["pos_embedding"], params["registers"],
      params["ln1_w"], params["ln1_b"],
      params["wq"], params["bq"], params["wk"], params["bk"],
      params["wv"], params["bv"], params["wo"], params["bo"],
      params["ln2_w"], params["ln2_b"],
      params["w1"], params["b1"], params["w2"], params["b2"],
      params["ln_w"], params["ln_b"])


# ------------------------------- parameter setup --------------------------------
def init_params(key):
    D, M, R, L, H = HIDDEN_DIM, MLP_DIM, NUM_REGISTERS, NUM_LAYERS, NUM_HEADS
    hd = D // H
    scale = 1.0 / float(hd) ** 0.5
    keys = iter(jax.random.split(key, 2 + 12 * L))

    def nrm(shape, std=0.02):
        return std * jax.random.normal(next(keys), shape, jnp.float32)

    params = {
        "registers": nrm((1, R, D)),
        "pos_embedding": nrm((1, SEQ_LENGTH, D)),
        "ln_w": jnp.ones((1, D), jnp.float32),
        "ln_b": jnp.zeros((1, D), jnp.float32),
    }
    names = ["ln1_w", "ln1_b", "wq", "bq", "wk", "bk", "wv", "bv", "wo", "bo",
             "ln2_w", "ln2_b", "w1", "b1", "w2", "b2"]
    per = {k: [] for k in names}
    for _ in range(L):
        per["ln1_w"].append(jnp.ones((1, D), jnp.float32))
        per["ln1_b"].append(jnp.zeros((1, D), jnp.float32))
        # PyTorch Linear stores W as (out, in); pre-transpose to (in, out) so the
        # kernel computes x @ W_t + b.  Output features are head-major, so the
        # column range [h*hd, (h+1)*hd) is exactly head h.
        # 1/sqrt(head_dim) is folded into the Q weight + bias (one-time transform).
        per["wq"].append(nrm((D, D)).T * scale)
        per["bq"].append(nrm((1, D)) * scale)
        per["wk"].append(nrm((D, D)).T)
        per["bk"].append(nrm((1, D)))
        per["wv"].append(nrm((D, D)).T)
        per["bv"].append(nrm((1, D)))
        per["wo"].append(nrm((D, D)).T)
        per["bo"].append(nrm((1, D)))
        per["ln2_w"].append(jnp.ones((1, D), jnp.float32))
        per["ln2_b"].append(jnp.zeros((1, D), jnp.float32))
        per["w1"].append(nrm((M, D)).T)
        per["b1"].append(nrm((1, M)))
        per["w2"].append(nrm((D, M)).T)
        per["b2"].append(nrm((1, D)))
    for k in names:
        params[k] = jnp.stack(per[k], axis=0)
    return params


# --------------------------- pure-JAX reference (correctness) --------------------
def encoder_reference(x, params):
    B = x.shape[0]
    D, H = HIDDEN_DIM, NUM_HEADS
    hd = D // H

    def ln(v, w, b):
        mu = jnp.mean(v, axis=-1, keepdims=True)
        var = jnp.mean((v - mu) ** 2, axis=-1, keepdims=True)
        return (v - mu) / jnp.sqrt(var + LN_EPS) * w + b

    h = x + params["pos_embedding"]
    regs = jnp.broadcast_to(params["registers"], (B, NUM_REGISTERS, D))
    h = jnp.concatenate([h, regs], axis=1)
    for l in range(NUM_LAYERS):
        n1 = ln(h, params["ln1_w"][l], params["ln1_b"][l])
        q = n1 @ params["wq"][l] + params["bq"][l]
        k = n1 @ params["wk"][l] + params["bk"][l]
        v = n1 @ params["wv"][l] + params["bv"][l]

        def split(t):
            return t.reshape(B, -1, H, hd).transpose(0, 2, 1, 3)

        qh, kh, vh = split(q), split(k), split(v)
        s = jnp.einsum("bhqd,bhkd->bhqk", qh, kh)     # scale already folded in wq/bq
        p = jax.nn.softmax(s, axis=-1)
        o = jnp.einsum("bhqk,bhkd->bhqd", p, vh)
        o = o.transpose(0, 2, 1, 3).reshape(B, -1, D)
        y = h + o @ params["wo"][l] + params["bo"][l]
        n2 = ln(y, params["ln2_w"][l], params["ln2_b"][l])
        m = n2 @ params["w1"][l] + params["b1"][l]
        m = 0.5 * m * (1.0 + lax.erf(m * 0.7071067811865476))
        m = m @ params["w2"][l] + params["b2"][l]
        h = y + m
    h = ln(h, params["ln_w"], params["ln_b"])
    return h[:, :SEQ_LENGTH, :]


# --------------------------------------- main ------------------------------------
if __name__ == "__main__":
    key = jax.random.PRNGKey(0)
    k_params, k_input = jax.random.split(key)
    params = init_params(k_params)
    x = jax.random.normal(k_input, (BATCH, SEQ_LENGTH, HIDDEN_DIM), jnp.float32)

    out = jax.block_until_ready(encoder_forward(x, params))
    assert out.shape == (BATCH, SEQ_LENGTH, HIDDEN_DIM), out.shape
    assert bool(jnp.all(jnp.isfinite(out)))

    # Tolerance check vs. pure-JAX reference (approx reciprocal changes numerics slightly).
    ref = encoder_reference(x, params)
    assert bool(jnp.allclose(out, ref, atol=2e-2, rtol=2e-2))
    print("KERNEL_OK")
</pallas_src>

<mosaic_0001>
module attributes {stable_mosaic.version = 11 : i64} {
  func.func @encoder_kernel(%arg0: i32, %arg1: memref<1x8x32xf32, #tpu.memory_space<vmem>>, %arg2: memref<1x8x32xf32, #tpu.memory_space<vmem>>, %arg3: memref<1x4x32xf32, #tpu.memory_space<vmem>>, %arg4: memref<2x1x32xf32, #tpu.memory_space<vmem>>, %arg5: memref<2x1x32xf32, #tpu.memory_space<vmem>>, %arg6: memref<2x32x32xf32, #tpu.memory_space<vmem>>, %arg7: memref<2x1x32xf32, #tpu.memory_space<vmem>>, %arg8: memref<2x32x32xf32, #tpu.memory_space<vmem>>, %arg9: memref<2x1x32xf32, #tpu.memory_space<vmem>>, %arg10: memref<2x32x32xf32, #tpu.memory_space<vmem>>, %arg11: memref<2x1x32xf32, #tpu.memory_space<vmem>>, %arg12: memref<2x32x32xf32, #tpu.memory_space<vmem>>, %arg13: memref<2x1x32xf32, #tpu.memory_space<vmem>>, %arg14: memref<2x1x32xf32, #tpu.memory_space<vmem>>, %arg15: memref<2x1x32xf32, #tpu.memory_space<vmem>>, %arg16: memref<2x32x64xf32, #tpu.memory_space<vmem>>, %arg17: memref<2x1x64xf32, #tpu.memory_space<vmem>>, %arg18: memref<2x64x32xf32, #tpu.memory_space<vmem>>, %arg19: memref<2x1x32xf32, #tpu.memory_space<vmem>>, %arg20: memref<1x32xf32, #tpu.memory_space<vmem>>, %arg21: memref<1x32xf32, #tpu.memory_space<vmem>>, %arg22: memref<1x8x32xf32, #tpu.memory_space<vmem>>, %arg23: memref<12x32xf32, #tpu.memory_space<vmem>>) attributes {dimension_semantics = [#tpu.dimension_semantics<parallel>], iteration_bounds = array<i64: 2>, scalar_prefetch = 0 : i64, scratch_operands = 1 : i64, tpu.core_type = #tpu.core_type<tc>, window_params = [{transform_indices = @transform_0, window_bounds = array<i64: 1, 8, 32>}, {pipeline_mode = #tpu.pipeline_mode<synchronous>, transform_indices = @transform_1, window_bounds = array<i64: 1, 8, 32>}, {pipeline_mode = #tpu.pipeline_mode<synchronous>, transform_indices = @transform_2, window_bounds = array<i64: 1, 4, 32>}, {pipeline_mode = #tpu.pipeline_mode<synchronous>, transform_indices = @transform_3, window_bounds = array<i64: 2, 1, 32>}, {pipeline_mode = #tpu.pipeline_mode<synchronous>, transform_indices = @transform_4, window_bounds = array<i64: 2, 1, 32>}, {pipeline_mode = #tpu.pipeline_mode<synchronous>, transform_indices = @transform_5, window_bounds = array<i64: 2, 32, 32>}, {pipeline_mode = #tpu.pipeline_mode<synchronous>, transform_indices = @transform_6, window_bounds = array<i64: 2, 1, 32>}, {pipeline_mode = #tpu.pipeline_mode<synchronous>, transform_indices = @transform_7, window_bounds = array<i64: 2, 32, 32>}, {pipeline_mode = #tpu.pipeline_mode<synchronous>, transform_indices = @transform_8, window_bounds = array<i64: 2, 1, 32>}, {pipeline_mode = #tpu.pipeline_mode<synchronous>, transform_indices = @transform_9, window_bounds = array<i64: 2, 32, 32>}, {pipeline_mode = #tpu.pipeline_mode<synchronous>, transform_indices = @transform_10, window_bounds = array<i64: 2, 1, 32>}, {pipeline_mode = #tpu.pipeline_mode<synchronous>, transform_indices = @transform_11, window_bounds = array<i64: 2, 32, 32>}, {pipeline_mode = #tpu.pipeline_mode<synchronous>, transform_indices = @transform_12, window_bounds = array<i64: 2, 1, 32>}, {pipeline_mode = #tpu.pipeline_mode<synchronous>, transform_indices = @transform_13, window_bounds = array<i64: 2, 1, 32>}, {pipeline_mode = #tpu.pipeline_mode<synchronous>, transform_indices = @transform_14, window_bounds = array<i64: 2, 1, 32>}, {pipeline_mode = #tpu.pipeline_mode<synchronous>, transform_indices = @transform_15, window_bounds = array<i64: 2, 32, 64>}, {pipeline_mode = #tpu.pipeline_mode<synchronous>, transform_indices = @transform_16, window_bounds = array<i64: 2, 1, 64>}, {pipeline_mode = #tpu.pipeline_mode<synchronous>, transform_indices = @transform_17, window_bounds = array<i64: 2, 64, 32>}, {pipeline_mode = #tpu.pipeline_mode<synchronous>, transform_indices = @transform_18, window_bounds = array<i64: 2, 1, 32>}, {pipeline_mode = #tpu.pipeline_mode<synchronous>, transform_indices = @transform_19, window_bounds = array<i64: 1, 32>}, {pipeline_mode = #tpu.pipeline_mode<synchronous>, transform_indices = @transform_20, window_bounds = array<i64: 1, 32>}, {transform_indices = @transform_21, window_bounds = array<i64: 1, 8, 32>}]} {
    %c0 = arith.constant 0 : index
    %c0_0 = arith.constant 0 : index
    %c0_1 = arith.constant 0 : index
    %0 = vector.load %arg1[%c0, %c0_0, %c0_1] : memref<1x8x32xf32, #tpu.memory_space<vmem>>, vector<1x8x32xf32>
    %1 = vector.shape_cast %0 : vector<1x8x32xf32> to vector<8x32xf32>
    %c0_2 = arith.constant 0 : index
    %c0_3 = arith.constant 0 : index
    %c0_4 = arith.constant 0 : index
    %2 = vector.load %arg2[%c0_2, %c0_3, %c0_4] : memref<1x8x32xf32, #tpu.memory_space<vmem>>, vector<1x8x32xf32>
    %3 = vector.shape_cast %2 : vector<1x8x32xf32> to vector<8x32xf32>
    %4 = arith.addf %1, %3 : vector<8x32xf32>
    %c0_5 = arith.constant 0 : index
    %c0_6 = arith.constant 0 : index
    %5 = vector.load %arg23[%c0_5, %c0_6] : memref<12x32xf32, #tpu.memory_space<vmem>>, vector<8x32xf32>
    tpu.vector_store %arg23[%c0_5, %c0_6], %4 {strides = array<i32>} : memref<12x32xf32, #tpu.memory_space<vmem>>, vector<8x32xf32>,
    %c0_7 = arith.constant 0 : index
    %c0_8 = arith.constant 0 : index
    %c0_9 = arith.constant 0 : index
    %6 = vector.load %arg3[%c0_7, %c0_8, %c0_9] : memref<1x4x32xf32, #tpu.memory_space<vmem>>, vector<1x4x32xf32>
    %7 = vector.shape_cast %6 : vector<1x4x32xf32> to vector<4x32xf32>
    %c8 = arith.constant 8 : index
    %c0_10 = arith.constant 0 : index
    %8 = vector.load %arg23[%c8, %c0_10] : memref<12x32xf32, #tpu.memory_space<vmem>>, vector<4x32xf32>
    tpu.vector_store %arg23[%c8, %c0_10], %7 {strides = array<i32>} : memref<12x32xf32, #tpu.memory_space<vmem>>, vector<4x32xf32>,
    %c0_11 = arith.constant 0 : index
    %c0_12 = arith.constant 0 : index
    %9 = vector.load %arg23[%c0_11, %c0_12] : memref<12x32xf32, #tpu.memory_space<vmem>>, vector<12x32xf32>
    %10 = tpu.iota {dimensions = array<i32: 1>} : vector<1x32xi32>
    %c0_i32 = arith.constant 0 : i32
    %11 = vector.broadcast %c0_i32 : i32 to vector<1x32xi32>
    %12 = arith.cmpi sge, %10, %11 : vector<1x32xi32>
    %c8_i32 = arith.constant 8 : i32
    %13 = vector.broadcast %c8_i32 : i32 to vector<1x32xi32>
    %14 = arith.cmpi slt, %10, %13 : vector<1x32xi32>
    %15 = arith.andi %12, %14 : vector<1x32xi1>
    %16 = arith.extui %15 : vector<1x32xi1> to vector<1x32xi32>
    %17 = arith.sitofp %16 : vector<1x32xi32> to vector<1x32xf32>
    %c8_i32_13 = arith.constant 8 : i32
    %18 = vector.broadcast %c8_i32_13 : i32 to vector<1x32xi32>
    %19 = arith.cmpi sge, %10, %18 : vector<1x32xi32>
    %c16_i32 = arith.constant 16 : i32
    %20 = vector.broadcast %c16_i32 : i32 to vector<1x32xi32>
    %21 = arith.cmpi slt, %10, %20 : vector<1x32xi32>
    %22 = arith.andi %19, %21 : vector<1x32xi1>
    %23 = arith.extui %22 : vector<1x32xi1> to vector<1x32xi32>
    %24 = arith.sitofp %23 : vector<1x32xi32> to vector<1x32xf32>
    %c16_i32_14 = arith.constant 16 : i32
    %25 = vector.broadcast %c16_i32_14 : i32 to vector<1x32xi32>
    %26 = arith.cmpi sge, %10, %25 : vector<1x32xi32>
    %c24_i32 = arith.constant 24 : i32
    %27 = vector.broadcast %c24_i32 : i32 to vector<1x32xi32>
    %28 = arith.cmpi slt, %10, %27 : vector<1x32xi32>
    %29 = arith.andi %26, %28 : vector<1x32xi1>
    %30 = arith.extui %29 : vector<1x32xi1> to vector<1x32xi32>
    %31 = arith.sitofp %30 : vector<1x32xi32> to vector<1x32xf32>
    %c24_i32_15 = arith.constant 24 : i32
    %32 = vector.broadcast %c24_i32_15 : i32 to vector<1x32xi32>
    %33 = arith.cmpi sge, %10, %32 : vector<1x32xi32>
    %c32_i32 = arith.constant 32 : i32
    %34 = vector.broadcast %c32_i32 : i32 to vector<1x32xi32>
    %35 = arith.cmpi slt, %10, %34 : vector<1x32xi32>
    %36 = arith.andi %33, %35 : vector<1x32xi1>
    %37 = arith.extui %36 : vector<1x32xi1> to vector<1x32xi32>
    %38 = arith.sitofp %37 : vector<1x32xi32> to vector<1x32xf32>
    %c0_16 = arith.constant 0 : index
    %c0_17 = arith.constant 0 : index
    %c0_18 = arith.constant 0 : index
    %39 = vector.load %arg4[%c0_16, %c0_17, %c0_18] : memref<2x1x32xf32, #tpu.memory_space<vmem>>, vector<1x1x32xf32>
    %40 = vector.shape_cast %39 : vector<1x1x32xf32> to vector<1x32xf32>
    %c0_19 = arith.constant 0 : index
    %c0_20 = arith.constant 0 : index
    %c0_21 = arith.constant 0 : index
    %41 = vector.load %arg5[%c0_19, %c0_20, %c0_21] : memref<2x1x32xf32, #tpu.memory_space<vmem>>, vector<1x1x32xf32>
    %42 = vector.shape_cast %41 : vector<1x1x32xf32> to vector<1x32xf32>
    %cst = arith.constant dense<0.000000e+00> : vector<12xf32>
    %43 = vector.multi_reduction <add>, %9, %cst [1] : vector<12x32xf32> to vector<12xf32>
    %44 = vector.shape_cast %43 : vector<12xf32> to vector<12x1xf32>
    %cst_22 = arith.constant 3.200000e+01 : f32
    %45 = vector.broadcast %cst_22 : f32 to vector<12x1xf32>
    %46 = arith.divf %44, %45 : vector<12x1xf32>
    %47 = vector.broadcast %46 : vector<12x1xf32> to vector<12x32xf32>
    %48 = arith.subf %9, %47 : vector<12x32xf32>
    %49 = arith.mulf %48, %48 : vector<12x32xf32>
    %cst_23 = arith.constant dense<0.000000e+00> : vector<12xf32>
    %50 = vector.multi_reduction <add>, %49, %cst_23 [1] : vector<12x32xf32> to vector<12xf32>
    %51 = vector.shape_cast %50 : vector<12xf32> to vector<12x1xf32>
    %cst_24 = arith.constant 3.200000e+01 : f32
    %52 = vector.broadcast %cst_24 : f32 to vector<12x1xf32>
    %53 = arith.divf %51, %52 : vector<12x1xf32>
    %54 = vector.broadcast %46 : vector<12x1xf32> to vector<12x32xf32>
    %55 = arith.subf %9, %54 : vector<12x32xf32>
    %cst_25 = arith.constant 9.99999997E-7 : f32
    %56 = vector.broadcast %cst_25 : f32 to vector<12x1xf32>
    %57 = arith.addf %53, %56 : vector<12x1xf32>
    %58 = math.rsqrt %57 : vector<12x1xf32>
    %59 = vector.broadcast %58 : vector<12x1xf32> to vector<12x32xf32>
    %60 = arith.mulf %55, %59 : vector<12x32xf32>
    %61 = vector.broadcast %40 : vector<1x32xf32> to vector<12x32xf32>
    %62 = arith.mulf %60, %61 : vector<12x32xf32>
    %63 = vector.broadcast %42 : vector<1x32xf32> to vector<12x32xf32>
    %64 = arith.addf %62, %63 : vector<12x32xf32>
    %c0_26 = arith.constant 0 : index
    %c0_27 = arith.constant 0 : index
    %c0_28 = arith.constant 0 : index
    %65 = vector.load %arg6[%c0_26, %c0_27, %c0_28] : memref<2x32x32xf32, #tpu.memory_space<vmem>>, vector<1x32x32xf32>
    %66 = vector.shape_cast %65 : vector<1x32x32xf32> to vector<32x32xf32>
    %cst_29 = arith.constant dense<0.000000e+00> : vector<12x32xf32>
    %67 = tpu.matmul %64, %66, %cst_29 {dimension_numbers = #tpu.dot_dimension_numbers<[1], [0], [0], [1], [0, 0, 1, 1], [], []>} : vector<12x32xf32>, vector<32x32xf32>, vector<12x32xf32> -> vector<12x32xf32>
    %c0_30 = arith.constant 0 : index
    %c0_31 = arith.constant 0 : index
    %c0_32 = arith.constant 0 : index
    %68 = vector.load %arg7[%c0_30, %c0_31, %c0_32] : memref<2x1x32xf32, #tpu.memory_space<vmem>>, vector<1x1x32xf32>
    %69 = vector.shape_cast %68 : vector<1x1x32xf32> to vector<1x32xf32>
    %70 = vector.broadcast %69 : vector<1x32xf32> to vector<12x32xf32>
    %71 = arith.addf %67, %70 : vector<12x32xf32>
    %c0_33 = arith.constant 0 : index
    %c0_34 = arith.constant 0 : index
    %c0_35 = arith.constant 0 : index
    %72 = vector.load %arg8[%c0_33, %c0_34, %c0_35] : memref<2x32x32xf32, #tpu.memory_space<vmem>>, vector<1x32x32xf32>
    %73 = vector.shape_cast %72 : vector<1x32x32xf32> to vector<32x32xf32>
    %cst_36 = arith.constant dense<0.000000e+00> : vector<12x32xf32>
    %74 = tpu.matmul %64, %73, %cst_36 {dimension_numbers = #tpu.dot_dimension_numbers<[1], [0], [0], [1], [0, 0, 1, 1], [], []>} : vector<12x32xf32>, vector<32x32xf32>, vector<12x32xf32> -> vector<12x32xf32>
    %c0_37 = arith.constant 0 : index
    %c0_38 = arith.constant 0 : index
    %c0_39 = arith.constant 0 : index
    %75 = vector.load %arg9[%c0_37, %c0_38, %c0_39] : memref<2x1x32xf32, #tpu.memory_space<vmem>>, vector<1x1x32xf32>
    %76 = vector.shape_cast %75 : vector<1x1x32xf32> to vector<1x32xf32>
    %77 = vector.broadcast %76 : vector<1x32xf32> to vector<12x32xf32>
    %78 = arith.addf %74, %77 : vector<12x32xf32>
    %c0_40 = arith.constant 0 : index
    %c0_41 = arith.constant 0 : index
    %c0_42 = arith.constant 0 : index
    %79 = vector.load %arg10[%c0_40, %c0_41, %c0_42] : memref<2x32x32xf32, #tpu.memory_space<vmem>>, vector<1x32x32xf32>
    %80 = vector.shape_cast %79 : vector<1x32x32xf32> to vector<32x32xf32>
    %cst_43 = arith.constant dense<0.000000e+00> : vector<12x32xf32>
    %81 = tpu.matmul %64, %80, %cst_43 {dimension_numbers = #tpu.dot_dimension_numbers<[1], [0], [0], [1], [0, 0, 1, 1], [], []>} : vector<12x32xf32>, vector<32x32xf32>, vector<12x32xf32> -> vector<12x32xf32>
    %c0_44 = arith.constant 0 : index
    %c0_45 = arith.constant 0 : index
    %c0_46 = arith.constant 0 : index
    %82 = vector.load %arg11[%c0_44, %c0_45, %c0_46] : memref<2x1x32xf32, #tpu.memory_space<vmem>>, vector<1x1x32xf32>
    %83 = vector.shape_cast %82 : vector<1x1x32xf32> to vector<1x32xf32>
    %84 = vector.broadcast %83 : vector<1x32xf32> to vector<12x32xf32>
    %85 = arith.addf %81, %84 : vector<12x32xf32>
    %86 = vector.broadcast %17 : vector<1x32xf32> to vector<12x32xf32>
    %87 = arith.mulf %71, %86 : vector<12x32xf32>
    %cst_47 = arith.constant dense<0.000000e+00> : vector<12x12xf32>
    %88 = tpu.matmul %87, %78, %cst_47 {dimension_numbers = #tpu.dot_dimension_numbers<[1], [1], [0], [0], [0, 0, 1, 0], [], []>} : vector<12x32xf32>, vector<12x32xf32>, vector<12x12xf32> -> vector<12x12xf32>
    %cst_48 = arith.constant dense<0xFF800000> : vector<12xf32>
    %89 = vector.multi_reduction <maximumf>, %88, %cst_48 [1] : vector<12x12xf32> to vector<12xf32>
    %90 = vector.shape_cast %89 : vector<12xf32> to vector<12x1xf32>
    %91 = vector.broadcast %90 : vector<12x1xf32> to vector<12x12xf32>
    %92 = arith.subf %88, %91 : vector<12x12xf32>
    %93 = math.exp %92 : vector<12x12xf32>
    %cst_49 = arith.constant dense<0.000000e+00> : vector<12xf32>
    %94 = vector.multi_reduction <add>, %93, %cst_49 [1] : vector<12x12xf32> to vector<12xf32>
    %95 = vector.shape_cast %94 : vector<12xf32> to vector<12x1xf32>
    %96 = tpu.reciprocal %95 {approx = true} : vector<12x1xf32> -> vector<12x1xf32>
    %97 = vector.broadcast %96 : vector<12x1xf32> to vector<12x12xf32>
    %98 = arith.mulf %93, %97 : vector<12x12xf32>
    %99 = vector.broadcast %17 : vector<1x32xf32> to vector<12x32xf32>
    %100 = arith.mulf %85, %99 : vector<12x32xf32>
    %cst_50 = arith.constant dense<0.000000e+00> : vector<12x32xf32>
    %101 = tpu.matmul %98, %100, %cst_50 {dimension_numbers = #tpu.dot_dimension_numbers<[1], [0], [0], [1], [0, 0, 1, 1], [], []>} : vector<12x12xf32>, vector<12x32xf32>, vector<12x32xf32> -> vector<12x32xf32>
    %102 = vector.broadcast %24 : vector<1x32xf32> to vector<12x32xf32>
    %103 = arith.mulf %71, %102 : vector<12x32xf32>
    %cst_51 = arith.constant dense<0.000000e+00> : vector<12x12xf32>
    %104 = tpu.matmul %103, %78, %cst_51 {dimension_numbers = #tpu.dot_dimension_numbers<[1], [1], [0], [0], [0, 0, 1, 0], [], []>} : vector<12x32xf32>, vector<12x32xf32>, vector<12x12xf32> -> vector<12x12xf32>
    %cst_52 = arith.constant dense<0xFF800000> : vector<12xf32>
    %105 = vector.multi_reduction <maximumf>, %104, %cst_52 [1] : vector<12x12xf32> to vector<12xf32>
    %106 = vector.shape_cast %105 : vector<12xf32> to vector<12x1xf32>
    %107 = vector.broadcast %106 : vector<12x1xf32> to vector<12x12xf32>
    %108 = arith.subf %104, %107 : vector<12x12xf32>
    %109 = math.exp %108 : vector<12x12xf32>
    %cst_53 = arith.constant dense<0.000000e+00> : vector<12xf32>
    %110 = vector.multi_reduction <add>, %109, %cst_53 [1] : vector<12x12xf32> to vector<12xf32>
    %111 = vector.shape_cast %110 : vector<12xf32> to vector<12x1xf32>
    %112 = tpu.reciprocal %111 {approx = true} : vector<12x1xf32> -> vector<12x1xf32>
    %113 = vector.broadcast %112 : vector<12x1xf32> to vector<12x12xf32>
    %114 = arith.mulf %109, %113 : vector<12x12xf32>
    %115 = vector.broadcast %24 : vector<1x32xf32> to vector<12x32xf32>
    %116 = arith.mulf %85, %115 : vector<12x32xf32>
    %cst_54 = arith.constant dense<0.000000e+00> : vector<12x32xf32>
    %117 = tpu.matmul %114, %116, %cst_54 {dimension_numbers = #tpu.dot_dimension_numbers<[1], [0], [0], [1], [0, 0, 1, 1], [], []>} : vector<12x12xf32>, vector<12x32xf32>, vector<12x32xf32> -> vector<12x32xf32>
    %118 = arith.addf %101, %117 : vector<12x32xf32>
    %119 = vector.broadcast %31 : vector<1x32xf32> to vector<12x32xf32>
    %120 = arith.mulf %71, %119 : vector<12x32xf32>
    %cst_55 = arith.constant dense<0.000000e+00> : vector<12x12xf32>
    %121 = tpu.matmul %120, %78, %cst_55 {dimension_numbers = #tpu.dot_dimension_numbers<[1], [1], [0], [0], [0, 0, 1, 0], [], []>} : vector<12x32xf32>, vector<12x32xf32>, vector<12x12xf32> -> vector<12x12xf32>
    %cst_56 = arith.constant dense<0xFF800000> : vector<12xf32>
    %122 = vector.multi_reduction <maximumf>, %121, %cst_56 [1] : vector<12x12xf32> to vector<12xf32>
    %123 = vector.shape_cast %122 : vector<12xf32> to vector<12x1xf32>
    %124 = vector.broadcast %123 : vector<12x1xf32> to vector<12x12xf32>
    %125 = arith.subf %121, %124 : vector<12x12xf32>
    %126 = math.exp %125 : vector<12x12xf32>
    %cst_57 = arith.constant dense<0.000000e+00> : vector<12xf32>
    %127 = vector.multi_reduction <add>, %126, %cst_57 [1] : vector<12x12xf32> to vector<12xf32>
    %128 = vector.shape_cast %127 : vector<12xf32> to vector<12x1xf32>
    %129 = tpu.reciprocal %128 {approx = true} : vector<12x1xf32> -> vector<12x1xf32>
    %130 = vector.broadcast %129 : vector<12x1xf32> to vector<12x12xf32>
    %131 = arith.mulf %126, %130 : vector<12x12xf32>
    %132 = vector.broadcast %31 : vector<1x32xf32> to vector<12x32xf32>
    %133 = arith.mulf %85, %132 : vector<12x32xf32>
    %cst_58 = arith.constant dense<0.000000e+00> : vector<12x32xf32>
    %134 = tpu.matmul %131, %133, %cst_58 {dimension_numbers = #tpu.dot_dimension_numbers<[1], [0], [0], [1], [0, 0, 1, 1], [], []>} : vector<12x12xf32>, vector<12x32xf32>, vector<12x32xf32> -> vector<12x32xf32>
    %135 = arith.addf %118, %134 : vector<12x32xf32>
    %136 = vector.broadcast %38 : vector<1x32xf32> to vector<12x32xf32>
    %137 = arith.mulf %71, %136 : vector<12x32xf32>
    %cst_59 = arith.constant dense<0.000000e+00> : vector<12x12xf32>
    %138 = tpu.matmul %137, %78, %cst_59 {dimension_numbers = #tpu.dot_dimension_numbers<[1], [1], [0], [0], [0, 0, 1, 0], [], []>} : vector<12x32xf32>, vector<12x32xf32>, vector<12x12xf32> -> vector<12x12xf32>
    %cst_60 = arith.constant dense<0xFF800000> : vector<12xf32>
    %139 = vector.multi_reduction <maximumf>, %138, %cst_60 [1] : vector<12x12xf32> to vector<12xf32>
    %140 = vector.shape_cast %139 : vector<12xf32> to vector<12x1xf32>
    %141 = vector.broadcast %140 : vector<12x1xf32> to vector<12x12xf32>
    %142 = arith.subf %138, %141 : vector<12x12xf32>
    %143 = math.exp %142 : vector<12x12xf32>
    %cst_61 = arith.constant dense<0.000000e+00> : vector<12xf32>
    %144 = vector.multi_reduction <add>, %143, %cst_61 [1] : vector<12x12xf32> to vector<12xf32>
    %145 = vector.shape_cast %144 : vector<12xf32> to vector<12x1xf32>
    %146 = tpu.reciprocal %145 {approx = true} : vector<12x1xf32> -> vector<12x1xf32>
    %147 = vector.broadcast %146 : vector<12x1xf32> to vector<12x12xf32>
    %148 = arith.mulf %143, %147 : vector<12x12xf32>
    %149 = vector.broadcast %38 : vector<1x32xf32> to vector<12x32xf32>
    %150 = arith.mulf %85, %149 : vector<12x32xf32>
    %cst_62 = arith.constant dense<0.000000e+00> : vector<12x32xf32>
    %151 = tpu.matmul %148, %150, %cst_62 {dimension_numbers = #tpu.dot_dimension_numbers<[1], [0], [0], [1], [0, 0, 1, 1], [], []>} : vector<12x12xf32>, vector<12x32xf32>, vector<12x32xf32> -> vector<12x32xf32>
    %152 = arith.addf %135, %151 : vector<12x32xf32>
    %c0_63 = arith.constant 0 : index
    %c0_64 = arith.constant 0 : index
    %c0_65 = arith.constant 0 : index
    %153 = vector.load %arg12[%c0_63, %c0_64, %c0_65] : memref<2x32x32xf32, #tpu.memory_space<vmem>>, vector<1x32x32xf32>
    %154 = vector.shape_cast %153 : vector<1x32x32xf32> to vector<32x32xf32>
    %cst_66 = arith.constant dense<0.000000e+00> : vector<12x32xf32>
    %155 = tpu.matmul %152, %154, %cst_66 {dimension_numbers = #tpu.dot_dimension_numbers<[1], [0], [0], [1], [0, 0, 1, 1], [], []>} : vector<12x32xf32>, vector<32x32xf32>, vector<12x32xf32> -> vector<12x32xf32>
    %c0_67 = arith.constant 0 : index
    %c0_68 = arith.constant 0 : index
    %c0_69 = arith.constant 0 : index
    %156 = vector.load %arg13[%c0_67, %c0_68, %c0_69] : memref<2x1x32xf32, #tpu.memory_space<vmem>>, vector<1x1x32xf32>
    %157 = vector.shape_cast %156 : vector<1x1x32xf32> to vector<1x32xf32>
    %158 = vector.broadcast %157 : vector<1x32xf32> to vector<12x32xf32>
    %159 = arith.addf %155, %158 : vector<12x32xf32>
    %160 = arith.addf %9, %159 : vector<12x32xf32>
    %c0_70 = arith.constant 0 : index
    %c0_71 = arith.constant 0 : index
    %c0_72 = arith.constant 0 : index
    %161 = vector.load %arg14[%c0_70, %c0_71, %c0_72] : memref<2x1x32xf32, #tpu.memory_space<vmem>>, vector<1x1x32xf32>
    %162 = vector.shape_cast %161 : vector<1x1x32xf32> to vector<1x32xf32>
    %c0_73 = arith.constant 0 : index
    %c0_74 = arith.constant 0 : index
    %c0_75 = arith.constant 0 : index
    %163 = vector.load %arg15[%c0_73, %c0_74, %c0_75] : memref<2x1x32xf32, #tpu.memory_space<vmem>>, vector<1x1x32xf32>
    %164 = vector.shape_cast %163 : vector<1x1x32xf32> to vector<1x32xf32>
    %cst_76 = arith.constant dense<0.000000e+00> : vector<12xf32>
    %165 = vector.multi_reduction <add>, %160, %cst_76 [1] : vector<12x32xf32> to vector<12xf32>
    %166 = vector.shape_cast %165 : vector<12xf32> to vector<12x1xf32>
    %cst_77 = arith.constant 3.200000e+01 : f32
    %167 = vector.broadcast %cst_77 : f32 to vector<12x1xf32>
    %168 = arith.divf %166, %167 : vector<12x1xf32>
    %169 = vector.broadcast %168 : vector<12x1xf32> to vector<12x32xf32>
    %170 = arith.subf %160, %169 : vector<12x32xf32>
    %171 = arith.mulf %170, %170 : vector<12x32xf32>
    %cst_78 = arith.constant dense<0.000000e+00> : vector<12xf32>
    %172 = vector.multi_reduction <add>, %171, %cst_78 [1] : vector<12x32xf32> to vector<12xf32>
    %173 = vector.shape_cast %172 : vector<12xf32> to vector<12x1xf32>
    %cst_79 = arith.constant 3.200000e+01 : f32
    %174 = vector.broadcast %cst_79 : f32 to vector<12x1xf32>
    %175 = arith.divf %173, %174 : vector<12x1xf32>
    %176 = vector.broadcast %168 : vector<12x1xf32> to vector<12x32xf32>
    %177 = arith.subf %160, %176 : vector<12x32xf32>
    %cst_80 = arith.constant 9.99999997E-7 : f32
    %178 = vector.broadcast %cst_80 : f32 to vector<12x1xf32>
    %179 = arith.addf %175, %178 : vector<12x1xf32>
    %180 = math.rsqrt %179 : vector<12x1xf32>
    %181 = vector.broadcast %180 : vector<12x1xf32> to vector<12x32xf32>
    %182 = arith.mulf %177, %181 : vector<12x32xf32>
    %183 = vector.broadcast %162 : vector<1x32xf32> to vector<12x32xf32>
    %184 = arith.mulf %182, %183 : vector<12x32xf32>
    %185 = vector.broadcast %164 : vector<1x32xf32> to vector<12x32xf32>
    %186 = arith.addf %184, %185 : vector<12x32xf32>
    %c0_81 = arith.constant 0 : index
    %c0_82 = arith.constant 0 : index
    %c0_83 = arith.constant 0 : index
    %187 = vector.load %arg16[%c0_81, %c0_82, %c0_83] : memref<2x32x64xf32, #tpu.memory_space<vmem>>, vector<1x32x64xf32>
    %188 = vector.shape_cast %187 : vector<1x32x64xf32> to vector<32x64xf32>
    %cst_84 = arith.constant dense<0.000000e+00> : vector<12x64xf32>
    %189 = tpu.matmul %186, %188, %cst_84 {dimension_numbers = #tpu.dot_dimension_numbers<[1], [0], [0], [1], [0, 0, 1, 1], [], []>} : vector<12x32xf32>, vector<32x64xf32>, vector<12x64xf32> -> vector<12x64xf32>
    %c0_85 = arith.constant 0 : index
    %c0_86 = arith.constant 0 : index
    %c0_87 = arith.constant 0 : index
    %190 = vector.load %arg17[%c0_85, %c0_86, %c0_87] : memref<2x1x64xf32, #tpu.memory_space<vmem>>, vector<1x1x64xf32>
    %191 = vector.shape_cast %190 : vector<1x1x64xf32> to vector<1x64xf32>
    %192 = vector.broadcast %191 : vector<1x64xf32> to vector<12x64xf32>
    %193 = arith.addf %189, %192 : vector<12x64xf32>
    %cst_88 = arith.constant 5.000000e-01 : f32
    %194 = vector.broadcast %cst_88 : f32 to vector<12x64xf32>
    %195 = arith.mulf %194, %193 : vector<12x64xf32>
    %cst_89 = arith.constant 0.707106769 : f32
    %196 = vector.broadcast %cst_89 : f32 to vector<12x64xf32>
    %197 = arith.mulf %193, %196 : vector<12x64xf32>
    %198 = math.erf %197 : vector<12x64xf32>
    %cst_90 = arith.constant 1.000000e+00 : f32
    %199 = vector.broadcast %cst_90 : f32 to vector<12x64xf32>
    %200 = arith.addf %199, %198 : vector<12x64xf32>
    %201 = arith.mulf %195, %200 : vector<12x64xf32>
    %c0_91 = arith.constant 0 : index
    %c0_92 = arith.constant 0 : index
    %c0_93 = arith.constant 0 : index
    %202 = vector.load %arg18[%c0_91, %c0_92, %c0_93] : memref<2x64x32xf32, #tpu.memory_space<vmem>>, vector<1x64x32xf32>
    %203 = vector.shape_cast %202 : vector<1x64x32xf32> to vector<64x32xf32>
    %cst_94 = arith.constant dense<0.000000e+00> : vector<12x32xf32>
    %204 = tpu.matmul %201, %203, %cst_94 {dimension_numbers = #tpu.dot_dimension_numbers<[1], [0], [0], [1], [0, 0, 1, 1], [], []>} : vector<12x64xf32>, vector<64x32xf32>, vector<12x32xf32> -> vector<12x32xf32>
    %c0_95 = arith.constant 0 : index
    %c0_96 = arith.constant 0 : index
    %c0_97 = arith.constant 0 : index
    %205 = vector.load %arg19[%c0_95, %c0_96, %c0_97] : memref<2x1x32xf32, #tpu.memory_space<vmem>>, vector<1x1x32xf32>
    %206 = vector.shape_cast %205 : vector<1x1x32xf32> to vector<1x32xf32>
    %207 = vector.broadcast %206 : vector<1x32xf32> to vector<12x32xf32>
    %208 = arith.addf %204, %207 : vector<12x32xf32>
    %209 = arith.addf %160, %208 : vector<12x32xf32>
    %c1 = arith.constant 1 : index
    %c0_98 = arith.constant 0 : index
    %c0_99 = arith.constant 0 : index
    %210 = vector.load %arg4[%c1, %c0_98, %c0_99] : memref<2x1x32xf32, #tpu.memory_space<vmem>>, vector<1x1x32xf32>
    %211 = vector.shape_cast %210 : vector<1x1x32xf32> to vector<1x32xf32>
    %c1_100 = arith.constant 1 : index
    %c0_101 = arith.constant 0 : index
    %c0_102 = arith.constant 0 : index
    %212 = vector.load %arg5[%c1_100, %c0_101, %c0_102] : memref<2x1x32xf32, #tpu.memory_space<vmem>>, vector<1x1x32xf32>
    %213 = vector.shape_cast %212 : vector<1x1x32xf32> to vector<1x32xf32>
    %cst_103 = arith.constant dense<0.000000e+00> : vector<12xf32>
    %214 = vector.multi_reduction <add>, %209, %cst_103 [1] : vector<12x32xf32> to vector<12xf32>
    %215 = vector.shape_cast %214 : vector<12xf32> to vector<12x1xf32>
    %cst_104 = arith.constant 3.200000e+01 : f32
    %216 = vector.broadcast %cst_104 : f32 to vector<12x1xf32>
    %217 = arith.divf %215, %216 : vector<12x1xf32>
    %218 = vector.broadcast %217 : vector<12x1xf32> to vector<12x32xf32>
    %219 = arith.subf %209, %218 : vector<12x32xf32>
    %220 = arith.mulf %219, %219 : vector<12x32xf32>
    %cst_105 = arith.constant dense<0.000000e+00> : vector<12xf32>
    %221 = vector.multi_reduction <add>, %220, %cst_105 [1] : vector<12x32xf32> to vector<12xf32>
    %222 = vector.shape_cast %221 : vector<12xf32> to vector<12x1xf32>
    %cst_106 = arith.constant 3.200000e+01 : f32
    %223 = vector.broadcast %cst_106 : f32 to vector<12x1xf32>
    %224 = arith.divf %222, %223 : vector<12x1xf32>
    %225 = vector.broadcast %217 : vector<12x1xf32> to vector<12x32xf32>
    %226 = arith.subf %209, %225 : vector<12x32xf32>
    %cst_107 = arith.constant 9.99999997E-7 : f32
    %227 = vector.broadcast %cst_107 : f32 to vector<12x1xf32>
    %228 = arith.addf %224, %227 : vector<12x1xf32>
    %229 = math.rsqrt %228 : vector<12x1xf32>
    %230 = vector.broadcast %229 : vector<12x1xf32> to vector<12x32xf32>
    %231 = arith.mulf %226, %230 : vector<12x32xf32>
    %232 = vector.broadcast %211 : vector<1x32xf32> to vector<12x32xf32>
    %233 = arith.mulf %231, %232 : vector<12x32xf32>
    %234 = vector.broadcast %213 : vector<1x32xf32> to vector<12x32xf32>
    %235 = arith.addf %233, %234 : vector<12x32xf32>
    %c1_108 = arith.constant 1 : index
    %c0_109 = arith.constant 0 : index
    %c0_110 = arith.constant 0 : index
    %236 = vector.load %arg6[%c1_108, %c0_109, %c0_110] : memref<2x32x32xf32, #tpu.memory_space<vmem>>, vector<1x32x32xf32>
    %237 = vector.shape_cast %236 : vector<1x32x32xf32> to vector<32x32xf32>
    %cst_111 = arith.constant dense<0.000000e+00> : vector<12x32xf32>
    %238 = tpu.matmul %235, %237, %cst_111 {dimension_numbers = #tpu.dot_dimension_numbers<[1], [0], [0], [1], [0, 0, 1, 1], [], []>} : vector<12x32xf32>, vector<32x32xf32>, vector<12x32xf32> -> vector<12x32xf32>
    %c1_112 = arith.constant 1 : index
    %c0_113 = arith.constant 0 : index
    %c0_114 = arith.constant 0 : index
    %239 = vector.load %arg7[%c1_112, %c0_113, %c0_114] : memref<2x1x32xf32, #tpu.memory_space<vmem>>, vector<1x1x32xf32>
    %240 = vector.shape_cast %239 : vector<1x1x32xf32> to vector<1x32xf32>
    %241 = vector.broadcast %240 : vector<1x32xf32> to vector<12x32xf32>
    %242 = arith.addf %238, %241 : vector<12x32xf32>
    %c1_115 = arith.constant 1 : index
    %c0_116 = arith.constant 0 : index
    %c0_117 = arith.constant 0 : index
    %243 = vector.load %arg8[%c1_115, %c0_116, %c0_117] : memref<2x32x32xf32, #tpu.memory_space<vmem>>, vector<1x32x32xf32>
    %244 = vector.shape_cast %243 : vector<1x32x32xf32> to vector<32x32xf32>
    %cst_118 = arith.constant dense<0.000000e+00> : vector<12x32xf32>
    %245 = tpu.matmul %235, %244, %cst_118 {dimension_numbers = #tpu.dot_dimension_numbers<[1], [0], [0], [1], [0, 0, 1, 1], [], []>} : vector<12x32xf32>, vector<32x32xf32>, vector<12x32xf32> -> vector<12x32xf32>
    %c1_119 = arith.constant 1 : index
    %c0_120 = arith.constant 0 : index
    %c0_121 = arith.constant 0 : index
    %246 = vector.load %arg9[%c1_119, %c0_120, %c0_121] : memref<2x1x32xf32, #tpu.memory_space<vmem>>, vector<1x1x32xf32>
    %247 = vector.shape_cast %246 : vector<1x1x32xf32> to vector<1x32xf32>
    %248 = vector.broadcast %247 : vector<1x32xf32> to vector<12x32xf32>
    %249 = arith.addf %245, %248 : vector<12x32xf32>
    %c1_122 = arith.constant 1 : index
    %c0_123 = arith.constant 0 : index
    %c0_124 = arith.constant 0 : index
    %250 = vector.load %arg10[%c1_122, %c0_123, %c0_124] : memref<2x32x32xf32, #tpu.memory_space<vmem>>, vector<1x32x32xf32>
    %251 = vector.shape_cast %250 : vector<1x32x32xf32> to vector<32x32xf32>
    %cst_125 = arith.constant dense<0.000000e+00> : vector<12x32xf32>
    %252 = tpu.matmul %235, %251, %cst_125 {dimension_numbers = #tpu.dot_dimension_numbers<[1], [0], [0], [1], [0, 0, 1, 1], [], []>} : vector<12x32xf32>, vector<32x32xf32>, vector<12x32xf32> -> vector<12x32xf32>
    %c1_126 = arith.constant 1 : index
    %c0_127 = arith.constant 0 : index
    %c0_128 = arith.constant 0 : index
    %253 = vector.load %arg11[%c1_126, %c0_127, %c0_128] : memref<2x1x32xf32, #tpu.memory_space<vmem>>, vector<1x1x32xf32>
    %254 = vector.shape_cast %253 : vector<1x1x32xf32> to vector<1x32xf32>
    %255 = vector.broadcast %254 : vector<1x32xf32> to vector<12x32xf32>
    %256 = arith.addf %252, %255 : vector<12x32xf32>
    %257 = vector.broadcast %17 : vector<1x32xf32> to vector<12x32xf32>
    %258 = arith.mulf %242, %257 : vector<12x32xf32>
    %cst_129 = arith.constant dense<0.000000e+00> : vector<12x12xf32>
    %259 = tpu.matmul %258, %249, %cst_129 {dimension_numbers = #tpu.dot_dimension_numbers<[1], [1], [0], [0], [0, 0, 1, 0], [], []>} : vector<12x32xf32>, vector<12x32xf32>, vector<12x12xf32> -> vector<12x12xf32>
    %cst_130 = arith.constant dense<0xFF800000> : vector<12xf32>
    %260 = vector.multi_reduction <maximumf>, %259, %cst_130 [1] : vector<12x12xf32> to vector<12xf32>
    %261 = vector.shape_cast %260 : vector<12xf32> to vector<12x1xf32>
    %262 = vector.broadcast %261 : vector<12x1xf32> to vector<12x12xf32>
    %263 = arith.subf %259, %262 : vector<12x12xf32>
    %264 = math.exp %263 : vector<12x12xf32>
    %cst_131 = arith.constant dense<0.000000e+00> : vector<12xf32>
    %265 = vector.multi_reduction <add>, %264, %cst_131 [1] : vector<12x12xf32> to vector<12xf32>
    %266 = vector.shape_cast %265 : vector<12xf32> to vector<12x1xf32>
    %267 = tpu.reciprocal %266 {approx = true} : vector<12x1xf32> -> vector<12x1xf32>
    %268 = vector.broadcast %267 : vector<12x1xf32> to vector<12x12xf32>
    %269 = arith.mulf %264, %268 : vector<12x12xf32>
    %270 = vector.broadcast %17 : vector<1x32xf32> to vector<12x32xf32>
    %271 = arith.mulf %256, %270 : vector<12x32xf32>
    %cst_132 = arith.constant dense<0.000000e+00> : vector<12x32xf32>
    %272 = tpu.matmul %269, %271, %cst_132 {dimension_numbers = #tpu.dot_dimension_numbers<[1], [0], [0], [1], [0, 0, 1, 1], [], []>} : vector<12x12xf32>, vector<12x32xf32>, vector<12x32xf32> -> vector<12x32xf32>
    %273 = vector.broadcast %24 : vector<1x32xf32> to vector<12x32xf32>
    %274 = arith.mulf %242, %273 : vector<12x32xf32>
    %cst_133 = arith.constant dense<0.000000e+00> : vector<12x12xf32>
    %275 = tpu.matmul %274, %249, %cst_133 {dimension_numbers = #tpu.dot_dimension_numbers<[1], [1], [0], [0], [0, 0, 1, 0], [], []>} : vector<12x32xf32>, vector<12x32xf32>, vector<12x12xf32> -> vector<12x12xf32>
    %cst_134 = arith.constant dense<0xFF800000> : vector<12xf32>
    %276 = vector.multi_reduction <maximumf>, %275, %cst_134 [1] : vector<12x12xf32> to vector<12xf32>
    %277 = vector.shape_cast %276 : vector<12xf32> to vector<12x1xf32>
    %278 = vector.broadcast %277 : vector<12x1xf32> to vector<12x12xf32>
    %279 = arith.subf %275, %278 : vector<12x12xf32>
    %280 = math.exp %279 : vector<12x12xf32>
    %cst_135 = arith.constant dense<0.000000e+00> : vector<12xf32>
    %281 = vector.multi_reduction <add>, %280, %cst_135 [1] : vector<12x12xf32> to vector<12xf32>
    %282 = vector.shape_cast %281 : vector<12xf32> to vector<12x1xf32>
    %283 = tpu.reciprocal %282 {approx = true} : vector<12x1xf32> -> vector<12x1xf32>
    %284 = vector.broadcast %283 : vector<12x1xf32> to vector<12x12xf32>
    %285 = arith.mulf %280, %284 : vector<12x12xf32>
    %286 = vector.broadcast %24 : vector<1x32xf32> to vector<12x32xf32>
    %287 = arith.mulf %256, %286 : vector<12x32xf32>
    %cst_136 = arith.constant dense<0.000000e+00> : vector<12x32xf32>
    %288 = tpu.matmul %285, %287, %cst_136 {dimension_numbers = #tpu.dot_dimension_numbers<[1], [0], [0], [1], [0, 0, 1, 1], [], []>} : vector<12x12xf32>, vector<12x32xf32>, vector<12x32xf32> -> vector<12x32xf32>
    %289 = arith.addf %272, %288 : vector<12x32xf32>
    %290 = vector.broadcast %31 : vector<1x32xf32> to vector<12x32xf32>
    %291 = arith.mulf %242, %290 : vector<12x32xf32>
    %cst_137 = arith.constant dense<0.000000e+00> : vector<12x12xf32>
    %292 = tpu.matmul %291, %249, %cst_137 {dimension_numbers = #tpu.dot_dimension_numbers<[1], [1], [0], [0], [0, 0, 1, 0], [], []>} : vector<12x32xf32>, vector<12x32xf32>, vector<12x12xf32> -> vector<12x12xf32>
    %cst_138 = arith.constant dense<0xFF800000> : vector<12xf32>
    %293 = vector.multi_reduction <maximumf>, %292, %cst_138 [1] : vector<12x12xf32> to vector<12xf32>
    %294 = vector.shape_cast %293 : vector<12xf32> to vector<12x1xf32>
    %295 = vector.broadcast %294 : vector<12x1xf32> to vector<12x12xf32>
    %296 = arith.subf %292, %295 : vector<12x12xf32>
    %297 = math.exp %296 : vector<12x12xf32>
    %cst_139 = arith.constant dense<0.000000e+00> : vector<12xf32>
    %298 = vector.multi_reduction <add>, %297, %cst_139 [1] : vector<12x12xf32> to vector<12xf32>
    %299 = vector.shape_cast %298 : vector<12xf32> to vector<12x1xf32>
    %300 = tpu.reciprocal %299 {approx = true} : vector<12x1xf32> -> vector<12x1xf32>
    %301 = vector.broadcast %300 : vector<12x1xf32> to vector<12x12xf32>
    %302 = arith.mulf %297, %301 : vector<12x12xf32>
    %303 = vector.broadcast %31 : vector<1x32xf32> to vector<12x32xf32>
    %304 = arith.mulf %256, %303 : vector<12x32xf32>
    %cst_140 = arith.constant dense<0.000000e+00> : vector<12x32xf32>
    %305 = tpu.matmul %302, %304, %cst_140 {dimension_numbers = #tpu.dot_dimension_numbers<[1], [0], [0], [1], [0, 0, 1, 1], [], []>} : vector<12x12xf32>, vector<12x32xf32>, vector<12x32xf32> -> vector<12x32xf32>
    %306 = arith.addf %289, %305 : vector<12x32xf32>
    %307 = vector.broadcast %38 : vector<1x32xf32> to vector<12x32xf32>
    %308 = arith.mulf %242, %307 : vector<12x32xf32>
    %cst_141 = arith.constant dense<0.000000e+00> : vector<12x12xf32>
    %309 = tpu.matmul %308, %249, %cst_141 {dimension_numbers = #tpu.dot_dimension_numbers<[1], [1], [0], [0], [0, 0, 1, 0], [], []>} : vector<12x32xf32>, vector<12x32xf32>, vector<12x12xf32> -> vector<12x12xf32>
    %cst_142 = arith.constant dense<0xFF800000> : vector<12xf32>
    %310 = vector.multi_reduction <maximumf>, %309, %cst_142 [1] : vector<12x12xf32> to vector<12xf32>
    %311 = vector.shape_cast %310 : vector<12xf32> to vector<12x1xf32>
    %312 = vector.broadcast %311 : vector<12x1xf32> to vector<12x12xf32>
    %313 = arith.subf %309, %312 : vector<12x12xf32>
    %314 = math.exp %313 : vector<12x12xf32>
    %cst_143 = arith.constant dense<0.000000e+00> : vector<12xf32>
    %315 = vector.multi_reduction <add>, %314, %cst_143 [1] : vector<12x12xf32> to vector<12xf32>
    %316 = vector.shape_cast %315 : vector<12xf32> to vector<12x1xf32>
    %317 = tpu.reciprocal %316 {approx = true} : vector<12x1xf32> -> vector<12x1xf32>
    %318 = vector.broadcast %317 : vector<12x1xf32> to vector<12x12xf32>
    %319 = arith.mulf %314, %318 : vector<12x12xf32>
    %320 = vector.broadcast %38 : vector<1x32xf32> to vector<12x32xf32>
    %321 = arith.mulf %256, %320 : vector<12x32xf32>
    %cst_144 = arith.constant dense<0.000000e+00> : vector<12x32xf32>
    %322 = tpu.matmul %319, %321, %cst_144 {dimension_numbers = #tpu.dot_dimension_numbers<[1], [0], [0], [1], [0, 0, 1, 1], [], []>} : vector<12x12xf32>, vector<12x32xf32>, vector<12x32xf32> -> vector<12x32xf32>
    %323 = arith.addf %306, %322 : vector<12x32xf32>
    %c1_145 = arith.constant 1 : index
    %c0_146 = arith.constant 0 : index
    %c0_147 = arith.constant 0 : index
    %324 = vector.load %arg12[%c1_145, %c0_146, %c0_147] : memref<2x32x32xf32, #tpu.memory_space<vmem>>, vector<1x32x32xf32>
    %325 = vector.shape_cast %324 : vector<1x32x32xf32> to vector<32x32xf32>
    %cst_148 = arith.constant dense<0.000000e+00> : vector<12x32xf32>
    %326 = tpu.matmul %323, %325, %cst_148 {dimension_numbers = #tpu.dot_dimension_numbers<[1], [0], [0], [1], [0, 0, 1, 1], [], []>} : vector<12x32xf32>, vector<32x32xf32>, vector<12x32xf32> -> vector<12x32xf32>
    %c1_149 = arith.constant 1 : index
    %c0_150 = arith.constant 0 : index
    %c0_151 = arith.constant 0 : index
    %327 = vector.load %arg13[%c1_149, %c0_150, %c0_151] : memref<2x1x32xf32, #tpu.memory_space<vmem>>, vector<1x1x32xf32>
    %328 = vector.shape_cast %327 : vector<1x1x32xf32> to vector<1x32xf32>
    %329 = vector.broadcast %328 : vector<1x32xf32> to vector<12x32xf32>
    %330 = arith.addf %326, %329 : vector<12x32xf32>
    %331 = arith.addf %209, %330 : vector<12x32xf32>
    %c1_152 = arith.constant 1 : index
    %c0_153 = arith.constant 0 : index
    %c0_154 = arith.constant 0 : index
    %332 = vector.load %arg14[%c1_152, %c0_153, %c0_154] : memref<2x1x32xf32, #tpu.memory_space<vmem>>, vector<1x1x32xf32>
    %333 = vector.shape_cast %332 : vector<1x1x32xf32> to vector<1x32xf32>
    %c1_155 = arith.constant 1 : index
    %c0_156 = arith.constant 0 : index
    %c0_157 = arith.constant 0 : index
    %334 = vector.load %arg15[%c1_155, %c0_156, %c0_157] : memref<2x1x32xf32, #tpu.memory_space<vmem>>, vector<1x1x32xf32>
    %335 = vector.shape_cast %334 : vector<1x1x32xf32> to vector<1x32xf32>
    %cst_158 = arith.constant dense<0.000000e+00> : vector<12xf32>
    %336 = vector.multi_reduction <add>, %331, %cst_158 [1] : vector<12x32xf32> to vector<12xf32>
    %337 = vector.shape_cast %336 : vector<12xf32> to vector<12x1xf32>
    %cst_159 = arith.constant 3.200000e+01 : f32
    %338 = vector.broadcast %cst_159 : f32 to vector<12x1xf32>
    %339 = arith.divf %337, %338 : vector<12x1xf32>
    %340 = vector.broadcast %339 : vector<12x1xf32> to vector<12x32xf32>
    %341 = arith.subf %331, %340 : vector<12x32xf32>
    %342 = arith.mulf %341, %341 : vector<12x32xf32>
    %cst_160 = arith.constant dense<0.000000e+00> : vector<12xf32>
    %343 = vector.multi_reduction <add>, %342, %cst_160 [1] : vector<12x32xf32> to vector<12xf32>
    %344 = vector.shape_cast %343 : vector<12xf32> to vector<12x1xf32>
    %cst_161 = arith.constant 3.200000e+01 : f32
    %345 = vector.broadcast %cst_161 : f32 to vector<12x1xf32>
    %346 = arith.divf %344, %345 : vector<12x1xf32>
    %347 = vector.broadcast %339 : vector<12x1xf32> to vector<12x32xf32>
    %348 = arith.subf %331, %347 : vector<12x32xf32>
    %cst_162 = arith.constant 9.99999997E-7 : f32
    %349 = vector.broadcast %cst_162 : f32 to vector<12x1xf32>
    %350 = arith.addf %346, %349 : vector<12x1xf32>
    %351 = math.rsqrt %350 : vector<12x1xf32>
    %352 = vector.broadcast %351 : vector<12x1xf32> to vector<12x32xf32>
    %353 = arith.mulf %348, %352 : vector<12x32xf32>
    %354 = vector.broadcast %333 : vector<1x32xf32> to vector<12x32xf32>
    %355 = arith.mulf %353, %354 : vector<12x32xf32>
    %356 = vector.broadcast %335 : vector<1x32xf32> to vector<12x32xf32>
    %357 = arith.addf %355, %356 : vector<12x32xf32>
    %c1_163 = arith.constant 1 : index
    %c0_164 = arith.constant 0 : index
    %c0_165 = arith.constant 0 : index
    %358 = vector.load %arg16[%c1_163, %c0_164, %c0_165] : memref<2x32x64xf32, #tpu.memory_space<vmem>>, vector<1x32x64xf32>
    %359 = vector.shape_cast %358 : vector<1x32x64xf32> to vector<32x64xf32>
    %cst_166 = arith.constant dense<0.000000e+00> : vector<12x64xf32>
    %360 = tpu.matmul %357, %359, %cst_166 {dimension_numbers = #tpu.dot_dimension_numbers<[1], [0], [0], [1], [0, 0, 1, 1], [], []>} : vector<12x32xf32>, vector<32x64xf32>, vector<12x64xf32> -> vector<12x64xf32>
    %c1_167 = arith.constant 1 : index
    %c0_168 = arith.constant 0 : index
    %c0_169 = arith.constant 0 : index
    %361 = vector.load %arg17[%c1_167, %c0_168, %c0_169] : memref<2x1x64xf32, #tpu.memory_space<vmem>>, vector<1x1x64xf32>
    %362 = vector.shape_cast %361 : vector<1x1x64xf32> to vector<1x64xf32>
    %363 = vector.broadcast %362 : vector<1x64xf32> to vector<12x64xf32>
    %364 = arith.addf %360, %363 : vector<12x64xf32>
    %cst_170 = arith.constant 5.000000e-01 : f32
    %365 = vector.broadcast %cst_170 : f32 to vector<12x64xf32>
    %366 = arith.mulf %365, %364 : vector<12x64xf32>
    %cst_171 = arith.constant 0.707106769 : f32
    %367 = vector.broadcast %cst_171 : f32 to vector<12x64xf32>
    %368 = arith.mulf %364, %367 : vector<12x64xf32>
    %369 = math.erf %368 : vector<12x64xf32>
    %cst_172 = arith.constant 1.000000e+00 : f32
    %370 = vector.broadcast %cst_172 : f32 to vector<12x64xf32>
    %371 = arith.addf %370, %369 : vector<12x64xf32>
    %372 = arith.mulf %366, %371 : vector<12x64xf32>
    %c1_173 = arith.constant 1 : index
    %c0_174 = arith.constant 0 : index
    %c0_175 = arith.constant 0 : index
    %373 = vector.load %arg18[%c1_173, %c0_174, %c0_175] : memref<2x64x32xf32, #tpu.memory_space<vmem>>, vector<1x64x32xf32>
    %374 = vector.shape_cast %373 : vector<1x64x32xf32> to vector<64x32xf32>
    %cst_176 = arith.constant dense<0.000000e+00> : vector<12x32xf32>
    %375 = tpu.matmul %372, %374, %cst_176 {dimension_numbers = #tpu.dot_dimension_numbers<[1], [0], [0], [1], [0, 0, 1, 1], [], []>} : vector<12x64xf32>, vector<64x32xf32>, vector<12x32xf32> -> vector<12x32xf32>
    %c1_177 = arith.constant 1 : index
    %c0_178 = arith.constant 0 : index
    %c0_179 = arith.constant 0 : index
    %376 = vector.load %arg19[%c1_177, %c0_178, %c0_179] : memref<2x1x32xf32, #tpu.memory_space<vmem>>, vector<1x1x32xf32>
    %377 = vector.shape_cast %376 : vector<1x1x32xf32> to vector<1x32xf32>
    %378 = vector.broadcast %377 : vector<1x32xf32> to vector<12x32xf32>
    %379 = arith.addf %375, %378 : vector<12x32xf32>
    %380 = arith.addf %331, %379 : vector<12x32xf32>
    %c0_180 = arith.constant 0 : index
    %c0_181 = arith.constant 0 : index
    %381 = vector.load %arg20[%c0_180, %c0_181] : memref<1x32xf32, #tpu.memory_space<vmem>>, vector<1x32xf32>
    %c0_182 = arith.constant 0 : index
    %c0_183 = arith.constant 0 : index
    %382 = vector.load %arg21[%c0_182, %c0_183] : memref<1x32xf32, #tpu.memory_space<vmem>>, vector<1x32xf32>
    %cst_184 = arith.constant dense<0.000000e+00> : vector<12xf32>
    %383 = vector.multi_reduction <add>, %380, %cst_184 [1] : vector<12x32xf32> to vector<12xf32>
    %384 = vector.shape_cast %383 : vector<12xf32> to vector<12x1xf32>
    %cst_185 = arith.constant 3.200000e+01 : f32
    %385 = vector.broadcast %cst_185 : f32 to vector<12x1xf32>
    %386 = arith.divf %384, %385 : vector<12x1xf32>
    %387 = vector.broadcast %386 : vector<12x1xf32> to vector<12x32xf32>
    %388 = arith.subf %380, %387 : vector<12x32xf32>
    %389 = arith.mulf %388, %388 : vector<12x32xf32>
    %cst_186 = arith.constant dense<0.000000e+00> : vector<12xf32>
    %390 = vector.multi_reduction <add>, %389, %cst_186 [1] : vector<12x32xf32> to vector<12xf32>
    %391 = vector.shape_cast %390 : vector<12xf32> to vector<12x1xf32>
    %cst_187 = arith.constant 3.200000e+01 : f32
    %392 = vector.broadcast %cst_187 : f32 to vector<12x1xf32>
    %393 = arith.divf %391, %392 : vector<12x1xf32>
    %394 = vector.broadcast %386 : vector<12x1xf32> to vector<12x32xf32>
    %395 = arith.subf %380, %394 : vector<12x32xf32>
    %cst_188 = arith.constant 9.99999997E-7 : f32
    %396 = vector.broadcast %cst_188 : f32 to vector<12x1xf32>
    %397 = arith.addf %393, %396 : vector<12x1xf32>
    %398 = math.rsqrt %397 : vector<12x1xf32>
    %399 = vector.broadcast %398 : vector<12x1xf32> to vector<12x32xf32>
    %400 = arith.mulf %395, %399 : vector<12x32xf32>
    %401 = vector.broadcast %381 : vector<1x32xf32> to vector<12x32xf32>
    %402 = arith.mulf %400, %401 : vector<12x32xf32>
    %403 = vector.broadcast %382 : vector<1x32xf32> to vector<12x32xf32>
    %404 = arith.addf %402, %403 : vector<12x32xf32>
    %405 = vector.extract_strided_slice %404 {offsets = [0, 0], sizes = [8, 32], strides = [1, 1]} : vector<12x32xf32> to vector<8x32xf32>
    %c0_189 = arith.constant 0 : index
    %c0_190 = arith.constant 0 : index
    %c0_191 = arith.constant 0 : index
    %406 = vector.load %arg22[%c0_189, %c0_190, %c0_191] : memref<1x8x32xf32, #tpu.memory_space<vmem>>, vector<1x8x32xf32>
    %407 = vector.shape_cast %406 : vector<1x8x32xf32> to vector<8x32xf32>
    %408 = vector.shape_cast %405 : vector<8x32xf32> to vector<1x8x32xf32>
    tpu.vector_store %arg22[%c0_189, %c0_190, %c0_191], %408 {strides = array<i32>} : memref<1x8x32xf32, #tpu.memory_space<vmem>>, vector<1x8x32xf32>,
    return
  }
  func.func @transform_0(%arg0: i32) -> (i32, i32, i32) {
    %c0_i32 = arith.constant 0 : i32
    %c0_i32_0 = arith.constant 0 : i32
    %c0_i32_1 = arith.constant 0 : i32
    return %arg0, %c0_i32, %c0_i32_0 : i32, i32, i32
  }
  func.func @transform_1(%arg0: i32) -> (i32, i32, i32) {
    %c0_i32 = arith.constant 0 : i32
    %c0_i32_0 = arith.constant 0 : i32
    %c0_i32_1 = arith.constant 0 : i32
    %c0_i32_2 = arith.constant 0 : i32
    return %c0_i32, %c0_i32_0, %c0_i32_1 : i32, i32, i32
  }
  func.func @transform_2(%arg0: i32) -> (i32, i32, i32) {
    %c0_i32 = arith.constant 0 : i32
    %c0_i32_0 = arith.constant 0 : i32
    %c0_i32_1 = arith.constant 0 : i32
    %c0_i32_2 = arith.constant 0 : i32
    return %c0_i32, %c0_i32_0, %c0_i32_1 : i32, i32, i32
  }
  func.func @transform_3(%arg0: i32) -> (i32, i32, i32) {
    %c0_i32 = arith.constant 0 : i32
    %c0_i32_0 = arith.constant 0 : i32
    %c0_i32_1 = arith.constant 0 : i32
    %c0_i32_2 = arith.constant 0 : i32
    return %c0_i32, %c0_i32_0, %c0_i32_1 : i32, i32, i32
  }
  func.func @transform_4(%arg0: i32) -> (i32, i32, i32) {
    %c0_i32 = arith.constant 0 : i32
    %c0_i32_0 = arith.constant 0 : i32
    %c0_i32_1 = arith.constant 0 : i32
    %c0_i32_2 = arith.constant 0 : i32
    return %c0_i32, %c0_i32_0, %c0_i32_1 : i32, i32, i32
  }
  func.func @transform_5(%arg0: i32) -> (i32, i32, i32) {
    %c0_i32 = arith.constant 0 : i32
    %c0_i32_0 = arith.constant 0 : i32
    %c0_i32_1 = arith.constant 0 : i32
    %c0_i32_2 = arith.constant 0 : i32
    return %c0_i32, %c0_i32_0, %c0_i32_1 : i32, i32, i32
  }
  func.func @transform_6(%arg0: i32) -> (i32, i32, i32) {
    %c0_i32 = arith.constant 0 : i32
    %c0_i32_0 = arith.constant 0 : i32
    %c0_i32_1 = arith.constant 0 : i32
    %c0_i32_2 = arith.constant 0 : i32
    return %c0_i32, %c0_i32_0, %c0_i32_1 : i32, i32, i32
  }
  func.func @transform_7(%arg0: i32) -> (i32, i32, i32) {
    %c0_i32 = arith.constant 0 : i32
    %c0_i32_0 = arith.constant 0 : i32
    %c0_i32_1 = arith.constant 0 : i32
    %c0_i32_2 = arith.constant 0 : i32
    return %c0_i32, %c0_i32_0, %c0_i32_1 : i32, i32, i32
  }
  func.func @transform_8(%arg0: i32) -> (i32, i32, i32) {
    %c0_i32 = arith.constant 0 : i32
    %c0_i32_0 = arith.constant 0 : i32
    %c0_i32_1 = arith.constant 0 : i32
    %c0_i32_2 = arith.constant 0 : i32
    return %c0_i32, %c0_i32_0, %c0_i32_1 : i32, i32, i32
  }
  func.func @transform_9(%arg0: i32) -> (i32, i32, i32) {
    %c0_i32 = arith.constant 0 : i32
    %c0_i32_0 = arith.constant 0 : i32
    %c0_i32_1 = arith.constant 0 : i32
    %c0_i32_2 = arith.constant 0 : i32
    return %c0_i32, %c0_i32_0, %c0_i32_1 : i32, i32, i32
  }
  func.func @transform_10(%arg0: i32) -> (i32, i32, i32) {
    %c0_i32 = arith.constant 0 : i32
    %c0_i32_0 = arith.constant 0 : i32
    %c0_i32_1 = arith.constant 0 : i32
    %c0_i32_2 = arith.constant 0 : i32
    return %c0_i32, %c0_i32_0, %c0_i32_1 : i32, i32, i32
  }
  func.func @transform_11(%arg0: i32) -> (i32, i32, i32) {
    %c0_i32 = arith.constant 0 : i32
    %c0_i32_0 = arith.constant 0 : i32
    %c0_i32_1 = arith.constant 0 : i32
    %c0_i32_2 = arith.constant 0 : i32
    return %c0_i32, %c0_i32_0, %c0_i32_1 : i32, i32, i32
  }
  func.func @transform_12(%arg0: i32) -> (i32, i32, i32) {
    %c0_i32 = arith.constant 0 : i32
    %c0_i32_0 = arith.constant 0 : i32
    %c0_i32_1 = arith.constant 0 : i32
    %c0_i32_2 = arith.constant 0 : i32
    return %c0_i32, %c0_i32_0, %c0_i32_1 : i32, i32, i32
  }
  func.func @transform_13(%arg0: i32) -> (i32, i32, i32) {
    %c0_i32 = arith.constant 0 : i32
    %c0_i32_0 = arith.constant 0 : i32
    %c0_i32_1 = arith.constant 0 : i32
    %c0_i32_2 = arith.constant 0 : i32
    return %c0_i32, %c0_i32_0, %c0_i32_1 : i32, i32, i32
  }
  func.func @transform_14(%arg0: i32) -> (i32, i32, i32) {
    %c0_i32 = arith.constant 0 : i32
    %c0_i32_0 = arith.constant 0 : i32
    %c0_i32_1 = arith.constant 0 : i32
    %c0_i32_2 = arith.constant 0 : i32
    return %c0_i32, %c0_i32_0, %c0_i32_1 : i32, i32, i32
  }
  func.func @transform_15(%arg0: i32) -> (i32, i32, i32) {
    %c0_i32 = arith.constant 0 : i32
    %c0_i32_0 = arith.constant 0 : i32
    %c0_i32_1 = arith.constant 0 : i32
    %c0_i32_2 = arith.constant 0 : i32
    return %c0_i32, %c0_i32_0, %c0_i32_1 : i32, i32, i32
  }
  func.func @transform_16(%arg0: i32) -> (i32, i32, i32) {
    %c0_i32 = arith.constant 0 : i32
    %c0_i32_0 = arith.constant 0 : i32
    %c0_i32_1 = arith.constant 0 : i32
    %c0_i32_2 = arith.constant 0 : i32
    return %c0_i32, %c0_i32_0, %c0_i32_1 : i32, i32, i32
  }
  func.func @transform_17(%arg0: i32) -> (i32, i32, i32) {
    %c0_i32 = arith.constant 0 : i32
    %c0_i32_0 = arith.constant 0 : i32
    %c0_i32_1 = arith.constant 0 : i32
    %c0_i32_2 = arith.constant 0 : i32
    return %c0_i32, %c0_i32_0, %c0_i32_1 : i32, i32, i32
  }
  func.func @transform_18(%arg0: i32) -> (i32, i32, i32) {
    %c0_i32 = arith.constant 0 : i32
    %c0_i32_0 = arith.constant 0 : i32
    %c0_i32_1 = arith.constant 0 : i32
    %c0_i32_2 = arith.constant 0 : i32
    return %c0_i32, %c0_i32_0, %c0_i32_1 : i32, i32, i32
  }
  func.func @transform_19(%arg0: i32) -> (i32, i32) {
    %c0_i32 = arith.constant 0 : i32
    %c0_i32_0 = arith.constant 0 : i32
    %c0_i32_1 = arith.constant 0 : i32
    return %c0_i32, %c0_i32_0 : i32, i32
  }
  func.func @transform_20(%arg0: i32) -> (i32, i32) {
    %c0_i32 = arith.constant 0 : i32
    %c0_i32_0 = arith.constant 0 : i32
    %c0_i32_1 = arith.constant 0 : i32
    return %c0_i32, %c0_i32_0 : i32, i32
  }
  func.func @transform_21(%arg0: i32) -> (i32, i32, i32) {
    %c0_i32 = arith.constant 0 : i32
    %c0_i32_0 = arith.constant 0 : i32
    %c0_i32_1 = arith.constant 0 : i32
    return %arg0, %c0_i32, %c0_i32_0 : i32, i32, i32
  }
}

</mosaic_0001>

<bundles_post_ra>
// kernel: tpu_custom_call.1
= control target key start
LH: loop header
LB: loop body
LE: loop exit
PB: predicated region body
PF: predicated region fallthrough
CT: control target
= control target key end

     0   :  { %s6598_s0 = inlined_call_operand.hbm [shape: f32[2,8,32], index: 0, kind: input, shape index: {}]   ;;  %s6599_s1 = inlined_call_operand.hbm [shape: f32[1,8,32], index: 1, kind: input, shape index: {}]   ;;  %s6600_s2 = inlined_call_operand.hbm [shape: f32[1,4,32], index: 2, kind: input, shape index: {}]   ;;  %s6601_s3 = inlined_call_operand.hbm [shape: f32[2,1,32], index: 3, kind: input, shape index: {}]   ;;  %s6602_s4 = inlined_call_operand.hbm [shape: f32[2,1,32], index: 4, kind: input, shape index: {}]   ;;  %s6603_s5 = inlined_call_operand.vmem [shape: f32[2,32,32], index: 5, kind: input, shape index: {}]   ;;  %s6604_s6 = inlined_call_operand.hbm [shape: f32[2,1,32], index: 6, kind: input, shape index: {}]   ;;  %s6605_s7 = inlined_call_operand.vmem [shape: f32[2,32,32], index: 7, kind: input, shape index: {}]   ;;  %s6606_s8 = inlined_call_operand.hbm [shape: f32[2,1,32], index: 8, kind: input, shape index: {}]   ;;  %s6607_s9 = inlined_call_operand.vmem [shape: f32[2,32,32], index: 9, kind: input, shape index: {}]   ;;  %s6608_s10 = inlined_call_operand.hbm [shape: f32[2,1,32], index: 10, kind: input, shape index: {}]   ;;  %s6609_s11 = inlined_call_operand.hbm [shape: f32[2,32,32], index: 11, kind: input, shape index: {}]   ;;  %s6610_s12 = inlined_call_operand.hbm [shape: f32[2,1,32], index: 12, kind: input, shape index: {}]   ;;  %s6611_s13 = inlined_call_operand.hbm [shape: f32[2,1,32], index: 13, kind: input, shape index: {}]   ;;  %s6612_s14 = inlined_call_operand.hbm [shape: f32[2,1,32], index: 14, kind: input, shape index: {}]   ;;  %s6613_s15 = inlined_call_operand.hbm [shape: f32[2,32,64], index: 15, kind: input, shape index: {}]   ;;  %s6614_s16 = inlined_call_operand.hbm [shape: f32[2,1,64], index: 16, kind: input, shape index: {}]   ;;  %s6615_s17 = inlined_call_operand.vmem [shape: f32[2,64,32], index: 17, kind: input, shape index: {}]   ;;  %s6616_s18 = inlined_call_operand.vmem [shape: f32[2,1,32], index: 18, kind: input, shape index: {}]   ;;  %s6617_s19 = inlined_call_operand.vmem [shape: f32[1,32], index: 19, kind: input, shape index: {}]   ;;  %s6618_s20 = inlined_call_operand.vmem [shape: f32[1,32], index: 20, kind: input, shape index: {}]   ;;  %s6619_s21 = inlined_call_operand.hbm [shape: f32[2,8,32], index: 21, kind: output, shape index: {}]  }
   0x1   :  { %6647 = sst [smem:[#allocation37_spill]] %s6598_s0 }
   0x2   :  { %6648 = sst [smem:[#allocation38_spill]] %s6599_s1 }
   0x3   :  { %6649 = sst [smem:[#allocation39_spill]] %s6600_s2 }
   0x4   :  { %6650 = sst [smem:[#allocation40_spill]] %s6601_s3 }
   0x5   :  { %6651 = sst [smem:[#allocation41_spill]] %s6602_s4 }
   0x6   :  { %6652 = sst [smem:[#allocation42_spill]] %s6603_s5 }
   0x7   :  { %6653 = sst [smem:[#allocation43_spill]] %s6604_s6 }
   0x8   :  { %6654 = sst [smem:[#allocation44_spill]] %s6605_s7 }
   0x9   :  { %6655 = sst [smem:[#allocation45_spill]] %s6606_s8 }
   0xa   :  { %6656 = sst [smem:[#allocation46_spill]] %s6607_s9 }
   0xb   :  { %6657 = sst [smem:[#allocation47_spill]] %s6608_s10 }
   0xc   :  { %6658 = sst [smem:[#allocation48_spill]] %s6609_s11 }
   0xd   :  { %6659 = sst [smem:[#allocation49_spill]] %s6610_s12 }
   0xe   :  { %6660 = sst [smem:[#allocation50_spill]] %s6615_s17 }
   0xf   :  { %6661 = sst [smem:[#allocation51_spill]] %s6616_s18 }
  0x10   :  { %6662 = sst [smem:[#allocation52_spill]] %s6617_s19 }
  0x11   :  { %6663 = sst [smem:[#allocation53_spill]] %s6618_s20 }
  0x12   :  { %6664 = sst [smem:[#allocation54_spill]] %s6619_s21 }
  0x13   :  { %26 = vsyncpa [#allocation4], 0 }
  0x14   :  { %28 = vsyncpa [#allocation4 + $0x1], 0 }
  0x15   :  { %29 = vsyncpa [#allocation7], 0 }
  0x16   :  { %30 = vsyncpa [#allocation10], 0 }
  0x17   :  { %31 = vsyncpa [#allocation13], 0 }
  0x18   :  { %32 = vsyncpa [#allocation16], 0 }
  0x19   :  { %33 = vsyncpa [#allocation19], 0 }
  0x1a   :  { %34 = vsyncpa [#allocation22], 0 }
  0x1b   :  { %35 = vsyncpa [#allocation25], 0 }
  0x1c   :  { %36 = vsyncpa [#allocation5], 0 }
  0x1d   :  { %38 = vsyncpa [#allocation5 + $0x1], 0  ;;  %s5669_s2 = smov 0   ;;  %s5671_s25 = smov 0  }
  0x1e   :  { %s5673_s26 = smov 0   ;;  %s5675_s27 = smov 0  }
  0x1f LB: > { %s5538_s3 = smov [#allocation6]   ;;  %s5690_s29 = sadd.s32 4294967295, %s5536_s27   ;;  %s5536_s27 = sphi %s5675_s27, %s6721_s27   ;;  %s5532_s26 = sphi %s5673_s26, %s6720_s26   ;;  %s5528_s25 = sphi %s5671_s25, %s6719_s25   ;;  %s5524_s2 = sphi %s5669_s2, %s6718_s2  }
  0x20   : > { %s534_s28 = sshll.u32 %s5538_s3, 4  ;;  %p3987_p0 = scmp.ge.s32.totalorder %s5536_s27, 1  ;;  %s535_s28 = int_to_ptr.vmem [resolvable:$true] %s534_s28 }
  0x21   : > { %p6628_p1 = scmp.eq.s32.totalorder %s5690_s29, 0  ;;  %p521_p2 = scmp.lt.s32.totalorder %s5536_s27, 3 }
  0x22   : > { %s5539_s4 = smov [#allocation9]   ;;  %s5540_s22 = smov [#allocation12]  }
  0x23   : > { %p5695_p3 = pnand %p3987_p0, %p521_p2  ;;  %s555_s30 = sshll.u32 %s5539_s4, 4  ;;  %s5702_s30 = int_to_ptr.vmem [resolvable:$true] %s555_s30 }
  0x24   : > { %s584_s23 = sshll.u32 %s5540_s22, 4  ;;  %s6668_s3 = sld [smem:[#allocation38_spill]]  ;;  %s5710_s23 = int_to_ptr.vmem [resolvable:$true] %s584_s23 }
  0x25   : > { %s6665_s0 = scalar_select %p5695_p3, 1, 0 }
  0x26   : > { %p4831_p5 = pneg %p5695_p3 }
  0x27   : > { %6666 = sst [smem:[#allocation36_spill]] %s6665_s0 }
  0x28   : > { %p5706_p6 = pnand %p4831_p5, %p6628_p1 }
  0x2a   : > { %s5048_s21 = scalar_lea.hbm %s6668_s3, 128  ;;  %p5720_p8 = pneg %p5706_p6 }
  0x2b   : > { %p5049_p7 = scmp.ne.s32.totalorder %s6668_s3, %s5048_s21  ;;  %p5055_p11 = scmp.lt.u32.totalorder %s5048_s21, %s6668_s3 }
  0x2d   : > { %p5051_p9 = pnand %p5720_p8, %p5049_p7 }
  0x2f   : > { %p5052_p10 = pneg %p5051_p9 }
  0x31   : > { %p5057_p12 = pnand %p5055_p11, %p5052_p10 }
  0x33   : > { %5060 = shalt.err (!%p5057_p12)
}
  0x34   : > { %s5061_s1 = scalar_lea.vmem %s535_s28, 128  ;;  %p5069_p5 = scmp.lt.s32.totalorder %s535_s28, %s535_s28 }
  0x35   : > { %p5062_p13 = scmp.ne.s32.totalorder %s535_s28, %s5061_s1  ;;  %p5070_p4 = scmp.lt.s32.totalorder %s5061_s1, %s5061_s1 }
  0x37   : > { %p5064_p0 = pnand %p5062_p13, %p5720_p8  ;;  %p5071_p1 = por %p5070_p4, %p5069_p5 }
  0x39   : > { %p5065_p2 = pneg %p5064_p0 }
  0x3b   : > { %p5072_p3 = pnand %p5071_p1, %p5065_p2 }
  0x3d   : > { %5075 = shalt.err (!%p5072_p3)
}
  0x3e   : > { %4834 = dma.hbm_to_vmem [thread:$0]  (!%p5706_p6), %s6668_s3, 128, %s535_s28, [#allocation7]  }
  0x3f   : > { %s6670_s24 = sld [smem:[#allocation40_spill]] }
  0x45   : > { %s5076_s22 = scalar_lea.hbm %s6670_s24, 32 }
  0x46   : > { %p5077_p7 = scmp.ne.s32.totalorder %s6670_s24, %s5076_s22  ;;  %p5083_p1 = scmp.lt.u32.totalorder %s5076_s22, %s6670_s24 }
  0x48   : > { %p5079_p9 = pnand %p5077_p7, %p5720_p8 }
  0x4a   : > { %p5080_p4 = pneg %p5079_p9 }
  0x4c   : > { %p5085_p3 = pnand %p5083_p1, %p5080_p4 }
  0x4e   : > { %5088 = shalt.err (!%p5085_p3)
}
  0x4f   : > { %s5089_s28 = scalar_lea.vmem %s5702_s30, 32  ;;  %p5097_p13 = scmp.lt.s32.totalorder %s5702_s30, %s5702_s30 }
  0x50   : > { %p5090_p10 = scmp.ne.s32.totalorder %s5702_s30, %s5089_s28  ;;  %p5098_p0 = scmp.lt.s32.totalorder %s5089_s28, %s5089_s28 }
  0x52   : > { %p5092_p11 = pnand %p5090_p10, %p5720_p8  ;;  %p5099_p2 = por %p5098_p0, %p5097_p13 }
  0x54   : > { %p5093_p12 = pneg %p5092_p11 }
  0x56   : > { %p5100_p5 = pnand %p5099_p2, %p5093_p12 }
  0x58   : > { %5103 = shalt.err (!%p5100_p5)
}
  0x59   : > { %s6636_s7 = smov 16   ;;  %s6638_s9 = smov 1  }
  0x5a   : > { %4840 = dma.hbm_to_vmem [thread:$0]  (!%p5706_p6), %s6670_s24, 32, %s5702_s30, [#allocation10], %s6636_s7, %s6636_s7, %s6638_s9  }
  0x5b   : > { %s6671_s6 = sld [smem:[#allocation43_spill]] }
  0x61   : > { %s5104_s21 = scalar_lea.hbm %s6671_s6, 32 }
  0x62   : > { %p5105_p7 = scmp.ne.s32.totalorder %s6671_s6, %s5104_s21  ;;  %p5111_p1 = scmp.lt.u32.totalorder %s5104_s21, %s6671_s6 }
  0x64   : > { %p5107_p9 = pnand %p5105_p7, %p5720_p8 }
  0x66   : > { %p5108_p4 = pneg %p5107_p9 }
  0x68   : > { %p5113_p3 = pnand %p5111_p1, %p5108_p4 }
  0x6a   : > { %5116 = shalt.err (!%p5113_p3)
}
  0x6b   : > { %s5117_s30 = scalar_lea.vmem %s5710_s23, 32  ;;  %p5125_p13 = scmp.lt.s32.totalorder %s5710_s23, %s5710_s23 }
  0x6c   : > { %p5118_p10 = scmp.ne.s32.totalorder %s5710_s23, %s5117_s30  ;;  %p5126_p0 = scmp.lt.s32.totalorder %s5117_s30, %s5117_s30 }
  0x6e   : > { %p5120_p11 = pnand %p5118_p10, %p5720_p8  ;;  %p5127_p2 = por %p5126_p0, %p5125_p13 }
  0x70   : > { %p5121_p12 = pneg %p5120_p11 }
  0x72   : > { %p5128_p5 = pnand %p5127_p2, %p5121_p12 }
  0x74   : > { %5131 = shalt.err (!%p5128_p5)
}
  0x75   : > { %4846 = dma.hbm_to_vmem [thread:$0]  (!%p5706_p6), %s6671_s6, 32, %s5710_s23, [#allocation13], %s6636_s7, %s6636_s7, %s6638_s9  }
  0x76   : > { %s5543_s19 = smov [#allocation15]   ;;  %s5544_s18 = smov [#allocation18]  }
  0x77   : > { %s616_s20 = sshll.u32 %s5543_s19, 4  ;;  %s642_s21 = sshll.u32 %s5544_s18, 4  ;;  %s617_s20 = int_to_ptr.vmem [resolvable:$true] %s616_s20  ;;  %s643_s21 = int_to_ptr.vmem [resolvable:$true] %s642_s21 }
  0x78   : > { %s6672_s10 = sld [smem:[#allocation47_spill]] }
  0x7e   : > { %s5132_s28 = scalar_lea.hbm %s6672_s10, 32 }
  0x7f   : > { %p5133_p7 = scmp.ne.s32.totalorder %s6672_s10, %s5132_s28  ;;  %p5139_p1 = scmp.lt.u32.totalorder %s5132_s28, %s6672_s10 }
  0x81   : > { %p5135_p9 = pnand %p5133_p7, %p5720_p8 }
  0x83   : > { %p5136_p4 = pneg %p5135_p9 }
  0x85   : > { %p5141_p3 = pnand %p5139_p1, %p5136_p4 }
  0x87   : > { %5144 = shalt.err (!%p5141_p3)
}
  0x88   : > { %s5145_s23 = scalar_lea.vmem %s617_s20, 32  ;;  %p5153_p13 = scmp.lt.s32.totalorder %s617_s20, %s617_s20 }
  0x89   : > { %p5146_p10 = scmp.ne.s32.totalorder %s617_s20, %s5145_s23  ;;  %p5154_p0 = scmp.lt.s32.totalorder %s5145_s23, %s5145_s23 }
  0x8b   : > { %p5148_p11 = pnand %p5146_p10, %p5720_p8  ;;  %p5155_p2 = por %p5154_p0, %p5153_p13 }
  0x8d   : > { %p5149_p12 = pneg %p5148_p11 }
  0x8f   : > { %p5156_p5 = pnand %p5155_p2, %p5149_p12 }
  0x91   : > { %5159 = shalt.err (!%p5156_p5)
}
  0x92   : > { %4852 = dma.hbm_to_vmem [thread:$0]  (!%p5706_p6), %s6672_s10, 32, %s617_s20, [#allocation16], %s6636_s7, %s6636_s7, %s6638_s9  }
  0x93   : > { %s6673_s12 = sld [smem:[#allocation49_spill]] }
  0x99   : > { %s5160_s18 = scalar_lea.hbm %s6673_s12, 32 }
  0x9a   : > { %p5161_p7 = scmp.ne.s32.totalorder %s6673_s12, %s5160_s18  ;;  %p5167_p1 = scmp.lt.u32.totalorder %s5160_s18, %s6673_s12 }
  0x9c   : > { %p5163_p9 = pnand %p5161_p7, %p5720_p8 }
  0x9e   : > { %p5164_p4 = pneg %p5163_p9 }
  0xa0   : > { %p5169_p3 = pnand %p5167_p1, %p5164_p4 }
  0xa2   : > { %5172 = shalt.err (!%p5169_p3)
}
  0xa3   : > { %s5173_s3 = scalar_lea.vmem %s643_s21, 32  ;;  %p5181_p13 = scmp.lt.s32.totalorder %s643_s21, %s643_s21 }
  0xa4   : > { %p5174_p10 = scmp.ne.s32.totalorder %s643_s21, %s5173_s3  ;;  %p5182_p0 = scmp.lt.s32.totalorder %s5173_s3, %s5173_s3 }
  0xa6   : > { %p5176_p11 = pnand %p5174_p10, %p5720_p8  ;;  %p5183_p2 = por %p5182_p0, %p5181_p13 }
  0xa8   : > { %p5177_p12 = pneg %p5176_p11 }
  0xaa   : > { %p5184_p5 = pnand %p5183_p2, %p5177_p12 }
  0xac   : > { %5187 = shalt.err (!%p5184_p5)
}
  0xad   : > { %4858 = dma.hbm_to_vmem [thread:$0]  (!%p5706_p6), %s6673_s12, 32, %s643_s21, [#allocation19], %s6636_s7, %s6636_s7, %s6638_s9  }
  0xae   : > { %s5545_s0 = smov [#allocation21]   ;;  %s5546_s17 = smov [#allocation8]  }
  0xaf   : > { %s668_s24 = sshll.u32 %s5545_s0, 4  ;;  %s545_s19 = sshll.u32 %s5546_s17, 4  ;;  %s669_s24 = int_to_ptr.vmem [resolvable:$true] %s668_s24  ;;  %s546_s19 = int_to_ptr.vmem [resolvable:$true] %s545_s19 }
  0xb0   : > { %s5188_s1 = scalar_lea.hbm %s6612_s14, 32 }
  0xb1   : > { %p5189_p7 = scmp.ne.s32.totalorder %s6612_s14, %s5188_s1  ;;  %p5195_p1 = scmp.lt.u32.totalorder %s5188_s1, %s6612_s14 }
  0xb3   : > { %p5191_p9 = pnand %p5189_p7, %p5720_p8 }
  0xb5   : > { %p5192_p4 = pneg %p5191_p9 }
  0xb7   : > { %p5197_p3 = pnand %p5195_p1, %p5192_p4 }
  0xb9   : > { %5200 = shalt.err (!%p5197_p3)
}
  0xba   : > { %s5201_s21 = scalar_lea.vmem %s669_s24, 32  ;;  %p5209_p13 = scmp.lt.s32.totalorder %s669_s24, %s669_s24 }
  0xbb   : > { %p5202_p10 = scmp.ne.s32.totalorder %s669_s24, %s5201_s21  ;;  %p5210_p0 = scmp.lt.s32.totalorder %s5201_s21, %s5201_s21 }
  0xbd   : > { %p5204_p11 = pnand %p5202_p10, %p5720_p8  ;;  %p5211_p2 = por %p5210_p0, %p5209_p13 }
  0xbf   : > { %p5205_p12 = pneg %p5204_p11 }
  0xc1   : > { %p5212_p5 = pnand %p5211_p2, %p5205_p12 }
  0xc3   : > { %5215 = shalt.err (!%p5212_p5)
}
  0xc4   : > { %4864 = dma.hbm_to_vmem [thread:$0]  (!%p5706_p6), %s6612_s14, 32, %s669_s24, [#allocation22], %s6636_s7, %s6636_s7, %s6638_s9  }
  0xc5   : > { %s6674_s22 = sld [smem:[#allocation39_spill]] }
  0xcb   : > { %s5216_s1 = scalar_lea.hbm %s6674_s22, 64 }
  0xcc   : > { %p5217_p7 = scmp.ne.s32.totalorder %s6674_s22, %s5216_s1  ;;  %p5223_p1 = scmp.lt.u32.totalorder %s5216_s1, %s6674_s22 }
  0xce   : > { %p5219_p9 = pnand %p5217_p7, %p5720_p8 }
  0xd0   : > { %p5220_p4 = pneg %p5219_p9 }
  0xd2   : > { %p5225_p3 = pnand %p5223_p1, %p5220_p4 }
  0xd4   : > { %5228 = shalt.err (!%p5225_p3)
}
  0xd5   : > { %s5229_s21 = scalar_lea.vmem %s546_s19, 64  ;;  %p5237_p13 = scmp.lt.s32.totalorder %s546_s19, %s546_s19 }
  0xd6   : > { %p5230_p10 = scmp.ne.s32.totalorder %s546_s19, %s5229_s21  ;;  %p5238_p0 = scmp.lt.s32.totalorder %s5229_s21, %s5229_s21 }
  0xd8   : > { %p5232_p11 = pnand %p5230_p10, %p5720_p8  ;;  %p5239_p2 = por %p5238_p0, %p5237_p13 }
  0xda   : > { %p5233_p12 = pneg %p5232_p11 }
  0xdc   : > { %p5240_p5 = pnand %p5239_p2, %p5233_p12 }
  0xde   : > { %5243 = shalt.err (!%p5240_p5)
}
  0xdf   : > { %4837 = dma.hbm_to_vmem [thread:$0]  (!%p5706_p6), %s6674_s22, 64, %s546_s19, [#allocation7]  }
  0xe0   : > { %s5547_s0 = smov [#allocation11]   ;;  %s5548_s18 = smov [#allocation14]  }
  0xe1   : > { %s568_s17 = sshll.u32 %s5547_s0, 4  ;;  %s600_s1 = sshll.u32 %s5548_s18, 4  ;;  %s569_s17 = int_to_ptr.vmem [resolvable:$true] %s568_s17  ;;  %s601_s1 = int_to_ptr.vmem [resolvable:$true] %s600_s1 }
  0xe2   : > { %s6675_s3 = sld [smem:[#allocation41_spill]] }
  0xe8   : > { %s5244_s20 = scalar_lea.hbm %s6675_s3, 32 }
  0xe9   : > { %p5245_p7 = scmp.ne.s32.totalorder %s6675_s3, %s5244_s20  ;;  %p5251_p1 = scmp.lt.u32.totalorder %s5244_s20, %s6675_s3 }
  0xeb   : > { %p5247_p9 = pnand %p5245_p7, %p5720_p8 }
  0xed   : > { %p5248_p4 = pneg %p5247_p9 }
  0xef   : > { %p5253_p3 = pnand %p5251_p1, %p5248_p4 }
  0xf1   : > { %5256 = shalt.err (!%p5253_p3)
}
  0xf2   : > { %s5257_s19 = scalar_lea.vmem %s569_s17, 32  ;;  %p5265_p13 = scmp.lt.s32.totalorder %s569_s17, %s569_s17 }
  0xf3   : > { %p5258_p10 = scmp.ne.s32.totalorder %s569_s17, %s5257_s19  ;;  %p5266_p0 = scmp.lt.s32.totalorder %s5257_s19, %s5257_s19 }
  0xf5   : > { %p5260_p11 = pnand %p5258_p10, %p5720_p8  ;;  %p5267_p2 = por %p5266_p0, %p5265_p13 }
  0xf7   : > { %p5261_p12 = pneg %p5260_p11 }
  0xf9   : > { %p5268_p5 = pnand %p5267_p2, %p5261_p12 }
  0xfb   : > { %5271 = shalt.err (!%p5268_p5)
}
  0xfc   : > { %s6676_s7 = smov 1   ;;  %s6677_s23 = smov 16  }
  0xfd   : > { %4843 = dma.hbm_to_vmem [thread:$0]  (!%p5706_p6), %s6675_s3, 32, %s569_s17, [#allocation10], %s6677_s23, %s6677_s23, %s6676_s7  }
  0xfe   : > { %s6678_s8 = sld [smem:[#allocation45_spill]] }
 0x104   : > { %s5272_s30 = scalar_lea.hbm %s6678_s8, 32 }
 0x105   : > { %p5273_p7 = scmp.ne.s32.totalorder %s6678_s8, %s5272_s30  ;;  %p5279_p1 = scmp.lt.u32.totalorder %s5272_s30, %s6678_s8 }
 0x107   : > { %p5275_p9 = pnand %p5273_p7, %p5720_p8 }
 0x109   : > { %p5276_p4 = pneg %p5275_p9 }
 0x10b   : > { %p5281_p3 = pnand %p5279_p1, %p5276_p4 }
 0x10d   : > { %5284 = shalt.err (!%p5281_p3)
}
 0x10e   : > { %s5285_s9 = scalar_lea.vmem %s601_s1, 32  ;;  %p5293_p13 = scmp.lt.s32.totalorder %s601_s1, %s601_s1 }
 0x10f   : > { %p5286_p10 = scmp.ne.s32.totalorder %s601_s1, %s5285_s9  ;;  %p5294_p0 = scmp.lt.s32.totalorder %s5285_s9, %s5285_s9 }
 0x111   : > { %p5288_p11 = pnand %p5286_p10, %p5720_p8  ;;  %p5295_p2 = por %p5294_p0, %p5293_p13 }
 0x113   : > { %p5289_p12 = pneg %p5288_p11 }
 0x115   : > { %p5296_p5 = pnand %p5295_p2, %p5289_p12 }
 0x117   : > { %5299 = shalt.err (!%p5296_p5)
}
 0x118   : > { %4849 = dma.hbm_to_vmem [thread:$0]  (!%p5706_p6), %s6678_s8, 32, %s601_s1, [#allocation13], %s6677_s23, %s6677_s23, %s6676_s7  }
 0x119   : > { %s5549_s18 = smov [#allocation17]   ;;  %s6679_s11 = sld [smem:[#allocation48_spill]] }
 0x11a   : > { %s629_s28 = sshll.u32 %s5549_s18, 4  ;;  %s630_s28 = int_to_ptr.vmem [resolvable:$true] %s629_s28 }
 0x11f   : > { %s5300_s21 = scalar_lea.hbm %s6679_s11, 1024 }
 0x120   : > { %p5301_p7 = scmp.ne.s32.totalorder %s6679_s11, %s5300_s21  ;;  %p5307_p1 = scmp.lt.u32.totalorder %s5300_s21, %s6679_s11 }
 0x122   : > { %p5303_p9 = pnand %p5301_p7, %p5720_p8 }
 0x124   : > { %p5304_p4 = pneg %p5303_p9 }
 0x126   : > { %p5309_p3 = pnand %p5307_p1, %p5304_p4 }
 0x128   : > { %5312 = shalt.err (!%p5309_p3)
}
 0x129   : > { %s5313_s1 = scalar_lea.vmem %s630_s28, 1024  ;;  %p5321_p13 = scmp.lt.s32.totalorder %s630_s28, %s630_s28 }
 0x12a   : > { %p5314_p10 = scmp.ne.s32.totalorder %s630_s28, %s5313_s1  ;;  %p5322_p0 = scmp.lt.s32.totalorder %s5313_s1, %s5313_s1 }
 0x12c   : > { %p5316_p11 = pnand %p5314_p10, %p5720_p8  ;;  %p5323_p2 = por %p5322_p0, %p5321_p13 }
 0x12e   : > { %p5317_p12 = pneg %p5316_p11 }
 0x130   : > { %p5324_p5 = pnand %p5323_p2, %p5317_p12 }
 0x132   : > { %5327 = shalt.err (!%p5324_p5)
}
 0x133   : > { %s5550_s17 = smov 128   ;;  %s5551_s0 = smov 8  }
 0x134   : > { %4855 = dma.hbm_to_vmem [thread:$0]  (!%p5706_p6), %s6679_s11, 1024, %s630_s28, [#allocation16], %s5550_s17, %s5550_s17, %s5551_s0  }
 0x135   : > { %s5552_s30 = smov [#allocation20]   ;;  %s5553_s21 = smov [#allocation23]  }
 0x136   : > { %s655_s20 = sshll.u32 %s5552_s30, 4  ;;  %s681_s24 = sshll.u32 %s5553_s21, 4  ;;  %s656_s20 = int_to_ptr.vmem [resolvable:$true] %s655_s20  ;;  %s5932_s24 = int_to_ptr.vmem [resolvable:$true] %s681_s24 }
 0x137   : > { %s5328_s1 = scalar_lea.hbm %s6611_s13, 32 }
 0x138   : > { %p5329_p7 = scmp.ne.s32.totalorder %s6611_s13, %s5328_s1  ;;  %p5335_p1 = scmp.lt.u32.totalorder %s5328_s1, %s6611_s13 }
 0x13a   : > { %p5331_p9 = pnand %p5329_p7, %p5720_p8 }
 0x13c   : > { %p5332_p4 = pneg %p5331_p9 }
 0x13e   : > { %p5337_p3 = pnand %p5335_p1, %p5332_p4 }
 0x140   : > { %5340 = shalt.err (!%p5337_p3)
}
 0x141   : > { %s5341_s18 = scalar_lea.vmem %s656_s20, 32  ;;  %p5349_p13 = scmp.lt.s32.totalorder %s656_s20, %s656_s20 }
 0x142   : > { %p5342_p10 = scmp.ne.s32.totalorder %s656_s20, %s5341_s18  ;;  %p5350_p0 = scmp.lt.s32.totalorder %s5341_s18, %s5341_s18 }
 0x144   : > { %p5344_p11 = pnand %p5342_p10, %p5720_p8  ;;  %p5351_p2 = por %p5350_p0, %p5349_p13 }
 0x146   : > { %p5345_p12 = pneg %p5344_p11 }
 0x148   : > { %p5352_p5 = pnand %p5351_p2, %p5345_p12 }
 0x14a   : > { %5355 = shalt.err (!%p5352_p5)
}
 0x14b   : > { %4861 = dma.hbm_to_vmem [thread:$0]  (!%p5706_p6), %s6611_s13, 32, %s656_s20, [#allocation19], %s6677_s23, %s6677_s23, %s6676_s7  }
 0x14c   : > { %s5356_s19 = scalar_lea.hbm %s6613_s15, 1024 }
 0x14d   : > { %p5357_p7 = scmp.ne.s32.totalorder %s6613_s15, %s5356_s19  ;;  %p5363_p1 = scmp.lt.u32.totalorder %s5356_s19, %s6613_s15 }
 0x14f   : > { %p5359_p9 = pnand %p5357_p7, %p5720_p8 }
 0x151   : > { %p5360_p4 = pneg %p5359_p9 }
 0x153   : > { %p5365_p3 = pnand %p5363_p1, %p5360_p4 }
 0x155   : > { %5368 = shalt.err (!%p5365_p3)
}
 0x156   : > { %s5369_s20 = scalar_lea.vmem %s5932_s24, 1024  ;;  %p5377_p13 = scmp.lt.s32.totalorder %s5932_s24, %s5932_s24 }
 0x157   : > { %p5370_p10 = scmp.ne.s32.totalorder %s5932_s24, %s5369_s20  ;;  %p5378_p0 = scmp.lt.s32.totalorder %s5369_s20, %s5369_s20 }
 0x159   : > { %p5372_p11 = pnand %p5370_p10, %p5720_p8  ;;  %p5379_p2 = por %p5378_p0, %p5377_p13 }
 0x15b   : > { %p5373_p12 = pneg %p5372_p11 }
 0x15d   : > { %p5380_p5 = pnand %p5379_p2, %p5373_p12 }
 0x15f   : > { %5383 = shalt.err (!%p5380_p5)
}
 0x160   : > { %4867 = dma.hbm_to_vmem [thread:$0]  (!%p5706_p6), %s6613_s15, 1024, %s5932_s24, [#allocation22], %s5550_s17, %s5550_s17, %s5551_s0  }
 0x161   : > { %s5554_s8 = smov [#allocation24]   ;;  %s5384_s9 = scalar_lea.hbm %s6614_s16, 32 }
 0x162   : > { %s694_s30 = sshll.u32 %s5554_s8, 4  ;;  %p5385_p7 = scmp.ne.s32.totalorder %s6614_s16, %s5384_s9  ;;  %s695_s30 = int_to_ptr.vmem [resolvable:$true] %s694_s30 }
 0x163   : > { %p5391_p1 = scmp.lt.u32.totalorder %s5384_s9, %s6614_s16 }
 0x164   : > { %p5387_p9 = pnand %p5385_p7, %p5720_p8 }
 0x166   : > { %p5388_p4 = pneg %p5387_p9 }
 0x168   : > { %p5393_p3 = pnand %p5391_p1, %p5388_p4 }
 0x16a   : > { %5396 = shalt.err (!%p5393_p3)
}
 0x16b   : > { %s5397_s17 = scalar_lea.vmem %s695_s30, 32  ;;  %p5405_p13 = scmp.lt.s32.totalorder %s695_s30, %s695_s30 }
 0x16c   : > { %p5398_p10 = scmp.ne.s32.totalorder %s695_s30, %s5397_s17  ;;  %p5406_p0 = scmp.lt.s32.totalorder %s5397_s17, %s5397_s17 }
 0x16e   : > { %p5400_p11 = pnand %p5398_p10, %p5720_p8  ;;  %p5407_p2 = por %p5406_p0, %p5405_p13 }
 0x170   : > { %p5401_p12 = pneg %p5400_p11 }
 0x172   : > { %p5408_p5 = pnand %p5407_p2, %p5401_p12 }
 0x174   : > { %5411 = shalt.err (!%p5408_p5)
}
 0x175   : > { %4870 = dma.hbm_to_vmem [thread:$0]  (!%p5706_p6), %s6614_s16, 32, %s695_s30, [#allocation25], %s6677_s23, %s6677_s23, %s6676_s7  }
 0x176   : > { %s3986_s5 = sadd.s32 4294967294, %s5536_s27   ;;  %s6004_s4 = sadd.s32 1, %s5536_s27  }
 0x177   : > { %s51_s18 = sadd.s32 1, %s5532_s26  ;;  %s48_s6 = ssub.s32 %s5536_s27, %s6004_s4 }
 0x178   : > { %p58_p8 = scmp.ne.s32.totalorder %s5532_s26, %s5528_s25  ;;  %p49_p7 = scmp.eq.s32.totalorder %s48_s6, 0 }
 0x179   : > { %p59_p9 = scmp.eq.s32.totalorder %s5536_s27, 0  ;;  %p64_p4 = scmp.ne.s32.totalorder %s5528_s25, %s5524_s2 }
 0x17a   : > { %p508_p1 = scmp.eq.s32.totalorder %s5690_s29, 1  ;;  %p6680_p10 = scmp.eq.s32.totalorder %s5690_s29, 0 }
 0x17b   : > { %s6016_s8 = scalar_select %p49_p7, %s5532_s26, %s51_s18  }
 0x17c   : > { %p60_p3 = por %p59_p9, %p58_p8  ;;  %p6020_p11 = por %p6680_p10, %p64_p4 }
 0x17d   : > { %p6024_p6 = por %p508_p1, %p58_p8  ;;  %p514_p12 = scmp.eq.s32.totalorder %s3986_s5, 1 }
 0x17e   : > { %p4892_p13 = scmp.lt.s32.totalorder %s5536_s27, 2  ;;  %s720_s23 = sand.u32 1, %s5532_s26  }
 0x17f   : > { %s6682_s7 = scalar_select %p6024_p6, 1, 0 }
 0x180   : > { %p6030_p0 = por %p514_p12, %p64_p4  ;;  %s4002_s19 = sshll.u32 %s720_s23, 3 }
 0x181   : > { %s4003_s9 = sshll.u32 %s5536_s27, 7  ;;  %s6684_s28 = sld [smem:[#allocation37_spill]] }
 0x182   : > { %s6683_s30 = scalar_select %p6030_p0, 1, 0 }
 0x183   : > { %s724_s17 = scalar_lea.vmem [#allocation3], %s4002_s19  ;;  %p6040_p2 = pnand %p4892_p13, %p60_p3 }
 0x184   : > { %s731_s0 = sshll.u32 %s724_s17, 4  ;;  %s721_s5 = scalar_lea.sflag [#allocation4], %s720_s23  ;;  %s6044_s0 = int_to_ptr.vmem [resolvable:$true] %s731_s0 }
 0x185   : > { %p5414_p8 = pneg %p6040_p2 }
 0x187   : > { %s6038_s20 = scalar_lea.hbm %s6684_s28, %s4003_s9  ;;  %s5417_s9 = scalar_lea.hbm %s6684_s28, 256 }
 0x188   : > { %s5412_s18 = scalar_lea.hbm %s6038_s20, 128  ;;  %p5418_p4 = scmp.lt.u32.totalorder %s6038_s20, %s6684_s28 }
 0x189   : > { %p5413_p5 = scmp.ne.s32.totalorder %s6038_s20, %s5412_s18  ;;  %p5419_p1 = scmp.lt.u32.totalorder %s5417_s9, %s5412_s18 }
 0x18a   : > { %p5421_p10 = scmp.lt.u32.totalorder %s5412_s18, %s6038_s20 }
 0x18b   : > { %p5415_p7 = pnand %p5414_p8, %p5413_p5  ;;  %p5420_p3 = por %p5419_p1, %p5418_p4 }
 0x18d   : > { %p5416_p9 = pneg %p5415_p7  ;;  %p5422_p12 = por %p5421_p10, %p5420_p3 }
 0x18f   : > { %p5423_p13 = pnand %p5422_p12, %p5416_p9 }
 0x191   : > { %5426 = shalt.err (!%p5423_p13)
}
 0x192   : > { %s5427_s23 = scalar_lea.vmem %s6044_s0, 128  ;;  %s5555_s17 = smov [#allocation3]  }
 0x193   : > { %p5428_p5 = scmp.ne.s32.totalorder %s6044_s0, %s5427_s23  ;;  %s5432_s6 = sshll.u32 %s5555_s17, 4  ;;  %s5433_s6 = int_to_ptr.vmem [resolvable:$false] %s5432_s6 }
 0x194   : > { %s5434_s19 = scalar_lea.vmem %s5433_s6, 256  ;;  %p5435_p6 = scmp.lt.s32.totalorder %s6044_s0, %s5433_s6 }
 0x195   : > { %p5430_p7 = pnand %p5428_p5, %p5414_p8  ;;  %p5436_p4 = scmp.lt.s32.totalorder %s5434_s19, %s5427_s23 }
 0x197   : > { %p5431_p0 = pneg %p5430_p7  ;;  %p5437_p1 = por %p5436_p4, %p5435_p6 }
 0x199   : > { %p5438_p3 = pnand %p5437_p1, %p5431_p0 }
 0x19b   : > { %5441 = shalt.err (!%p5438_p3)
}
 0x19c   : > { %4874 = dma.hbm_to_vmem [thread:$0]  (!%p6040_p2), %s6038_s20, 128, %s6044_s0, %s721_s5  }
 0x19d   : > { %s6686_s18 = sld [smem:[#allocation36_spill]] }
 0x1a3   : > { %p6687_p9 = scmp.ne.s32.totalorder %s6686_s18, 0 }
 0x1a4   : > { %s6074_s9 = sand.u32 (!%p6687_p9), 1, %s5528_s25  }
 0x1a5   : > { %740 = sbr.rel (%p6687_p9) target bundleno = 5909 (0x1715), region = 104  ;;  %s6642_s1 = sshll.u32 (!%p6687_p9), %s6074_s9, 3 }
 0x1a6   : > { %s743_s3 = scalar_lea.sflag (!%p6687_p9), [#allocation4], %s6074_s9  ;;  %s746_s23 = scalar_lea.vmem (!%p6687_p9), [#allocation3], %s6642_s1 }
 0x1ac   : > { %5487 = dma.done.wait (%p6020_p11), %s743_s3, 128  }
 0x1ad   : > { %5489 = vsyncadd (%p6020_p11), %s743_s3, 4294967168  ;;  %p6688_p6 = scmp.eq.s32.totalorder %s5690_s29, 0 }
 0x1af   : > { %5491 = dma.done.wait (%p6688_p6), [#allocation7], 192   ;;  %p6689_p0 = pmov %p6688_p6 }
 0x1b1   : > { %5493 = vsyncadd (%p6689_p0), [#allocation7], 4294967104  ;;  %p6690_p2 = pmov %p6689_p0 }
 0x1b2   : > { %p6691_p8 = pmov %p6689_p0 }
 0x1b3   : > { %5495 = dma.done.wait (%p6690_p2), [#allocation10], 64  }
 0x1b4   : > { %5497 = vsyncadd (%p6691_p8), [#allocation10], 4294967232  ;;  %p6692_p10 = pmov %p6689_p0 }
 0x1b5   : > { %p6693_p12 = pmov %p6689_p0 }
 0x1b6   : > { %5499 = dma.done.wait (%p6692_p10), [#allocation13], 64  }
 0x1b7   : > { %5501 = vsyncadd (%p6693_p12), [#allocation13], 4294967232  ;;  %p6694_p11 = pmov %p6689_p0 }
 0x1b8   : > { %p6695_p13 = pmov %p6689_p0 }
 0x1b9   : > { %5503 = dma.done.wait (%p6694_p11), [#allocation16], 1056  }
 0x1ba   : > { %5505 = vsyncadd (%p6695_p13), [#allocation16], 4294966240  ;;  %p6696_p5 = pmov %p6689_p0 }
 0x1bb   : > { %p6697_p7 = pmov %p6689_p0 }
 0x1bc   : > { %5507 = dma.done.wait (%p6696_p5), [#allocation19], 64  }
 0x1bd   : > { %5509 = vsyncadd (%p6697_p7), [#allocation19], 4294967232  ;;  %p6698_p4 = pmov %p6689_p0 }
 0x1be   : > { %p6699_p1 = pmov %p6689_p0 }
 0x1bf   : > { %5511 = dma.done.wait (%p6698_p4), [#allocation22], 1056  }
 0x1c0   : > { %5513 = vsyncadd (%p6699_p1), [#allocation22], 4294966240  ;;  %p6700_p3 = pmov %p6689_p0 }
 0x1c1   : > { %p6701_p9 = pmov %p6689_p0 }
 0x1c2   : > { %5515 = dma.done.wait (%p6700_p3), [#allocation25], 32  }
 0x1c3   : > { %5517 = vsyncadd (%p6701_p9), [#allocation25], 4294967264  ;;  %vm863_vm0 = vcmask 257024   ;;  %v857_v0 = vld [vmem:[%s746_s23] sm:$0xff]  ;;  %v858_v1 = vld [vmem:[#allocation6] sm:$0xff]  ;;  %vm860_vm1 = vcmask 261120   ;;  %v867_v33 = vlaneseq }
 0x1c4   : > { %v862_v2 = vld [vmem:[#allocation8] sm:$0xf]  ;;  %v859_v3 = vadd.f32 %v858_v1, %v857_v0  ;;  %s6702_s0 = sld [smem:[#allocation42_spill]]  ;;  %s6703_s19 = sld [smem:[#allocation46_spill]]  ;;  %v5556_v35 = vmov 0.0   ;;  %vm1426_vm12 = vcmask 1043456   ;;  %vm6200_vm13 = vmpackc.low %vm860_vm1, %vm860_vm1 }
 0x1c5   : > { %864 = vst.msk [vmem:[#allocation2 + $0x8] sm:$0xf] %vm863_vm0, %v862_v2  ;;  %s6704_s6 = sld [smem:[#allocation44_spill]]  ;;  %v868_v34 = vand.u32 127, %v867_v33  ;;  %v4024_v44 = vld [vmem:[#allocation9] ss:$0 sm:$0xff] }
 0x1c6   : > { %861 = vst.msk [vmem:[#allocation2] sm:$0xff] %vm860_vm1, %v859_v3  ;;  %v4025_v46 = vld [vmem:[#allocation11] ss:$0 sm:$0xff]  ;;  %v4032_v56 = vld [vmem:[#allocation15] ss:$0 sm:$0xff]  ;;  %vm5557_vm14 = vmmov 1  }
 0x1c7   : > { %vm884_vm2 = vcmp.ge.s32.totalorder %v868_v34, 24  ;;  %vm885_vm3 = vcmp.lt.s32.totalorder %v868_v34, 32  ;;  %vm874_vm5 = vcmp.ge.s32.totalorder %v868_v34, 8  ;;  %vm875_vm6 = vcmp.lt.s32.totalorder %v868_v34, 16  ;;  %v4026_v57 = vld [vmem:[#allocation12] ss:$0 sm:$0xff]  ;;  %vm6206_vm15 = vmpackc.low %vm1426_vm12, %vm5557_vm14 }
 0x1c8   : > { %vm886_vm4 = vmand %vm884_vm2, %vm885_vm3  ;;  %vm879_vm7 = vcmp.ge.s32.totalorder %v868_v34, 16  ;;  %vm880_vm8 = vcmp.lt.s32.totalorder %v868_v34, 24  ;;  %vm870_vm10 = vcmp.lt.s32.totalorder %v868_v34, 8  ;;  %vm1291_vm2 = vcmask 93184   ;;  %s6709_s10 = sld [smem:[#allocation50_spill]]  ;;  %s6710_s5 = sld [smem:[#allocation51_spill]] }
 0x1c9   : > { %v6156_v36 = vsel %vm886_vm4, 1.0, %v5556_v35  ;;  %vm876_vm9 = vmand %vm874_vm5, %vm875_vm6  ;;  %v6170_v60 = vsel %vm870_vm10, 1.0, %v5556_v35  ;;  %vm1287_vm3 = vcmask 97280   ;;  %vm2230_vm4 = vcmask 523264   ;;  %s6711_s23 = sld [smem:[#allocation52_spill]]  ;;  %s6712_s20 = sld [smem:[#allocation53_spill]] }
 0x1ca   : > { %v934_v18 = vld [vmem:[%s6702_s0] sm:$0xff]  ;;  %v935_v19 = vld [vmem:[%s6702_s0 + $0x8] sm:$0xff]  ;;  %v936_v23 = vld [vmem:[%s6702_s0 + $0x10] sm:$0xff]  ;;  %v6172_v61 = vsel %vm876_vm9, 1.0, %v5556_v35  ;;  %s4148_s24 = sshll.u32 %s5690_s29, 7  ;;  %s6713_s17 = sshll.u32 %s6074_s9, 3 }
 0x1cb   : > { %v1112_v20 = vld [vmem:[%s6703_s19] sm:$0xff]  ;;  %v4555_v21 = vpack.c.bf16 %v935_v19, %v934_v18  ;;  %v1113_v22 = vld [vmem:[%s6703_s19 + $0x8] sm:$0xff]  ;;  %v937_v24 = vld [vmem:[%s6702_s0 + $0x18] sm:$0xff]  ;;  %s856_s12 = scalar_lea.vmem [#allocation26], %s6713_s17  ;;  %s3779_s18 = scalar_lea.sflag [#allocation5], %s6074_s9 }
 0x1cc   : > { %v6116_v5 = vld [vmem:[#allocation2 + $0x8] sm:$0xf]  ;;  %v4571_v25 = vpack.c.bf16 %v1113_v22, %v1112_v20  ;;  %v4559_v26 = vpack.c.bf16 %v937_v24, %v936_v23  ;;  %v1114_v27 = vld [vmem:[%s6703_s19 + $0x10] sm:$0xff]  ;;  %v1115_v28 = vld [vmem:[%s6703_s19 + $0x18] sm:$0xff]  ;;  %s3792_s1 = sshll.u32 %s856_s12, 4  ;;  %p6715_p0 = scmp.ne.s32.totalorder %s6682_s7, 0  ;;  %s6555_s1 = int_to_ptr.vmem [resolvable:$true] %s3792_s1 }
 0x1cd   : > { %v6114_v4 = vld [vmem:[#allocation2] sm:$0xff]  ;;  %v894_v7 = vsel %vm863_vm0, %v6116_v5, 0.0  ;;  %4556 = vmatprep.subr.bf16.mxu1 %v4555_v21  ;;  %v4575_v29 = vpack.c.bf16 %v1115_v28, %v1114_v27  ;;  %v1027_v31 = vld [vmem:[%s6704_s6 + $0x8] sm:$0xff]  ;;  %v1028_v51 = vld [vmem:[%s6704_s6 + $0x10] sm:$0xff]  ;;  %s5442_s3 = scalar_lea.vmem %s6555_s1, 128  ;;  %s5558_s29 = smov [#allocation26]  }
 0x1ce   : > { %v891_v6 = vsel %vm860_vm1, %v6114_v4, 0.0  ;;  %4558 = vmatpush3.bf16.msra.mxu1 %v4555_v21  ;;  %4572 = vmatprep.subr.bf16.mxu0 %v4571_v25  ;;  %v1026_v30 = vld [vmem:[%s6704_s6] sm:$0xff]  ;;  %v1029_v52 = vld [vmem:[%s6704_s6 + $0x18] sm:$0xff]  ;;  %vm881_vm11 = vmand %vm879_vm7, %vm880_vm8  ;;  %p5443_p6 = scmp.ne.s32.totalorder %s6555_s1, %s5442_s3 }
 0x1cf   : > { %892 = vadd.xlane.f32.xlu0 %v891_v6  ;;  %4574 = vmatpush3.bf16.msra.mxu0 %v4571_v25  ;;  %v4563_v32 = vpack.c.bf16 %v1027_v31, %v1026_v30  ;;  %v4567_v55 = vpack.c.bf16 %v1029_v52, %v1028_v51  ;;  %v6174_v62 = vsel %vm881_vm11, 1.0, %v5556_v35  ;;  %v4125_v27 = vld [vmem:[#allocation18 + $0x1] ss:$0 sm:$0xff] }
 0x1d0   : > { %4560 = vmatprep.subr.bf16.mxu1 %v4559_v26  ;;  %4576 = vmatprep.subr.bf16.mxu0 %v4575_v29  ;;  %p5444_p2 = pnand %p5443_p6, %p6715_p0 }
 0x1d2   : > { %4562 = vmatpush3.bf16.msra.mxu1 %v4559_v26  ;;  %p5445_p8 = pneg %p5444_p2 }
 0x1d3   : > { %895 = vadd.xlane.f32.xlu0 %v894_v7  ;;  %4578 = vmatpush3.bf16.msra.mxu0 %v4575_v29 }
 0x1d4   : > { %4564 = vmatprep.subr.bf16.mxu1 %v4563_v32 }
 0x25c   : > { %v893_v8 = vpop.xlane.xlu0 %892 }
 0x25d   : > { %v898_v9 = vmul.f32 0.03125, %v893_v8 }
 0x25f   : > { %v900_v10 = vsub.f32 %v6114_v4, %v898_v9 }
 0x260   : > { %v896_v11 = vpop.xlane.xlu0 %895 }
 0x261   : > { %v899_v12 = vmul.f32 0.03125, %v896_v11  ;;  %v902_v13 = vmul.f32 %v900_v10, %v900_v10 }
 0x263   : > { %v901_v14 = vsub.f32 %v6116_v5, %v899_v12  ;;  %v904_v15 = vsel %vm860_vm1, %v902_v13, 0.0 }
 0x264   : > { %905 = vadd.xlane.f32.xlu1 %v904_v15 }
 0x265   : > { %v903_v16 = vmul.f32 %v901_v14, %v901_v14 }
 0x267   : > { %v907_v17 = vsel %vm863_vm0, %v903_v16, 0.0  ;;  %v4029_v16 = vld [vmem:[#allocation14] ss:$0 sm:$0xff] }
 0x268   : > { %908 = vadd.xlane.f32.xlu1 %v907_v17 }
 0x2f1   : > { %v906_v37 = vpop.xlane.xlu1 %905 }
 0x2f2   : > { %v910_v38 = vmul.f32 0.03125, %v906_v37 }
 0x2f4   : > { %v912_v39 = vadd.f32 1e-06, %v910_v38 }
 0x2f5   : > { %v909_v40 = vpop.xlane.xlu1 %908 }
 0x2f6   : > { %4958 = vrsqrt.f32 %v912_v39  ;;  %v911_v41 = vmul.f32 0.03125, %v909_v40 }
 0x2f8   : > { %v913_v42 = vadd.f32 1e-06, %v911_v41 }
 0x2fa   : > { %4960 = vrsqrt.f32 %v913_v42 }
 0x300   : > { %v4959_v43 = vpop.eup %4958 }
 0x301   : > { %v916_v45 = vmul.f32 %v4959_v43, %v900_v10 }
 0x303   : > { %v924_v47 = vmul.f32 %v4024_v44, %v916_v45 }
 0x304   : > { %v4961_v48 = vpop.eup %4960 }
 0x305   : > { %v917_v49 = vmul.f32 %v4961_v48, %v901_v14  ;;  %v932_v50 = vadd.f32 %v4025_v46, %v924_v47 }
 0x307   : > { %v925_v53 = vmul.f32 %v4024_v44, %v917_v49  ;;  %4303 = vmatprep.mubr.msk.f32.mxu1 %vm860_vm1, %v932_v50  ;;  %4325 = vmatprep.mubr.msk.f32.mxu0 %vm860_vm1, %v932_v50 }
 0x309   : > { %v933_v54 = vadd.f32 %v4025_v46, %v925_v53 }
 0x30b   : > { %4304 = vmatmul.mubr.msk.f32.vlgmr.msra.gmra.mrb[0].mxu1 %vm860_vm1, %v933_v54  ;;  %4326 = vmatmul.mubr.msk.f32.vlgmr.msra.gmra.mrb[0].mxu0 %vm860_vm1, %v933_v54 }
 0x30c   : > { %4566 = vmatpush3.bf16.msra.mxu1 %v4563_v32  ;;  %4314 = vmatprep.mubr.msk.f32.mxu1 %vm860_vm1, %v932_v50 }
 0x30d   : > { %4568 = vmatprep.subr.bf16.mxu1 %v4567_v55 }
 0x310   : > { %4570 = vmatpush3.bf16.msra.mxu1 %v4567_v55 }
 0x313   : > { %4315 = vmatmul.mubr.msk.f32.vlgmr.msra.gmra.mrb[2].mxu1 %vm860_vm1, %v933_v54 }
 0x3de   : > { %v4305_v58 = vpop.f32.mrb[0].mxu1  ;;  %v4327_v59 = vpop.f32.mrb[0].mxu0 }
 0x3df   : > { %v1195_v63 = vadd.f32 %v4327_v59, %v4032_v56  ;;  %v1017_v0 = vpop.f32.mrb[1].mxu1  ;;  %v1189_v1 = vpop.f32.mrb[1].mxu0  ;;  %v6222_v28 = vadd.f32 %v4305_v58, %v4026_v57 }
 0x3e0   : > { %v6176_v2 = vadd.f32 %v4026_v57, %v1017_v0  ;;  %v1190_v3 = vadd.f32 %v4032_v56, %v1189_v1 }
 0x3e1   : > { %v1312_v6 = vmul.f32 %v6170_v60, %v1195_v63  ;;  %v1419_v7 = vmul.f32 %v6172_v61, %v1195_v63  ;;  %v1695_v8 = vmul.f32 %v6174_v62, %v1195_v63  ;;  %v1888_v9 = vmul.f32 %v6156_v36, %v1195_v63 }
 0x3e2   : > { %v1311_v10 = vmul.f32 %v6170_v60, %v1190_v3  ;;  %v1418_v11 = vmul.f32 %v6172_v61, %v1190_v3  ;;  %v1694_v12 = vmul.f32 %v6174_v62, %v1190_v3  ;;  %v1887_v13 = vmul.f32 %v6156_v36, %v1190_v3 }
 0x3e3   : > { %v1198_v14 = vmul.f32 %v6170_v60, %v6176_v2  ;;  %v1313_v15 = vmul.f32 %v6172_v61, %v6176_v2  ;;  %v1199_v29 = vmul.f32 %v6170_v60, %v6222_v28  ;;  %v1314_v30 = vmul.f32 %v6172_v61, %v6222_v28 }
 0x3e4   : > { %v4591_v17 = vpack.c.bf16 %v1419_v7, %v1418_v11  ;;  %v6190_v18 = vpack.c.bf16 %v1312_v6, %v1311_v10  ;;  %v6192_v19 = vpack.c.bf16 %v1695_v8, %v1694_v12  ;;  %v6194_v20 = vpack.c.bf16 %v1888_v9, %v1887_v13 }
 0x3e5   : > { %4332 = vmatprep.mubr.msk.f32.mxu1 %vm860_vm1, %v1198_v14  ;;  %4339 = vmatprep.mubr.msk.f32.mxu0 %vm860_vm1, %v1313_v15  ;;  %v1589_v31 = vmul.f32 %v6174_v62, %v6176_v2  ;;  %v1590_v32 = vmul.f32 %v6174_v62, %v6222_v28 }
 0x3e6   : > { %v4316_v21 = vpop.f32.mrb[2].mxu1 }
 0x3e7   : > { %v1109_v22 = vadd.f32 %v4316_v21, %v4029_v16  ;;  %v1103_v23 = vpop.f32.mrb[3].mxu1 }
 0x3e8   : > { %v1104_v24 = vadd.f32 %v4029_v16, %v1103_v23 }
 0x3ea   : > { %v6204_v26 = vpack.c.bf16 %v1109_v22, %v1104_v24 }
 0x3ec   : > { %4581 = vmatprep.subr.msk.bf16.mxu1 %vm6200_vm13, %v6204_v26  ;;  %4587 = vmatprep.subr.msk.bf16.mxu0 %vm6200_vm13, %v6204_v26 }
 0x3ed   : > { %4584 = vmatpush3.bf16.xpose.msk.msra.mxu1 %vm6200_vm13, %v6204_v26  ;;  %4590 = vmatpush3.bf16.xpose.msk.msra.mxu0 %vm6200_vm13, %v6204_v26 }
 0x3ee   : > { %4593 = vmatprep.subr.msk.bf16.mxu1 %vm6206_vm15, %v4591_v17  ;;  %4605 = vmatprep.subr.msk.bf16.mxu0 %vm6200_vm13, %v6204_v26 }
 0x3f4   : > { %4333 = vmatmul.mubr.msk.f32.vlgmr.msra.gmra.mrb[4].mxu1 %vm860_vm1, %v1199_v29  ;;  %4340 = vmatmul.mubr.msk.f32.vlgmr.msra.gmra.mrb[2].mxu0 %vm860_vm1, %v1314_v30 }
 0x3f5   : > { %4596 = vmatpush3.bf16.msk.msra.mxu1 %vm6206_vm15, %v4591_v17  ;;  %4608 = vmatpush3.bf16.xpose.msk.msra.mxu0 %vm6200_vm13, %v6204_v26 }
 0x3f6   : > { %4360 = vmatprep.mubr.msk.f32.mxu0 %vm860_vm1, %v1589_v31  ;;  %4599 = vmatprep.subr.msk.bf16.mxu1 %vm6206_vm15, %v6190_v18 }
 0x3fc   : > { %4361 = vmatmul.mubr.msk.f32.vlgmr.msra.gmra.mrb[4].mxu0 %vm860_vm1, %v1590_v32 }
 0x4c7   : > { %v4334_v33 = vpop.f32.mrb[4].mxu1  ;;  %v4341_v34 = vpop.f32.mrb[2].mxu0 }
 0x4c8   : > { %v1278_v35 = vpop.f32.mrb[5].mxu1  ;;  %v1387_v37 = vpop.f32.mrb[3].mxu0  ;;  %v1399_v38 = vsel %vm1291_vm2, %v4341_v34, -inf  ;;  %v1292_v40 = vsel %vm1291_vm2, %v4334_v33, -inf }
 0x4c9   : > { %1400 = vmax.xlane.f32.xlu1 %v1399_v38  ;;  %v1396_v39 = vsel %vm1287_vm3, %v1387_v37, -inf  ;;  %v1288_v41 = vsel %vm1287_vm3, %v1278_v35, -inf }
 0x4ca   : > { %1397 = vmax.xlane.f32.xlu0 %v1396_v39 }
 0x4cd   : > { %1293 = vmax.xlane.f32.xlu1 %v1292_v40 }
 0x4ce   : > { %1289 = vmax.xlane.f32.xlu0 %v1288_v41 }
 0x4cf   : > { %v4362_v42 = vpop.f32.mrb[4].mxu0 }
 0x4d0   : > { %v1663_v43 = vpop.f32.mrb[5].mxu0  ;;  %v1675_v44 = vsel %vm1291_vm2, %v4362_v42, -inf }
 0x4d1   : > { %1676 = vmax.xlane.f32.xlu1 %v1675_v44  ;;  %v1672_v45 = vsel %vm1287_vm3, %v1663_v43, -inf }
 0x4d2   : > { %1673 = vmax.xlane.f32.xlu0 %v1672_v45 }
 0x556   : > { %v1401_v46 = vpop.xlane.xlu1 %1400 }
 0x557   : > { %v1403_v47 = vsub.f32 %v4341_v34, %v1401_v46  ;;  %v1398_v48 = vpop.xlane.xlu0 %1397 }
 0x558   : > { %v1402_v49 = vsub.f32 %v1387_v37, %v1398_v48 }
 0x559   : > { %v1406_v50 = vmul.f32 1.442695, %v1403_v47 }
 0x55a   : > { %v1404_v51 = vmul.f32 1.442695, %v1402_v49  ;;  %v1294_v52 = vpop.xlane.xlu1 %1293 }
 0x55b   : > { %4962 = vpow2.f32 %v1406_v50  ;;  %v1296_v53 = vsub.f32 %v4334_v33, %v1294_v52  ;;  %v1290_v54 = vpop.xlane.xlu0 %1289 }
 0x55c   : > { %4964 = vpow2.f32 %v1404_v51  ;;  %v1295_v55 = vsub.f32 %v1278_v35, %v1290_v54  ;;  %v1975_v54 = vld [vmem:[#allocation17] sm:$0xff] }
 0x55d   : > { %v1299_v56 = vmul.f32 1.442695, %v1296_v53 }
 0x55e   : > { %v1297_v57 = vmul.f32 1.442695, %v1295_v55  ;;  %v1677_v58 = vpop.xlane.xlu1 %1676  ;;  %v1976_v55 = vld [vmem:[#allocation17 + $0x8] sm:$0xff] }
 0x55f   : > { %4966 = vpow2.f32 %v1299_v56  ;;  %v1679_v59 = vsub.f32 %v4362_v42, %v1677_v58  ;;  %v1674_v63 = vpop.xlane.xlu0 %1673  ;;  %v1977_v56 = vld [vmem:[#allocation17 + $0x10] sm:$0xff]  ;;  %v1978_v58 = vld [vmem:[#allocation17 + $0x18] sm:$0xff] }
 0x560   : > { %4968 = vpow2.f32 %v1297_v57  ;;  %v1678_v0 = vsub.f32 %v1663_v43, %v1674_v63  ;;  %v1782_v43 = vmul.f32 %v6156_v36, %v6176_v2  ;;  %v4627_v57 = vpack.c.bf16 %v1976_v55, %v1975_v54  ;;  %v2217_v54 = vld [vmem:[%s6709_s10 + $0x10] sm:$0xff]  ;;  %v2218_v55 = vld [vmem:[%s6709_s10 + $0x18] sm:$0xff] }
 0x561   : > { %v1682_v1 = vmul.f32 1.442695, %v1679_v59  ;;  %v4631_v59 = vpack.c.bf16 %v1978_v58, %v1977_v56  ;;  %v4647_v56 = vpack.c.bf16 %v2218_v55, %v2217_v54  ;;  %v2220_v58 = vld [vmem:[%s6709_s10 + $0x28] sm:$0xff] }
 0x562   : > { %v1680_v3 = vmul.f32 1.442695, %v1678_v0  ;;  %4628 = vmatprep.subr.bf16.mxu0 %v4627_v57 }
 0x563   : > { %4970 = vpow2.f32 %v1682_v1  ;;  %4630 = vmatpush3.bf16.msra.mxu0 %v4627_v57  ;;  %v2219_v57 = vld [vmem:[%s6709_s10 + $0x20] sm:$0xff] }
 0x564   : > { %4972 = vpow2.f32 %v1680_v3  ;;  %4632 = vmatprep.subr.bf16.mxu0 %v4631_v59 }
 0x565   : > { %v4963_v6 = vpop.eup %4962 }
 0x566   : > { %v4965_v7 = vpop.eup %4964  ;;  %v1411_v8 = vsel %vm1291_vm2, %v4963_v6, 0.0 }
 0x567   : > { %1412 = vadd.xlane.f32.xlu1 %v1411_v8  ;;  %v1408_v9 = vsel %vm1287_vm3, %v4965_v7, 0.0  ;;  %4634 = vmatpush3.bf16.msra.mxu0 %v4631_v59  ;;  %v4651_v59 = vpack.c.bf16 %v2220_v58, %v2219_v57 }
 0x568   : > { %1409 = vadd.xlane.f32.xlu0 %v1408_v9 }
 0x569   : > { %v4967_v10 = vpop.eup %4966 }
 0x56a   : > { %v4969_v11 = vpop.eup %4968  ;;  %v1304_v12 = vsel %vm1291_vm2, %v4967_v10, 0.0 }
 0x56b   : > { %1305 = vadd.xlane.f32.xlu1 %v1304_v12  ;;  %v1301_v13 = vsel %vm1287_vm3, %v4969_v11, 0.0 }
 0x56c   : > { %1302 = vadd.xlane.f32.xlu0 %v1301_v13 }
 0x56d   : > { %v4971_v14 = vpop.eup %4970 }
 0x56e   : > { %v4973_v15 = vpop.eup %4972  ;;  %v1687_v16 = vsel %vm1291_vm2, %v4971_v14, 0.0 }
 0x56f   : > { %1688 = vadd.xlane.f32.xlu1 %v1687_v16  ;;  %v1684_v17 = vsel %vm1287_vm3, %v4973_v15, 0.0 }
 0x570   : > { %1685 = vadd.xlane.f32.xlu0 %v1684_v17 }
 0x5f4   : > { %v1413_v21 = vpop.xlane.xlu1 %1412 }
 0x5f5   : > { %4974 = vrcp.f32 %v1413_v21  ;;  %v1410_v22 = vpop.xlane.xlu0 %1409 }
 0x5f6   : > { %4976 = vrcp.f32 %v1410_v22 }
 0x5f8   : > { %v1306_v24 = vpop.xlane.xlu1 %1305 }
 0x5f9   : > { %v1303_v23 = vpop.xlane.xlu0 %1302 }
 0x5fa   : > { %4978 = vrcp.f32 %v1303_v23 }
 0x5fb   : > { %4980 = vrcp.f32 %v1306_v24 }
 0x5fc   : > { %v1689_v34 = vpop.xlane.xlu1 %1688 }
 0x5fd   : > { %v1686_v29 = vpop.xlane.xlu0 %1685 }
 0x5fe   : > { %4982 = vrcp.f32 %v1686_v29 }
 0x5ff   : > { %v4975_v30 = vpop.eup %4974  ;;  %4984 = vrcp.f32 %v1689_v34  ;;  %v2113_v34 = vld [vmem:[#allocation23] sm:$0xff] }
 0x600   : > { %v4977_v31 = vpop.eup %4976  ;;  %v1417_v33 = vmul.f32 %v4975_v30, %v4963_v6 }
 0x601   : > { %v1416_v32 = vmul.f32 %v4977_v31, %v4965_v7 }
 0x603   : > { %4346 = vmatprep.mubr.msk.f32.mxu1 %vm1287_vm3, %v1416_v32 }
 0x604   : > { %v4979_v35 = vpop.eup %4978  ;;  %4347 = vmatmul.mubr.msk.f32.vlgmr.msra.gmra.mrb[6].mxu1 %vm1287_vm3, %v1417_v33 }
 0x605   : > { %4602 = vmatpush3.bf16.msk.msra.mxu1 %vm6206_vm15, %v6190_v18  ;;  %v1309_v37 = vmul.f32 %v4979_v35, %v4969_v11  ;;  %v4981_v38 = vpop.eup %4980  ;;  %v2114_v35 = vld [vmem:[#allocation23 + $0x8] sm:$0xff] }
 0x606   : > { %4611 = vmatprep.subr.msk.bf16.mxu1 %vm6206_vm15, %v6192_v19  ;;  %v1310_v40 = vmul.f32 %v4981_v38, %v4967_v10  ;;  %v4063_v10 = vld [vmem:[#allocation18] ss:$0 sm:$0xff]  ;;  %v2115_v38 = vld [vmem:[#allocation23 + $0x10] sm:$0xff] }
 0x607   : > { %4353 = vmatprep.mubr.msk.f32.mxu1 %vm1287_vm3, %v1309_v37  ;;  %v4635_v37 = vpack.c.bf16 %v2114_v35, %v2113_v34 }
 0x608   : > { %v4983_v39 = vpop.eup %4982 }
 0x609   : > { %v1692_v41 = vmul.f32 %v4983_v39, %v4973_v15  ;;  %v4985_v18 = vpop.eup %4984  ;;  %4636 = vmatprep.subr.bf16.mxu0 %v4635_v37  ;;  %v2116_v39 = vld [vmem:[#allocation23 + $0x18] sm:$0xff] }
 0x60a   : > { %v1693_v42 = vmul.f32 %v4985_v18, %v4971_v14 }
 0x60c   : > { %4354 = vmatmul.mubr.msk.f32.vlgmr.msra.gmra.mrb[6].mxu1 %vm1287_vm3, %v1310_v40  ;;  %v4639_v40 = vpack.c.bf16 %v2116_v39, %v2115_v38 }
 0x60d   : > { %4614 = vmatpush3.bf16.msk.msra.mxu1 %vm6206_vm15, %v6192_v19  ;;  %4367 = vmatprep.mubr.msk.f32.mxu1 %vm1287_vm3, %v1692_v41  ;;  %v1783_v19 = vmul.f32 %v6156_v36, %v6222_v28 }
 0x60e   : > { %4617 = vmatprep.subr.msk.bf16.mxu1 %vm6200_vm13, %v6204_v26 }
 0x614   : > { %4368 = vmatmul.mubr.msk.f32.vlgmr.msra.gmra.mrb[6].mxu1 %vm1287_vm3, %v1693_v42 }
 0x615   : > { %4374 = vmatprep.mubr.msk.f32.mxu1 %vm860_vm1, %v1782_v43 }
 0x616   : > { %4620 = vmatpush3.bf16.xpose.msk.msra.mxu1 %vm6200_vm13, %v6204_v26 }
 0x617   : > { %4623 = vmatprep.subr.msk.bf16.mxu1 %vm6206_vm15, %v6194_v20 }
 0x61d   : > { %4375 = vmatmul.mubr.msk.f32.vlgmr.msra.gmra.mrb[8].mxu1 %vm860_vm1, %v1783_v19 }
 0x61e   : > { %4626 = vmatpush3.bf16.msk.msra.mxu1 %vm6206_vm15, %v6194_v20 }
 0x6f0   : > { %v4376_v2 = vpop.f32.mrb[8].mxu1 }
 0x6f1   : > { %v1856_v44 = vpop.f32.mrb[9].mxu1  ;;  %v1868_v45 = vsel %vm1291_vm2, %v4376_v2, -inf }
 0x6f2   : > { %1869 = vmax.xlane.f32.xlu1 %v1868_v45  ;;  %v1865_v26 = vsel %vm1287_vm3, %v1856_v44, -inf  ;;  %v4066_v45 = vld [vmem:[#allocation20] ss:$0 sm:$0xff] }
 0x6f3   : > { %1866 = vmax.xlane.f32.xlu0 %v1865_v26 }
 0x77f   : > { %v1870_v46 = vpop.xlane.xlu1 %1869 }
 0x780   : > { %v1872_v47 = vsub.f32 %v4376_v2, %v1870_v46  ;;  %v1867_v48 = vpop.xlane.xlu0 %1866 }
 0x781   : > { %v1871_v49 = vsub.f32 %v1856_v44, %v1867_v48  ;;  %v4067_v48 = vld [vmem:[#allocation21] ss:$0 sm:$0xff] }
 0x782   : > { %v1875_v50 = vmul.f32 1.442695, %v1872_v47 }
 0x783   : > { %v1873_v28 = vmul.f32 1.442695, %v1871_v49 }
 0x784   : > { %4986 = vpow2.f32 %v1875_v50 }
 0x785   : > { %4988 = vpow2.f32 %v1873_v28 }
 0x78e   : > { %v4987_v51 = vpop.eup %4986 }
 0x78f   : > { %v4989_v52 = vpop.eup %4988  ;;  %v1880_v20 = vsel %vm1291_vm2, %v4987_v51, 0.0 }
 0x790   : > { %1881 = vadd.xlane.f32.xlu1 %v1880_v20  ;;  %v1877_v53 = vsel %vm1287_vm3, %v4989_v52, 0.0  ;;  %v2216_v20 = vld [vmem:[%s6709_s10 + $0x8] sm:$0xff] }
 0x791   : > { %1878 = vadd.xlane.f32.xlu0 %v1877_v53 }
 0x81d   : > { %v1882_v63 = vpop.xlane.xlu1 %1881 }
 0x81e   : > { %4990 = vrcp.f32 %v1882_v63  ;;  %v1879_v0 = vpop.xlane.xlu0 %1878  ;;  %v2221_v63 = vld [vmem:[%s6709_s10 + $0x30] sm:$0xff] }
 0x81f   : > { %4992 = vrcp.f32 %v1879_v0  ;;  %v2222_v0 = vld [vmem:[%s6709_s10 + $0x38] sm:$0xff] }
 0x828   : > { %v4991_v1 = vpop.eup %4990 }
 0x829   : > { %v4993_v3 = vpop.eup %4992  ;;  %v1886_v7 = vmul.f32 %v4991_v1, %v4987_v51  ;;  %v4655_v1 = vpack.c.bf16 %v2222_v0, %v2221_v63  ;;  %v4074_v0 = vld [vmem:[#allocation9 + $0x1] ss:$0 sm:$0xff] }
 0x82a   : > { %v1885_v6 = vmul.f32 %v4993_v3, %v4989_v52  ;;  %v2215_v52 = vld [vmem:[%s6709_s10] sm:$0xff]  ;;  %v4068_v3 = vld [vmem:[#allocation24] ss:$0 sm:$0xff] }
 0x82b   : > { %v4643_v53 = vpack.c.bf16 %v2216_v20, %v2215_v52  ;;  %v4083_v52 = vld [vmem:[%s6704_s6 + $0x20] sm:$0xff]  ;;  %v4084_v20 = vld [vmem:[%s6704_s6 + $0x28] sm:$0xff] }
 0x82c   : > { %4381 = vmatprep.mubr.msk.f32.mxu1 %vm1287_vm3, %v1885_v6 }
 0x82d   : > { %4382 = vmatmul.mubr.msk.f32.vlgmr.msra.gmra.mrb[6].mxu1 %vm1287_vm3, %v1886_v7  ;;  %4644 = vmatprep.subr.bf16.mxu1 %v4643_v53 }
 0x82e   : > { %4646 = vmatpush3.bf16.msra.mxu1 %v4643_v53  ;;  %v4667_v53 = vpack.c.bf16 %v4084_v20, %v4083_v52 }
 0x82f   : > { %4648 = vmatprep.subr.bf16.mxu1 %v4647_v56 }
 0x832   : > { %4650 = vmatpush3.bf16.msra.mxu1 %v4647_v56 }
 0x833   : > { %4652 = vmatprep.subr.bf16.mxu1 %v4651_v59 }
 0x836   : > { %4654 = vmatpush3.bf16.msra.mxu1 %v4651_v59 }
 0x837   : > { %4656 = vmatprep.subr.bf16.mxu1 %v4655_v1 }
 0x83a   : > { %4658 = vmatpush3.bf16.msra.mxu1 %v4655_v1 }
 0x900   : > { %v4383_v8 = vpop.f32.mrb[6].mxu1 }
 0x901   : > { %v1964_v9 = vpop.f32.mrb[7].mxu1 }
 0x902   : > { %4392 = vmatprep.mubr.msk.f32.mxu0 %vm860_vm1, %v1964_v9 }
 0x903   : > { %4393 = vmatmul.mubr.msk.f32.vlgmr.msra.gmra.mrb[6].mxu0 %vm860_vm1, %v4383_v8 }
 0x904   : > { %4638 = vmatpush3.bf16.msra.mxu0 %v4635_v37 }
 0x905   : > { %4640 = vmatprep.subr.bf16.mxu0 %v4639_v40 }
 0x908   : > { %4642 = vmatpush3.bf16.msra.mxu0 %v4639_v40 }
 0x9d6   : > { %v4394_v11 = vpop.f32.mrb[6].mxu0 }
 0x9d7   : > { %v2064_v12 = vadd.f32 %v4394_v11, %v4063_v10  ;;  %v2058_v13 = vpop.f32.mrb[7].mxu0 }
 0x9d8   : > { %v2059_v14 = vadd.f32 %v4063_v10, %v2058_v13 }
 0x9d9   : > { %v6303_v15 = vadd.f32 %v2064_v12, %v6116_v5 }
 0x9da   : > { %v6306_v16 = vadd.f32 %v2059_v14, %v6114_v4 }
 0x9db   : > { %v2074_v17 = vsel %vm863_vm0, %v6303_v15, 0.0 }
 0x9dc   : > { %2075 = vadd.xlane.f32.xlu1 %v2074_v17  ;;  %v2071_v21 = vsel %vm860_vm1, %v6306_v16, 0.0 }
 0x9dd   : > { %2072 = vadd.xlane.f32.xlu0 %v2071_v21 }
 0xa69   : > { %v2076_v22 = vpop.xlane.xlu1 %2075 }
 0xa6a   : > { %v2078_v23 = vmul.f32 0.03125, %v2076_v22  ;;  %v2073_v24 = vpop.xlane.xlu0 %2072 }
 0xa6b   : > { %v2077_v29 = vmul.f32 0.03125, %v2073_v24 }
 0xa6c   : > { %v2080_v30 = vsub.f32 %v6303_v15, %v2078_v23 }
 0xa6d   : > { %v2079_v5 = vsub.f32 %v6306_v16, %v2077_v29  ;;  %v4071_v29 = vld [vmem:[%s6710_s5] ss:$0 sm:$0xff] }
 0xa6e   : > { %v2082_v31 = vmul.f32 %v2080_v30, %v2080_v30 }
 0xa6f   : > { %v2081_v32 = vmul.f32 %v2079_v5, %v2079_v5 }
 0xa70   : > { %v2086_v4 = vsel %vm863_vm0, %v2082_v31, 0.0 }
 0xa71   : > { %2087 = vadd.xlane.f32.xlu1 %v2086_v4  ;;  %v2083_v33 = vsel %vm860_vm1, %v2081_v32, 0.0 }
 0xa72   : > { %2084 = vadd.xlane.f32.xlu0 %v2083_v33 }
 0xafe   : > { %v2088_v41 = vpop.xlane.xlu1 %2087 }
 0xaff   : > { %v2090_v18 = vmul.f32 0.03125, %v2088_v41  ;;  %v2085_v42 = vpop.xlane.xlu0 %2084 }
 0xb00   : > { %v2089_v43 = vmul.f32 0.03125, %v2085_v42 }
 0xb01   : > { %v2092_v19 = vadd.f32 1e-06, %v2090_v18 }
 0xb02   : > { %v2091_v2 = vadd.f32 1e-06, %v2089_v43 }
 0xb03   : > { %4994 = vrsqrt.f32 %v2092_v19  ;;  %v4076_v19 = vld [vmem:[%s6702_s0 + $0x20] sm:$0xff] }
 0xb04   : > { %4996 = vrsqrt.f32 %v2091_v2  ;;  %v4077_v2 = vld [vmem:[%s6702_s0 + $0x28] sm:$0xff] }
 0xb0d   : > { %v4995_v44 = vpop.eup %4994 }
 0xb0e   : > { %v4997_v26 = vpop.eup %4996  ;;  %v2096_v46 = vmul.f32 %v4995_v44, %v2080_v30  ;;  %v4659_v44 = vpack.c.bf16 %v4077_v2, %v4076_v19 }
 0xb0f   : > { %v2095_v47 = vmul.f32 %v4997_v26, %v2079_v5  ;;  %v4091_v26 = vld [vmem:[%s6703_s19 + $0x28] sm:$0xff] }
 0xb10   : > { %v2104_v49 = vmul.f32 %v4066_v45, %v2096_v46  ;;  %4660 = vmatprep.subr.bf16.mxu0 %v4659_v44 }
 0xb11   : > { %v2103_v50 = vmul.f32 %v4066_v45, %v2095_v47  ;;  %v4090_v45 = vld [vmem:[%s6703_s19 + $0x20] sm:$0xff]  ;;  %v4078_v47 = vld [vmem:[%s6702_s0 + $0x30] sm:$0xff] }
 0xb12   : > { %v2112_v51 = vadd.f32 %v4067_v48, %v2104_v49  ;;  %v4675_v46 = vpack.c.bf16 %v4091_v26, %v4090_v45  ;;  %v4092_v49 = vld [vmem:[%s6703_s19 + $0x30] sm:$0xff] }
 0xb13   : > { %v2111_v28 = vadd.f32 %v4067_v48, %v2103_v50  ;;  %v4079_v48 = vld [vmem:[%s6702_s0 + $0x38] sm:$0xff] }
 0xb14   : > { %4676 = vmatprep.subr.bf16.mxu1 %v4675_v46  ;;  %v4663_v50 = vpack.c.bf16 %v4079_v48, %v4078_v47 }
 0xb15   : > { %4403 = vmatprep.mubr.msk.f32.mxu0 %vm860_vm1, %v2111_v28  ;;  %v4093_v28 = vld [vmem:[%s6703_s19 + $0x38] sm:$0xff] }
 0xb16   : > { %4404 = vmatmul.mubr.msk.f32.vlgmr.msra.gmra.mrb[8].mxu0 %vm860_vm1, %v2112_v51  ;;  %v4679_v51 = vpack.c.bf16 %v4093_v28, %v4092_v49 }
 0xb17   : > { %4662 = vmatpush3.bf16.msra.mxu0 %v4659_v44 }
 0xb18   : > { %4664 = vmatprep.subr.bf16.mxu0 %v4663_v50 }
 0xb1b   : > { %4666 = vmatpush3.bf16.msra.mxu0 %v4663_v50 }
 0xb1c   : > { %4668 = vmatprep.subr.bf16.mxu0 %v4667_v53 }
 0xbe9   : > { %v4405_v6 = vpop.f32.mrb[8].mxu0 }
 0xbea   : > { %v2202_v7 = vadd.f32 %v4405_v6, %v4068_v3  ;;  %v2196_v8 = vpop.f32.mrb[9].mxu0 }
 0xbeb   : > { %v2197_v9 = vadd.f32 %v4068_v3, %v2196_v8 }
 0xbec   : > { %v2208_v10 = vmul.f32 0.70710677, %v2202_v7  ;;  %v2206_v22 = vmul.f32 0.5, %v2202_v7  ;;  %v4075_v7 = vld [vmem:[#allocation11 + $0x1] ss:$0 sm:$0xff] }
 0xbed   : > { %v2207_v11 = vmul.f32 0.70710677, %v2197_v9  ;;  %v2205_v17 = vmul.f32 0.5, %v2197_v9 }
 0xbee   : > { %4998 = verf.f32 %v2208_v10  ;;  %v4085_v10 = vld [vmem:[%s6704_s6 + $0x30] sm:$0xff] }
 0xbef   : > { %5000 = verf.f32 %v2207_v11  ;;  %v4086_v11 = vld [vmem:[%s6704_s6 + $0x38] sm:$0xff]  ;;  %s6714_s6 = sld [smem:[#allocation54_spill]] }
 0xbf8   : > { %v4999_v12 = vpop.eup %4998 }
 0xbf9   : > { %v5001_v13 = vpop.eup %5000  ;;  %v2212_v14 = vadd.f32 1.0, %v4999_v12 }
 0xbfa   : > { %v2211_v21 = vadd.f32 1.0, %v5001_v13 }
 0xbfb   : > { %v2214_v24 = vmul.f32 %v2212_v14, %v2206_v22  ;;  %v4671_v14 = vpack.c.bf16 %v4086_v11, %v4085_v10 }
 0xbfc   : > { %v2213_v23 = vmul.f32 %v2211_v21, %v2205_v17  ;;  %v4094_v17 = vld [vmem:[#allocation15 + $0x1] ss:$0 sm:$0xff]  ;;  %v4080_v21 = vld [vmem:[#allocation12 + $0x1] ss:$0 sm:$0xff] }
 0xbfe   : > { %4422 = vmatprep.mubr.msk.f32.mxu1 %vm2230_vm4, %v2213_v23 }
 0xbff   : > { %4423 = vmatmul.mubr.msk.f32.vlgmr.msra.gmra.mrb[10].mxu1 %vm2230_vm4, %v2214_v24 }
 0xc00   : > { %4678 = vmatpush3.bf16.msra.mxu1 %v4675_v46 }
 0xc01   : > { %4680 = vmatprep.subr.bf16.mxu1 %v4679_v51 }
 0xc04   : > { %4682 = vmatpush3.bf16.msra.mxu1 %v4679_v51 }
 0xcd2   : > { %v4424_v30 = vpop.f32.mrb[10].mxu1 }
 0xcd3   : > { %v2309_v5 = vadd.f32 %v4424_v30, %v4071_v29  ;;  %v2303_v31 = vpop.f32.mrb[11].mxu1 }
 0xcd4   : > { %v2304_v32 = vadd.f32 %v4071_v29, %v2303_v31 }
 0xcd5   : > { %v6348_v4 = vadd.f32 %v2309_v5, %v6303_v15 }
 0xcd6   : > { %v6351_v33 = vadd.f32 %v2304_v32, %v6306_v16 }
 0xcd7   : > { %v2321_v34 = vsel %vm863_vm0, %v6348_v4, 0.0 }
 0xcd8   : > { %2322 = vadd.xlane.f32.xlu1 %v2321_v34  ;;  %v2318_v35 = vsel %vm860_vm1, %v6351_v33, 0.0 }
 0xcd9   : > { %2319 = vadd.xlane.f32.xlu0 %v2318_v35 }
 0xd65   : > { %v2323_v37 = vpop.xlane.xlu1 %2322 }
 0xd66   : > { %v2325_v38 = vmul.f32 0.03125, %v2323_v37  ;;  %v2320_v39 = vpop.xlane.xlu0 %2319 }
 0xd67   : > { %v2324_v40 = vmul.f32 0.03125, %v2320_v39 }
 0xd68   : > { %v2327_v41 = vsub.f32 %v6348_v4, %v2325_v38 }
 0xd69   : > { %v2326_v15 = vsub.f32 %v6351_v33, %v2324_v40 }
 0xd6a   : > { %v2329_v18 = vmul.f32 %v2327_v41, %v2327_v41 }
 0xd6b   : > { %v2328_v42 = vmul.f32 %v2326_v15, %v2326_v15 }
 0xd6c   : > { %v2333_v16 = vsel %vm863_vm0, %v2329_v18, 0.0 }
 0xd6d   : > { %2334 = vadd.xlane.f32.xlu1 %v2333_v16  ;;  %v2330_v43 = vsel %vm860_vm1, %v2328_v42, 0.0  ;;  %v4087_v42 = vld [vmem:[#allocation14 + $0x1] ss:$0 sm:$0xff] }
 0xd6e   : > { %2331 = vadd.xlane.f32.xlu0 %v2330_v43 }
 0xdfa   : > { %v2335_v54 = vpop.xlane.xlu1 %2334 }
 0xdfb   : > { %v2337_v55 = vmul.f32 0.03125, %v2335_v54  ;;  %v2332_v56 = vpop.xlane.xlu0 %2331 }
 0xdfc   : > { %v2336_v57 = vmul.f32 0.03125, %v2332_v56 }
 0xdfd   : > { %v2339_v58 = vadd.f32 1e-06, %v2337_v55 }
 0xdfe   : > { %v2338_v59 = vadd.f32 1e-06, %v2336_v57 }
 0xdff   : > { %5002 = vrsqrt.f32 %v2339_v58 }
 0xe00   : > { %5004 = vrsqrt.f32 %v2338_v59 }
 0xe09   : > { %v5003_v63 = vpop.eup %5002 }
 0xe0a   : > { %v5005_v1 = vpop.eup %5004  ;;  %v2343_v3 = vmul.f32 %v5003_v63, %v2327_v41 }
 0xe0b   : > { %v2342_v6 = vmul.f32 %v5005_v1, %v2326_v15 }
 0xe0c   : > { %v2351_v8 = vmul.f32 %v4074_v0, %v2343_v3 }
 0xe0d   : > { %v2350_v9 = vmul.f32 %v4074_v0, %v2342_v6 }
 0xe0e   : > { %v2359_v13 = vadd.f32 %v4075_v7, %v2351_v8 }
 0xe0f   : > { %v2358_v12 = vadd.f32 %v4075_v7, %v2350_v9 }
 0xe11   : > { %4433 = vmatprep.mubr.msk.f32.mxu0 %vm860_vm1, %v2358_v12  ;;  %4455 = vmatprep.mubr.msk.f32.mxu1 %vm860_vm1, %v2358_v12 }
 0xe12   : > { %4434 = vmatmul.mubr.msk.f32.vlgmr.msra.gmra.mrb[10].mxu0 %vm860_vm1, %v2359_v13  ;;  %4456 = vmatmul.mubr.msk.f32.vlgmr.msra.gmra.mrb[12].mxu1 %vm860_vm1, %v2359_v13 }
 0xe13   : > { %4670 = vmatpush3.bf16.msra.mxu0 %v4667_v53  ;;  %4444 = vmatprep.mubr.msk.f32.mxu0 %vm860_vm1, %v2358_v12 }
 0xe14   : > { %4672 = vmatprep.subr.bf16.mxu0 %v4671_v14 }
 0xe17   : > { %4674 = vmatpush3.bf16.msra.mxu0 %v4671_v14 }
 0xe1a   : > { %4445 = vmatmul.mubr.msk.f32.vlgmr.msra.gmra.mrb[12].mxu0 %vm860_vm1, %v2359_v13 }
 0xee5   : > { %v4435_v22 = vpop.f32.mrb[10].mxu0  ;;  %v4457_v23 = vpop.f32.mrb[12].mxu1 }
 0xee6   : > { %v2627_v24 = vadd.f32 %v4457_v23, %v4094_v17  ;;  %v2445_v29 = vpop.f32.mrb[11].mxu0  ;;  %v2621_v30 = vpop.f32.mrb[13].mxu1  ;;  %v2451_v48 = vadd.f32 %v4435_v22, %v4080_v21 }
 0xee7   : > { %v2446_v5 = vadd.f32 %v4080_v21, %v2445_v29  ;;  %v2622_v31 = vadd.f32 %v4094_v17, %v2621_v30 }
 0xee8   : > { %v2742_v32 = vmul.f32 %v6170_v60, %v2627_v24  ;;  %v2849_v34 = vmul.f32 %v6172_v61, %v2627_v24  ;;  %v3124_v35 = vmul.f32 %v6174_v62, %v2627_v24  ;;  %v3317_v37 = vmul.f32 %v6156_v36, %v2627_v24 }
 0xee9   : > { %v2741_v38 = vmul.f32 %v6170_v60, %v2622_v31  ;;  %v2848_v39 = vmul.f32 %v6172_v61, %v2622_v31  ;;  %v3123_v40 = vmul.f32 %v6174_v62, %v2622_v31  ;;  %v3316_v41 = vmul.f32 %v6156_v36, %v2622_v31 }
 0xeea   : > { %v2630_v15 = vmul.f32 %v6170_v60, %v2446_v5  ;;  %v2743_v18 = vmul.f32 %v6172_v61, %v2446_v5  ;;  %v2631_v49 = vmul.f32 %v6170_v60, %v2451_v48  ;;  %v2744_v50 = vmul.f32 %v6172_v61, %v2451_v48 }
 0xeeb   : > { %v4695_v16 = vpack.c.bf16 %v2849_v34, %v2848_v39  ;;  %v6413_v43 = vpack.c.bf16 %v2742_v32, %v2741_v38  ;;  %v6415_v19 = vpack.c.bf16 %v3124_v35, %v3123_v40  ;;  %v6417_v2 = vpack.c.bf16 %v3317_v37, %v3316_v41 }
 0xeec   : > { %4462 = vmatprep.mubr.msk.f32.mxu0 %vm860_vm1, %v2630_v15  ;;  %4469 = vmatprep.mubr.msk.f32.mxu1 %vm860_vm1, %v2743_v18  ;;  %v3018_v28 = vmul.f32 %v6174_v62, %v2446_v5  ;;  %v3019_v60 = vmul.f32 %v6174_v62, %v2451_v48  ;;  %v3211_v61 = vmul.f32 %v6156_v36, %v2446_v5 }
 0xeed   : > { %v4446_v44 = vpop.f32.mrb[12].mxu0  ;;  %v3212_v51 = vmul.f32 %v6156_v36, %v2451_v48 }
 0xeee   : > { %v2539_v45 = vadd.f32 %v4446_v44, %v4087_v42  ;;  %v2533_v26 = vpop.f32.mrb[13].mxu0 }
 0xeef   : > { %v2534_v46 = vadd.f32 %v4087_v42, %v2533_v26 }
 0xef1   : > { %v4683_v47 = vpack.c.bf16 %v2539_v45, %v2534_v46 }
 0xef3   : > { %4685 = vmatprep.subr.msk.bf16.mxu0 %vm6200_vm13, %v4683_v47  ;;  %4691 = vmatprep.subr.msk.bf16.mxu1 %vm6200_vm13, %v4683_v47 }
 0xef4   : > { %4688 = vmatpush3.bf16.xpose.msk.msra.mxu0 %vm6200_vm13, %v4683_v47  ;;  %4694 = vmatpush3.bf16.xpose.msk.msra.mxu1 %vm6200_vm13, %v4683_v47 }
 0xef5   : > { %4697 = vmatprep.subr.msk.bf16.mxu0 %vm6206_vm15, %v4695_v16  ;;  %4709 = vmatprep.subr.msk.bf16.mxu1 %vm6200_vm13, %v4683_v47 }
 0xefb   : > { %4463 = vmatmul.mubr.msk.f32.vlgmr.msra.gmra.mrb[14].mxu0 %vm860_vm1, %v2631_v49  ;;  %4470 = vmatmul.mubr.msk.f32.vlgmr.msra.gmra.mrb[14].mxu1 %vm860_vm1, %v2744_v50 }
 0xefc   : > { %4700 = vmatpush3.bf16.msk.msra.mxu0 %vm6206_vm15, %v4695_v16  ;;  %4712 = vmatpush3.bf16.xpose.msk.msra.mxu1 %vm6200_vm13, %v4683_v47 }
 0xefd   : > { %4490 = vmatprep.mubr.msk.f32.mxu1 %vm860_vm1, %v3018_v28  ;;  %4703 = vmatprep.subr.msk.bf16.mxu0 %vm6206_vm15, %v6413_v43 }
 0xefe   : > { %4721 = vmatprep.subr.msk.bf16.mxu1 %vm6200_vm13, %v4683_v47 }
 0xf03   : > { %4491 = vmatmul.mubr.msk.f32.vlgmr.msra.gmra.mrb[16].mxu1 %vm860_vm1, %v3019_v60 }
 0xf04   : > { %4724 = vmatpush3.bf16.xpose.msk.msra.mxu1 %vm6200_vm13, %v4683_v47  ;;  %4504 = vmatprep.mubr.msk.f32.mxu1 %vm860_vm1, %v3211_v61 }
 0xf0b   : > { %4505 = vmatmul.mubr.msk.f32.vlgmr.msra.gmra.mrb[18].mxu1 %vm860_vm1, %v3212_v51 }
 0xfce   : > { %v4464_v52 = vpop.f32.mrb[14].mxu0  ;;  %v4471_v20 = vpop.f32.mrb[14].mxu1 }
 0xfcf   : > { %v2710_v53 = vpop.f32.mrb[15].mxu0  ;;  %v2817_v54 = vpop.f32.mrb[15].mxu1  ;;  %v2829_v55 = vsel %vm1291_vm2, %v4471_v20, -inf  ;;  %v2722_v56 = vsel %vm1291_vm2, %v4464_v52, -inf }
 0xfd0   : > { %2830 = vmax.xlane.f32.xlu1 %v2829_v55  ;;  %v2826_v62 = vsel %vm1287_vm3, %v2817_v54, -inf  ;;  %v2719_v25 = vsel %vm1287_vm3, %v2710_v53, -inf }
 0xfd1   : > { %2827 = vmax.xlane.f32.xlu0 %v2826_v62 }
 0xfd4   : > { %2723 = vmax.xlane.f32.xlu1 %v2722_v56 }
 0xfd5   : > { %2720 = vmax.xlane.f32.xlu0 %v2719_v25 }
 0xfd6   : > { %v4492_v57 = vpop.f32.mrb[16].mxu1 }
 0xfd7   : > { %v3092_v36 = vpop.f32.mrb[17].mxu1  ;;  %v3104_v58 = vsel %vm1291_vm2, %v4492_v57, -inf }
 0xfd8   : > { %3105 = vmax.xlane.f32.xlu1 %v3104_v58  ;;  %v3101_v59 = vsel %vm1287_vm3, %v3092_v36, -inf }
 0xfd9   : > { %3102 = vmax.xlane.f32.xlu0 %v3101_v59 }
 0xfde   : > { %v4506_v63 = vpop.f32.mrb[18].mxu1 }
 0xfdf   : > { %v3285_v0 = vpop.f32.mrb[19].mxu1  ;;  %v3297_v1 = vsel %vm1291_vm2, %v4506_v63, -inf }
 0xfe0   : > { %3298 = vmax.xlane.f32.xlu1 %v3297_v1  ;;  %v3294_v3 = vsel %vm1287_vm3, %v3285_v0, -inf }
 0xfe1   : > { %3295 = vmax.xlane.f32.xlu0 %v3294_v3 }
0x105d   : > { %v2831_v6 = vpop.xlane.xlu1 %2830 }
0x105e   : > { %v2833_v7 = vsub.f32 %v4471_v20, %v2831_v6  ;;  %v2828_v8 = vpop.xlane.xlu0 %2827  ;;  %v3405_v6 = vld [vmem:[#allocation17 + $0x20] sm:$0xff] }
0x105f   : > { %v2832_v9 = vsub.f32 %v2817_v54, %v2828_v8 }
0x1060   : > { %v2836_v10 = vmul.f32 1.442695, %v2833_v7  ;;  %v3406_v7 = vld [vmem:[#allocation17 + $0x28] sm:$0xff] }
0x1061   : > { %v2834_v11 = vmul.f32 1.442695, %v2832_v9  ;;  %v2724_v12 = vpop.xlane.xlu1 %2723 }
0x1062   : > { %5006 = vpow2.f32 %v2836_v10  ;;  %v2726_v13 = vsub.f32 %v4464_v52, %v2724_v12  ;;  %v2721_v14 = vpop.xlane.xlu0 %2720  ;;  %v4731_v10 = vpack.c.bf16 %v3406_v7, %v3405_v6  ;;  %v3407_v12 = vld [vmem:[#allocation17 + $0x30] sm:$0xff]  ;;  %v4140_v6 = vld [vmem:[%s6709_s10 + $0x78] sm:$0xff] }
0x1063   : > { %5008 = vpow2.f32 %v2834_v11  ;;  %v2725_v17 = vsub.f32 %v2710_v53, %v2721_v14 }
0x1064   : > { %v2729_v21 = vmul.f32 1.442695, %v2726_v13  ;;  %v3408_v13 = vld [vmem:[#allocation17 + $0x38] sm:$0xff] }
0x1065   : > { %v2727_v22 = vmul.f32 1.442695, %v2725_v17  ;;  %v3106_v23 = vpop.xlane.xlu1 %3105  ;;  %v4735_v17 = vpack.c.bf16 %v3408_v13, %v3407_v12 }
0x1066   : > { %5010 = vpow2.f32 %v2729_v21  ;;  %v3108_v24 = vsub.f32 %v4492_v57, %v3106_v23  ;;  %v3103_v29 = vpop.xlane.xlu0 %3102 }
0x1067   : > { %5012 = vpow2.f32 %v2727_v22  ;;  %v3107_v30 = vsub.f32 %v3092_v36, %v3103_v29 }
0x1068   : > { %v3111_v5 = vmul.f32 1.442695, %v3108_v24 }
0x1069   : > { %v3109_v31 = vmul.f32 1.442695, %v3107_v30 }
0x106a   : > { %5014 = vpow2.f32 %v3111_v5 }
0x106b   : > { %5016 = vpow2.f32 %v3109_v31 }
0x106c   : > { %v5007_v32 = vpop.eup %5006 }
0x106d   : > { %v5009_v34 = vpop.eup %5008  ;;  %v3299_v35 = vpop.xlane.xlu1 %3298  ;;  %v2841_v37 = vsel %vm1291_vm2, %v5007_v32, 0.0 }
0x106e   : > { %v3301_v38 = vsub.f32 %v4506_v63, %v3299_v35  ;;  %2842 = vadd.xlane.f32.xlu1 %v2841_v37  ;;  %v3296_v39 = vpop.xlane.xlu0 %3295  ;;  %v2838_v40 = vsel %vm1287_vm3, %v5009_v34, 0.0 }
0x106f   : > { %v3300_v41 = vsub.f32 %v3285_v0, %v3296_v39  ;;  %2839 = vadd.xlane.f32.xlu0 %v2838_v40 }
0x1070   : > { %v5011_v15 = vpop.eup %5010  ;;  %v3304_v18 = vmul.f32 1.442695, %v3301_v38 }
0x1071   : > { %v5013_v42 = vpop.eup %5012  ;;  %v3302_v16 = vmul.f32 1.442695, %v3300_v41  ;;  %v2734_v44 = vsel %vm1291_vm2, %v5011_v15, 0.0 }
0x1072   : > { %5018 = vpow2.f32 %v3304_v18  ;;  %2735 = vadd.xlane.f32.xlu1 %v2734_v44  ;;  %v2731_v45 = vsel %vm1287_vm3, %v5013_v42, 0.0  ;;  %v3547_v18 = vld [vmem:[#allocation23 + $0x20] sm:$0xff]  ;;  %v3549_v44 = vld [vmem:[#allocation23 + $0x30] sm:$0xff] }
0x1073   : > { %5020 = vpow2.f32 %v3302_v16  ;;  %2732 = vadd.xlane.f32.xlu0 %v2731_v45  ;;  %v3550_v45 = vld [vmem:[#allocation23 + $0x38] sm:$0xff] }
0x1074   : > { %v5015_v26 = vpop.eup %5014 }
0x1075   : > { %v5017_v46 = vpop.eup %5016  ;;  %v3116_v47 = vsel %vm1291_vm2, %v5015_v26, 0.0 }
0x1076   : > { %3117 = vadd.xlane.f32.xlu1 %v3116_v47  ;;  %v3113_v48 = vsel %vm1287_vm3, %v5017_v46, 0.0 }
0x1077   : > { %3114 = vadd.xlane.f32.xlu0 %v3113_v48 }
0x107c   : > { %v5019_v49 = vpop.eup %5018 }
0x107d   : > { %v5021_v50 = vpop.eup %5020  ;;  %v3309_v28 = vsel %vm1291_vm2, %v5019_v49, 0.0 }
0x107e   : > { %3310 = vadd.xlane.f32.xlu1 %v3309_v28  ;;  %v3306_v60 = vsel %vm1287_vm3, %v5021_v50, 0.0 }
0x107f   : > { %3307 = vadd.xlane.f32.xlu0 %v3306_v60 }
0x10fb   : > { %v2843_v61 = vpop.xlane.xlu1 %2842 }
0x10fc   : > { %5022 = vrcp.f32 %v2843_v61  ;;  %v2840_v51 = vpop.xlane.xlu0 %2839  ;;  %v4128_v61 = vld [vmem:[#allocation20 + $0x1] ss:$0 sm:$0xff] }
0x10fd   : > { %5024 = vrcp.f32 %v2840_v51 }
0x10ff   : > { %v2736_v20 = vpop.xlane.xlu1 %2735 }
0x1100   : > { %v2733_v52 = vpop.xlane.xlu0 %2732 }
0x1101   : > { %5026 = vrcp.f32 %v2733_v52 }
0x1102   : > { %5028 = vrcp.f32 %v2736_v20 }
0x1103   : > { %v3118_v25 = vpop.xlane.xlu1 %3117 }
0x1104   : > { %v3115_v53 = vpop.xlane.xlu0 %3114 }
0x1105   : > { %5030 = vrcp.f32 %v3115_v53  ;;  %v4129_v53 = vld [vmem:[#allocation21 + $0x1] ss:$0 sm:$0xff] }
0x1106   : > { %v5023_v54 = vpop.eup %5022  ;;  %5032 = vrcp.f32 %v3118_v25  ;;  %v4133_v25 = vld [vmem:[%s6709_s10 + $0x40] sm:$0xff] }
0x1107   : > { %v5025_v55 = vpop.eup %5024  ;;  %v2847_v56 = vmul.f32 %v5023_v54, %v5007_v32 }
0x1108   : > { %v2846_v62 = vmul.f32 %v5025_v55, %v5009_v34 }
0x110a   : > { %4476 = vmatprep.mubr.msk.f32.mxu0 %vm1287_vm3, %v2846_v62 }
0x110b   : > { %v5027_v57 = vpop.eup %5026  ;;  %4477 = vmatmul.mubr.msk.f32.vlgmr.msra.gmra.mrb[16].mxu0 %vm1287_vm3, %v2847_v56  ;;  %v3311_v1 = vpop.xlane.xlu1 %3310 }
0x110c   : > { %4706 = vmatpush3.bf16.msk.msra.mxu0 %vm6206_vm15, %v6413_v43  ;;  %v3308_v36 = vpop.xlane.xlu0 %3307  ;;  %v2739_v58 = vmul.f32 %v5027_v57, %v5013_v42  ;;  %v5029_v59 = vpop.eup %5028  ;;  %v3548_v42 = vld [vmem:[#allocation23 + $0x28] sm:$0xff] }
0x110d   : > { %4715 = vmatprep.subr.msk.bf16.mxu0 %vm6206_vm15, %v6415_v19  ;;  %5034 = vrcp.f32 %v3308_v36  ;;  %v2740_v0 = vmul.f32 %v5029_v59, %v5011_v15  ;;  %v4739_v16 = vpack.c.bf16 %v3548_v42, %v3547_v18  ;;  %v4134_v57 = vld [vmem:[%s6709_s10 + $0x48] sm:$0xff]  ;;  %v4136_v59 = vld [vmem:[%s6709_s10 + $0x58] sm:$0xff] }
0x110e   : > { %4483 = vmatprep.mubr.msk.f32.mxu0 %vm1287_vm3, %v2739_v58  ;;  %5036 = vrcp.f32 %v3311_v1  ;;  %v4747_v36 = vpack.c.bf16 %v4134_v57, %v4133_v25  ;;  %v4135_v58 = vld [vmem:[%s6709_s10 + $0x50] sm:$0xff]  ;;  %v4138_v1 = vld [vmem:[%s6709_s10 + $0x68] sm:$0xff] }
0x110f   : > { %v5031_v63 = vpop.eup %5030  ;;  %4740 = vmatprep.subr.bf16.mxu1 %v4739_v16 }
0x1110   : > { %v3121_v3 = vmul.f32 %v5031_v63, %v5017_v46  ;;  %v5033_v43 = vpop.eup %5032  ;;  %4742 = vmatpush3.bf16.msra.mxu1 %v4739_v16  ;;  %v4751_v63 = vpack.c.bf16 %v4136_v59, %v4135_v58  ;;  %v4146_v16 = vld [vmem:[%s6712_s20] ss:$0 sm:$0xff] }
0x1111   : > { %v3122_v9 = vmul.f32 %v5033_v43, %v5015_v26  ;;  %v4743_v26 = vpack.c.bf16 %v3550_v45, %v3549_v44  ;;  %v4139_v43 = vld [vmem:[%s6709_s10 + $0x70] sm:$0xff] }
0x1112   : > { %v4759_v7 = vpack.c.bf16 %v4140_v6, %v4139_v43 }
0x1113   : > { %4484 = vmatmul.mubr.msk.f32.vlgmr.msra.gmra.mrb[16].mxu0 %vm1287_vm3, %v2740_v0  ;;  %4744 = vmatprep.subr.bf16.mxu1 %v4743_v26  ;;  %v4137_v0 = vld [vmem:[%s6709_s10 + $0x60] sm:$0xff]  ;;  %s6553_s10 = scalar_lea.hbm %s6714_s6, %s4148_s24 }
0x1114   : > { %4718 = vmatpush3.bf16.msk.msra.mxu0 %vm6206_vm15, %v6415_v19  ;;  %4497 = vmatprep.mubr.msk.f32.mxu0 %vm1287_vm3, %v3121_v3  ;;  %v4755_v3 = vpack.c.bf16 %v4138_v1, %v4137_v0 }
0x1115   : > { %4727 = vmatprep.subr.msk.bf16.mxu0 %vm6206_vm15, %v6417_v2  ;;  %4746 = vmatpush3.bf16.msra.mxu1 %v4743_v26 }
0x1117   : > { %v5035_v8 = vpop.eup %5034 }
0x1118   : > { %v3314_v11 = vmul.f32 %v5035_v8, %v5021_v50  ;;  %v5037_v19 = vpop.eup %5036  ;;  %v4130_v8 = vld [vmem:[#allocation24 + $0x1] ss:$0 sm:$0xff] }
0x1119   : > { %v3315_v14 = vmul.f32 %v5037_v19, %v5019_v49 }
0x111b   : > { %4498 = vmatmul.mubr.msk.f32.vlgmr.msra.gmra.mrb[16].mxu0 %vm1287_vm3, %v3122_v9 }
0x111c   : > { %4730 = vmatpush3.bf16.msk.msra.mxu0 %vm6206_vm15, %v6417_v2  ;;  %4511 = vmatprep.mubr.msk.f32.mxu0 %vm1287_vm3, %v3314_v11 }
0x111d   : > { %4732 = vmatprep.subr.bf16.mxu0 %v4731_v10 }
0x1123   : > { %4512 = vmatmul.mubr.msk.f32.vlgmr.msra.gmra.mrb[16].mxu0 %vm1287_vm3, %v3315_v14 }
0x1124   : > { %4734 = vmatpush3.bf16.msra.mxu0 %v4731_v10 }
0x1125   : > { %4736 = vmatprep.subr.bf16.mxu0 %v4735_v17 }
0x1128   : > { %4738 = vmatpush3.bf16.msra.mxu0 %v4735_v17 }
0x1129   : > { %4748 = vmatprep.subr.bf16.mxu0 %v4747_v36 }
0x11f6   : > { %v4513_v21 = vpop.f32.mrb[16].mxu0 }
0x11f7   : > { %v3393_v22 = vpop.f32.mrb[17].mxu0 }
0x11f8   : > { %4522 = vmatprep.mubr.msk.f32.mxu0 %vm860_vm1, %v3393_v22 }
0x11f9   : > { %4523 = vmatmul.mubr.msk.f32.vlgmr.msra.gmra.mrb[18].mxu0 %vm860_vm1, %v4513_v21 }
0x11fa   : > { %4750 = vmatpush3.bf16.msra.mxu0 %v4747_v36 }
0x11fb   : > { %4752 = vmatprep.subr.bf16.mxu0 %v4751_v63 }
0x11fe   : > { %4754 = vmatpush3.bf16.msra.mxu0 %v4751_v63 }
0x11ff   : > { %4756 = vmatprep.subr.bf16.mxu0 %v4755_v3 }
0x1202   : > { %4758 = vmatpush3.bf16.msra.mxu0 %v4755_v3 }
0x1203   : > { %4760 = vmatprep.subr.bf16.mxu0 %v4759_v7 }
0x1206   : > { %4762 = vmatpush3.bf16.msra.mxu0 %v4759_v7 }
0x12cc   : > { %v4524_v2 = vpop.f32.mrb[18].mxu0 }
0x12cd   : > { %v3495_v23 = vadd.f32 %v4524_v2, %v4125_v27  ;;  %v3489_v24 = vpop.f32.mrb[19].mxu0 }
0x12ce   : > { %v3490_v29 = vadd.f32 %v4125_v27, %v3489_v24 }
0x12cf   : > { %v3499_v30 = vadd.f32 %v3495_v23, %v6348_v4 }
0x12d0   : > { %v6499_v5 = vadd.f32 %v3490_v29, %v6351_v33  ;;  %v4142_v29 = vld [vmem:[%s6710_s5 + $0x1] ss:$0 sm:$0xff] }
0x12d1   : > { %v3507_v31 = vsel %vm863_vm0, %v3499_v30, 0.0 }
0x12d2   : > { %3508 = vadd.xlane.f32.xlu1 %v3507_v31  ;;  %v3504_v32 = vsel %vm860_vm1, %v6499_v5, 0.0 }
0x12d3   : > { %3505 = vadd.xlane.f32.xlu0 %v3504_v32 }
0x135f   : > { %v3509_v34 = vpop.xlane.xlu1 %3508 }
0x1360   : > { %v3511_v35 = vmul.f32 0.03125, %v3509_v34  ;;  %v3506_v37 = vpop.xlane.xlu0 %3505 }
0x1361   : > { %v3510_v38 = vmul.f32 0.03125, %v3506_v37 }
0x1362   : > { %v3513_v39 = vsub.f32 %v3499_v30, %v3511_v35 }
0x1363   : > { %v3512_v40 = vsub.f32 %v6499_v5, %v3510_v38 }
0x1364   : > { %v3515_v41 = vmul.f32 %v3513_v39, %v3513_v39 }
0x1365   : > { %v3514_v15 = vmul.f32 %v3512_v40, %v3512_v40 }
0x1366   : > { %v3519_v4 = vsel %vm863_vm0, %v3515_v41, 0.0 }
0x1367   : > { %3520 = vadd.xlane.f32.xlu1 %v3519_v4  ;;  %v3516_v33 = vsel %vm860_vm1, %v3514_v15, 0.0 }
0x1368   : > { %3517 = vadd.xlane.f32.xlu0 %v3516_v33 }
0x13f4   : > { %v3521_v46 = vpop.xlane.xlu1 %3520 }
0x13f5   : > { %v3523_v47 = vmul.f32 0.03125, %v3521_v46  ;;  %v3518_v48 = vpop.xlane.xlu0 %3517 }
0x13f6   : > { %v3522_v49 = vmul.f32 0.03125, %v3518_v48 }
0x13f7   : > { %v3525_v50 = vadd.f32 1e-06, %v3523_v47 }
0x13f8   : > { %v3524_v28 = vadd.f32 1e-06, %v3522_v49 }
0x13f9   : > { %5038 = vrsqrt.f32 %v3525_v50 }
0x13fa   : > { %5040 = vrsqrt.f32 %v3524_v28 }
0x1403   : > { %v5039_v60 = vpop.eup %5038 }
0x1404   : > { %v5041_v51 = vpop.eup %5040  ;;  %v3529_v52 = vmul.f32 %v5039_v60, %v3513_v39 }
0x1405   : > { %v3528_v20 = vmul.f32 %v5041_v51, %v3512_v40 }
0x1406   : > { %v3537_v54 = vmul.f32 %v4128_v61, %v3529_v52 }
0x1407   : > { %v3536_v55 = vmul.f32 %v4128_v61, %v3528_v20 }
0x1408   : > { %v3545_v56 = vadd.f32 %v4129_v53, %v3537_v54 }
0x1409   : > { %v3544_v62 = vadd.f32 %v4129_v53, %v3536_v55 }
0x140b   : > { %4533 = vmatprep.mubr.msk.f32.mxu1 %vm860_vm1, %v3544_v62 }
0x140c   : > { %4534 = vmatmul.mubr.msk.f32.vlgmr.msra.gmra.mrb[20].mxu1 %vm860_vm1, %v3545_v56 }
0x14df   : > { %v4535_v9 = vpop.f32.mrb[20].mxu1 }
0x14e0   : > { %v3637_v10 = vadd.f32 %v4535_v9, %v4130_v8  ;;  %v3631_v11 = vpop.f32.mrb[21].mxu1 }
0x14e1   : > { %v3632_v19 = vadd.f32 %v4130_v8, %v3631_v11 }
0x14e2   : > { %v3643_v12 = vmul.f32 0.70710677, %v3637_v10  ;;  %v3641_v2 = vmul.f32 0.5, %v3637_v10 }
0x14e3   : > { %v3642_v13 = vmul.f32 0.70710677, %v3632_v19  ;;  %v3640_v22 = vmul.f32 0.5, %v3632_v19 }
0x14e4   : > { %5042 = verf.f32 %v3643_v12 }
0x14e5   : > { %5044 = verf.f32 %v3642_v13 }
0x14ee   : > { %v5043_v14 = vpop.eup %5042 }
0x14ef   : > { %v5045_v17 = vpop.eup %5044  ;;  %v3647_v21 = vadd.f32 1.0, %v5043_v14 }
0x14f0   : > { %v3646_v27 = vadd.f32 1.0, %v5045_v17 }
0x14f1   : > { %v3649_v24 = vmul.f32 %v3647_v21, %v3641_v2 }
0x14f2   : > { %v3648_v23 = vmul.f32 %v3646_v27, %v3640_v22 }
0x14f4   : > { %4552 = vmatprep.mubr.msk.f32.mxu0 %vm2230_vm4, %v3648_v23 }
0x14f5   : > { %4553 = vmatmul.mubr.msk.f32.vlgmr.msra.gmra.mrb[20].mxu0 %vm2230_vm4, %v3649_v24 }
0x15c8   : > { %v4554_v30 = vpop.f32.mrb[20].mxu0 }
0x15c9   : > { %v3739_v31 = vpop.f32.mrb[21].mxu0 }
0x15ca   : > { %v3740_v32 = vadd.f32 %v4142_v29, %v3739_v31 }
0x15cc   : > { %v3747_v34 = vadd.f32 %v3740_v32, %v6499_v5  ;;  %v4145_v5 = vld [vmem:[%s6711_s23] ss:$0 sm:$0xff]  ;;  %s5446_s23 = sshll.u32 %s5558_s29, 4  ;;  %s5447_s23 = int_to_ptr.vmem [resolvable:$false] %s5446_s23 }
0x15cd   : > { %s5448_s21 = scalar_lea.vmem %s5447_s23, 256  ;;  %p5449_p10 = scmp.lt.s32.totalorder %s6555_s1, %s5447_s23 }
0x15ce   : > { %v3750_v35 = vsel %vm860_vm1, %v3747_v34, 0.0  ;;  %p5450_p12 = scmp.lt.s32.totalorder %s5448_s21, %s5442_s3 }
0x15cf   : > { %3751 = vadd.xlane.f32.xlu0 %v3750_v35 }
0x15d0   : > { %p5451_p11 = por %p5450_p12, %p5449_p10 }
0x15d2   : > { %p5452_p13 = pnand %p5451_p11, %p5445_p8 }
0x165c   : > { %v3752_v37 = vpop.xlane.xlu0 %3751 }
0x165d   : > { %v3753_v38 = vmul.f32 0.03125, %v3752_v37 }
0x165f   : > { %v3754_v39 = vsub.f32 %v3747_v34, %v3753_v38 }
0x1661   : > { %v3755_v40 = vmul.f32 %v3754_v39, %v3754_v39 }
0x1663   : > { %v3756_v41 = vsel %vm860_vm1, %v3755_v40, 0.0 }
0x1664   : > { %3757 = vadd.xlane.f32.xlu1 %v3756_v41 }
0x16f1   : > { %v3758_v15 = vpop.xlane.xlu1 %3757 }
0x16f2   : > { %v3759_v4 = vmul.f32 0.03125, %v3758_v15 }
0x16f4   : > { %v3760_v33 = vadd.f32 1e-06, %v3759_v4 }
0x16f6   : > { %5046 = vrsqrt.f32 %v3760_v33 }
0x1700   : > { %v5047_v18 = vpop.eup %5046 }
0x1701   : > { %v3762_v42 = vmul.f32 %v5047_v18, %v3754_v39 }
0x1703   : > { %v3769_v44 = vmul.f32 %v4145_v5, %v3762_v42 }
0x1705   : > { %v3776_v45 = vadd.f32 %v4146_v16, %v3769_v44 }
0x1707   : > { %3777 = vst.msk [vmem:[%s856_s12] sm:$0xff] %vm860_vm1, %v3776_v45 }
0x1708   : > { %5455 = shalt.err (!%p5452_p13)
}
0x1709   : > { %s5456_s9 = scalar_lea.hbm %s6553_s10, 128  ;;  %s5460_s11 = scalar_lea.hbm %s6714_s6, 256 }
0x170a   : > { %p5457_p5 = scmp.ne.s32.totalorder %s6553_s10, %s5456_s9  ;;  %p5461_p1 = scmp.lt.u32.totalorder %s6553_s10, %s6714_s6 }
0x170b   : > { %p5462_p3 = scmp.lt.u32.totalorder %s5460_s11, %s5456_s9  ;;  %p5464_p6 = scmp.lt.u32.totalorder %s5456_s9, %s6553_s10 }
0x170c   : > { %p5458_p7 = pnand %p5457_p5, %p6715_p0 }
0x170d   : > { %p5463_p9 = por %p5462_p3, %p5461_p1 }
0x170e   : > { %p5459_p4 = pneg %p5458_p7 }
0x170f   : > { %p5465_p2 = por %p5464_p6, %p5463_p9 }
0x1711   : > { %p5466_p8 = pnand %p5465_p2, %p5459_p4 }
0x1713   : > { %5469 = shalt.err (!%p5466_p8)
}
0x1714   : > { %4829 = dma.vmem_to_hbm [thread:$0]  (%p6715_p0), %s6555_s1, 128, %s6553_s10, %s3779_s18  }
0x1715 PF: > { %s3804_s17 = sand.u32 1, %s5524_s2   ;;  %p6716_p10 = scmp.ne.s32.totalorder %s6683_s30, 0 }
0x1716   : > { %p6717_p12 = scmp.ge.s32.totalorder %s5536_s27, 2  ;;  %s3805_s12 = scalar_lea.sflag [#allocation5], %s3804_s17 }
0x1718   : > { %p4876_p11 = pnand %p6717_p12, %p6716_p10 }
0x171a   : > { %5519 = dma.done.wait (!%p4876_p11), %s3805_s12, 128  }
0x171b   : > { %5521 = vsyncadd (!%p4876_p11), %s3805_s12, 4294967168  ;;  %p41_p13 = scmp.ge.s32.totalorder %s6004_s4, 4   ;;  %s6718_s2 = smov %s5528_s25 }
0x171c   : > { %s6719_s25 = smov %s5532_s26  ;;  %s6720_s26 = smov %s6016_s8 }
0x171d   : > { %s6721_s27 = smov %s6004_s4  ;;  %43 = sbr.rel (!%p41_p13) target bundleno = 31 (0x1f), region = 217 }
0x1724   :  { %3810 = vsyncpa [#allocation4], 1 }
0x1725   :  { %3812 = vsyncpa [#allocation4 + $0x1], 1 }
0x1726   :  { %3813 = vsyncpa [#allocation7], 1 }
0x1727   :  { %3814 = vsyncpa [#allocation10], 1 }
0x1728   :  { %3815 = vsyncpa [#allocation13], 1 }
0x1729   :  { %3816 = vsyncpa [#allocation16], 1 }
0x172a   :  { %3817 = vsyncpa [#allocation19], 1 }
0x172b   :  { %3818 = vsyncpa [#allocation22], 1 }
0x172c   :  { %3819 = vsyncpa [#allocation25], 1 }
0x172d   :  { %3820 = vsyncpa [#allocation5], 1 }
0x172e   :  { %3822 = vsyncpa [#allocation5 + $0x1], 1 }

</bundles_post_ra>
